<compile_context>
chip_gen: v5e
topology: v5e:2x2
jax: 0.10.0
libtpu: 0.0.40
codegen_flags: <defaults>
</compile_context>

<pallas_src>
import functools

import numpy as np
import jax
import jax.numpy as jnp
from jax import lax
from jax.experimental import pallas as pl
from jax.experimental.pallas import tpu as pltpu


def _round_up(x, m):
    return ((x + m - 1) // m) * m


def _cdiv(a, b):
    return (a + b - 1) // b


def _pick_tile(size, requested, align):
    """Largest tile <= requested (aligned), balanced so padding is minimized."""
    cap = _round_up(size, align)
    t = min(_round_up(max(requested, align), align), cap)
    n = _cdiv(size, t)
    return _round_up(_cdiv(size, n), align)


def ftr_forward_kernel(basis_ref, a_ref, x_ref, out_ref, acc_ref, *, inv_t, nseg):
    # basis_ref: (TILE_M, R)   a_ref: (R, TILE_T)   x_ref: (TILE_M, TILE_T)
    # out_ref:   (TILE_M, 1)   resident across the T grid axis (written at last t)
    # acc_ref:   (TILE_M, 128) lane-dense running sum-of-squares scratch
    t = pl.program_id(1)

    @pl.when(t == 0)
    def _():
        acc_ref[...] = jnp.zeros_like(acc_ref)

    # (TILE_M, R) @ (R, TILE_T) on the MXU with f32 accumulation.
    q = jnp.dot(basis_ref[...], a_ref[...], preferred_element_type=jnp.float32)
    # front_fun == sigmoid, expressed via tanh so the transcendental runs on the
    # EUP slot: sigmoid(q) = 0.5*tanh(0.5*q) + 0.5 (exact at q == 0).
    xhat = 0.5 * jnp.tanh(0.5 * q) + 0.5
    d = xhat - x_ref[...].astype(jnp.float32)
    sq = d * d

    # Lane-group partial sums: static, lane-aligned 128-wide slices -> pure VPU
    # adds, no per-step XLU cross-lane reduce and no masked (TILE_M, 1) store.
    partial = sq[:, 0:128]
    for k in range(1, nseg):
        partial = partial + sq[:, k * 128:(k + 1) * 128]
    acc_ref[...] += partial

    @pl.when(t == pl.num_programs(1) - 1)
    def _():
        # Single cross-lane reduce per M tile; sum -> mean over the true T.
        out_ref[...] = jnp.sum(acc_ref[...], axis=-1, keepdims=True) * inv_t


def ftr_forward(basis, amplitude, a_coefs, x, *, tile_m=512, tile_t=2048):
    """Pallas implementation of FTR_network.forward(y=a_coefs, x)."""
    M, R = basis.shape
    Rt, T = a_coefs.shape
    assert Rt == R and x.shape == (M, T)

    # Fold the (trainable) amplitude into the small (R, T) operand once:
    # (basis * amp) @ a == basis @ (amp[:, None] * a).
    a_scaled = amplitude.astype(a_coefs.dtype)[:, None] * a_coefs

    # Tile sizes honoring the (8, 128) layout constraint, balanced to minimize
    # padding while staying close to the requested (large) tiles.
    tile_m = _pick_tile(M, tile_m, 8)
    # v7x megacore: give the "parallel" M axis >= 2 tiles so both TensorCores
    # get work (harmless on single-core v5e/v6e).
    if M >= 1024 and _cdiv(M, tile_m) < 2:
        tile_m = _round_up(_cdiv(M, 2), 8)
    tile_t = _pick_tile(T, tile_t, 128)

    M_pad = _round_up(M, tile_m)
    T_pad = _round_up(T, tile_t)

    if M_pad != M:
        basis = jnp.pad(basis, ((0, M_pad - M), (0, 0)))
        x = jnp.pad(x, ((0, M_pad - M), (0, 0)))
    if T_pad != T:
        a_scaled = jnp.pad(a_scaled, ((0, 0), (0, T_pad - T)))
        # Pad the time axis of x with 0.5 == sigmoid(0): padded columns have
        # q == 0 exactly, so (xhat - x)^2 == 0 there -> no in-kernel mask.
        x = jnp.pad(x, ((0, 0), (0, T_pad - T)), constant_values=0.5)

    grid = (M_pad // tile_m, T_pad // tile_t)
    nseg = tile_t // 128

    kernel = functools.partial(
        ftr_forward_kernel, inv_t=np.float32(1.0 / T), nseg=nseg)

    # VMEM budget: double-buffered input tiles + elementwise f32 temporaries
    # (q / xhat / d / sq) + lane-dense scratch + resident output block.
    b_item = basis.dtype.itemsize
    a_item = a_scaled.dtype.itemsize
    x_item = x.dtype.itemsize
    per_step = (2 * (tile_m * R * b_item + R * tile_t * a_item
                     + tile_m * tile_t * x_item)
                + 3 * tile_m * tile_t * 4          # elementwise f32 temporaries
                + tile_m * 128 * 4                 # accumulator scratch
                + 2 * tile_m * 4)                  # (tile_m, 1) output block
    try:
        vmem_cap = int(pltpu.get_tpu_info().vmem_capacity_bytes)
    except Exception:
        vmem_cap = 64 << 20                        # conservative (v7x per-core)
    vmem_limit = int(min(max(per_step + (4 << 20), 16 << 20),
                         int(0.7 * vmem_cap)))

    cost = pl.CostEstimate(
        flops=int(2 * M * R * T + 4 * M * T),
        transcendentals=int(M * T),
        # basis block index is constant across the T axis -> fetched once per
        # M tile; a_scaled is re-fetched once per M tile.
        bytes_accessed=int(x.size * x_item
                           + basis.size * b_item
                           + a_scaled.size * a_item * grid[0]
                           + M_pad * 4),
    )

    out = pl.pallas_call(
        kernel,
        out_shape=jax.ShapeDtypeStruct((M_pad, 1), jnp.float32),
        grid_spec=pltpu.PrefetchScalarGridSpec(
            num_scalar_prefetch=0,
            grid=grid,
            in_specs=[
                pl.BlockSpec((tile_m, R), lambda i, t: (i, 0)),       # basis
                pl.BlockSpec((R, tile_t), lambda i, t: (0, t)),       # amp-scaled a_coefs
                pl.BlockSpec((tile_m, tile_t), lambda i, t: (i, t)),  # x
            ],
            out_specs=pl.BlockSpec((tile_m, 1), lambda i, t: (i, 0)),
            scratch_shapes=[pltpu.VMEM((tile_m, 128), jnp.float32)],
        ),
        compiler_params=pltpu.CompilerParams(
            dimension_semantics=("parallel", "arbitrary"),
            vmem_limit_bytes=vmem_limit),
        cost_estimate=cost,
    )(basis, a_scaled, x)

    return out[:M, 0]


def ftr_forward_ref(basis, amplitude, a_coefs, x):
    q = jnp.dot(basis * amplitude[None, :], a_coefs, precision="highest")
    xhat = jax.nn.sigmoid(q)
    return jnp.mean((xhat - x) ** 2, axis=-1)


if __name__ == "__main__":
    key = jax.random.PRNGKey(0)
    k_phi, k_y, k_x = jax.random.split(key, 3)

    # Module-consistent shapes; M and T deliberately NOT multiples of the tile
    # sizes so the padding (0.5 time-pad), tile balancing and the multi-tile
    # grid (2 x 2) are exercised.
    M = 520          # spatial dimension of phi snapshots
    T_snap = 64      # number of snapshots used to build the basis (SVD of phi)
    rank = 8         # reduced rank
    T = 2200         # number of temporal evaluation points (trailing axis)

    # __init__: SVD of snapshot matrix phi -> basis = U[:, :rank], amplitude = S[:rank]
    phi = jax.random.normal(k_phi, (M, T_snap), dtype=jnp.float32)
    u, s, vt = jnp.linalg.svd(phi, full_matrices=False)
    basis = u[:, :rank]
    amplitude = s[:rank]

    # forward inputs: y (a_coefs) and data x
    a_coefs = 0.1 * jax.random.normal(k_y, (rank, T), dtype=jnp.float32)
    x = jax.random.normal(k_x, (M, T), dtype=jnp.float32)

    out = jax.block_until_ready(ftr_forward(basis, amplitude, a_coefs, x))
    ref = jax.block_until_ready(ftr_forward_ref(basis, amplitude, a_coefs, x))

    assert out.shape == (M,)
    np.testing.assert_allclose(np.asarray(out), np.asarray(ref), rtol=1e-4, atol=1e-5)
    print("KERNEL_OK")
</pallas_src>

<mosaic_0001>
module attributes {stable_mosaic.version = 11 : i64} {
  func.func @ftr_forward_kernel(%arg0: i32, %arg1: i32, %arg2: memref<264x8xf32, #tpu.memory_space<vmem>>, %arg3: memref<8x1152xf32, #tpu.memory_space<vmem>>, %arg4: memref<264x1152xf32, #tpu.memory_space<vmem>>, %arg5: memref<264x1xf32, #tpu.memory_space<vmem>>, %arg6: memref<264x128xf32, #tpu.memory_space<vmem>>) attributes {dimension_semantics = [#tpu.dimension_semantics<parallel>, #tpu.dimension_semantics<arbitrary>], iteration_bounds = array<i64: 2, 2>, scalar_prefetch = 0 : i64, scratch_operands = 1 : i64, tpu.core_type = #tpu.core_type<tc>, window_params = [{transform_indices = @transform_0, window_bounds = array<i64: 264, 8>}, {transform_indices = @transform_1, window_bounds = array<i64: 8, 1152>}, {transform_indices = @transform_2, window_bounds = array<i64: 264, 1152>}, {transform_indices = @transform_3, window_bounds = array<i64: 264, 1>}]} {
    %c0_i32 = arith.constant 0 : i32
    %0 = arith.cmpi eq, %arg1, %c0_i32 : i32
    %1 = arith.extui %0 : i1 to i32
    %c0_i32_0 = arith.constant 0 : i32
    %2 = arith.cmpi ne, %1, %c0_i32_0 : i32
    scf.if %2 {
      %cst_14 = arith.constant 0.000000e+00 : f32
      %39 = vector.broadcast %cst_14 : f32 to vector<264x128xf32>
      %c0_15 = arith.constant 0 : index
      %c0_16 = arith.constant 0 : index
      %40 = vector.load %arg6[%c0_15, %c0_16] : memref<264x128xf32, #tpu.memory_space<vmem>>, vector<264x128xf32>
      tpu.vector_store %arg6[%c0_15, %c0_16], %39 {strides = array<i32>} : memref<264x128xf32, #tpu.memory_space<vmem>>, vector<264x128xf32>,
    } else {
    }
    %c0 = arith.constant 0 : index
    %c0_1 = arith.constant 0 : index
    %3 = vector.load %arg2[%c0, %c0_1] : memref<264x8xf32, #tpu.memory_space<vmem>>, vector<264x8xf32>
    %c0_2 = arith.constant 0 : index
    %c0_3 = arith.constant 0 : index
    %4 = vector.load %arg3[%c0_2, %c0_3] : memref<8x1152xf32, #tpu.memory_space<vmem>>, vector<8x1152xf32>
    %cst = arith.constant dense<0.000000e+00> : vector<264x1152xf32>
    %5 = tpu.matmul %3, %4, %cst {dimension_numbers = #tpu.dot_dimension_numbers<[1], [0], [0], [1], [0, 0, 1, 1], [], []>} : vector<264x8xf32>, vector<8x1152xf32>, vector<264x1152xf32> -> vector<264x1152xf32>
    %cst_4 = arith.constant 5.000000e-01 : f32
    %6 = vector.broadcast %cst_4 : f32 to vector<264x1152xf32>
    %7 = arith.mulf %6, %5 : vector<264x1152xf32>
    %8 = math.tanh %7 : vector<264x1152xf32>
    %cst_5 = arith.constant 5.000000e-01 : f32
    %9 = vector.broadcast %cst_5 : f32 to vector<264x1152xf32>
    %10 = arith.mulf %9, %8 : vector<264x1152xf32>
    %cst_6 = arith.constant 5.000000e-01 : f32
    %11 = vector.broadcast %cst_6 : f32 to vector<264x1152xf32>
    %12 = arith.addf %10, %11 : vector<264x1152xf32>
    %c0_7 = arith.constant 0 : index
    %c0_8 = arith.constant 0 : index
    %13 = vector.load %arg4[%c0_7, %c0_8] : memref<264x1152xf32, #tpu.memory_space<vmem>>, vector<264x1152xf32>
    %14 = arith.subf %12, %13 : vector<264x1152xf32>
    %15 = arith.mulf %14, %14 : vector<264x1152xf32>
    %16 = vector.extract_strided_slice %15 {offsets = [0, 0], sizes = [264, 128], strides = [1, 1]} : vector<264x1152xf32> to vector<264x128xf32>
    %17 = vector.extract_strided_slice %15 {offsets = [0, 128], sizes = [264, 128], strides = [1, 1]} : vector<264x1152xf32> to vector<264x128xf32>
    %18 = arith.addf %16, %17 : vector<264x128xf32>
    %19 = vector.extract_strided_slice %15 {offsets = [0, 256], sizes = [264, 128], strides = [1, 1]} : vector<264x1152xf32> to vector<264x128xf32>
    %20 = arith.addf %18, %19 : vector<264x128xf32>
    %21 = vector.extract_strided_slice %15 {offsets = [0, 384], sizes = [264, 128], strides = [1, 1]} : vector<264x1152xf32> to vector<264x128xf32>
    %22 = arith.addf %20, %21 : vector<264x128xf32>
    %23 = vector.extract_strided_slice %15 {offsets = [0, 512], sizes = [264, 128], strides = [1, 1]} : vector<264x1152xf32> to vector<264x128xf32>
    %24 = arith.addf %22, %23 : vector<264x128xf32>
    %25 = vector.extract_strided_slice %15 {offsets = [0, 640], sizes = [264, 128], strides = [1, 1]} : vector<264x1152xf32> to vector<264x128xf32>
    %26 = arith.addf %24, %25 : vector<264x128xf32>
    %27 = vector.extract_strided_slice %15 {offsets = [0, 768], sizes = [264, 128], strides = [1, 1]} : vector<264x1152xf32> to vector<264x128xf32>
    %28 = arith.addf %26, %27 : vector<264x128xf32>
    %29 = vector.extract_strided_slice %15 {offsets = [0, 896], sizes = [264, 128], strides = [1, 1]} : vector<264x1152xf32> to vector<264x128xf32>
    %30 = arith.addf %28, %29 : vector<264x128xf32>
    %31 = vector.extract_strided_slice %15 {offsets = [0, 1024], sizes = [264, 128], strides = [1, 1]} : vector<264x1152xf32> to vector<264x128xf32>
    %32 = arith.addf %30, %31 : vector<264x128xf32>
    %c0_9 = arith.constant 0 : index
    %c0_10 = arith.constant 0 : index
    %33 = vector.load %arg6[%c0_9, %c0_10] : memref<264x128xf32, #tpu.memory_space<vmem>>, vector<264x128xf32>
    %34 = arith.addf %33, %32 : vector<264x128xf32>
    %c0_11 = arith.constant 0 : index
    %c0_12 = arith.constant 0 : index
    %35 = vector.load %arg6[%c0_11, %c0_12] : memref<264x128xf32, #tpu.memory_space<vmem>>, vector<264x128xf32>
    tpu.vector_store %arg6[%c0_11, %c0_12], %34 {strides = array<i32>} : memref<264x128xf32, #tpu.memory_space<vmem>>, vector<264x128xf32>,
    %c1_i32 = arith.constant 1 : i32
    %36 = arith.cmpi eq, %arg1, %c1_i32 : i32
    %37 = arith.extui %36 : i1 to i32
    %c0_i32_13 = arith.constant 0 : i32
    %38 = arith.cmpi ne, %37, %c0_i32_13 : i32
    scf.if %38 {
      %c0_14 = arith.constant 0 : index
      %c0_15 = arith.constant 0 : index
      %39 = vector.load %arg6[%c0_14, %c0_15] : memref<264x128xf32, #tpu.memory_space<vmem>>, vector<264x128xf32>
      %cst_16 = arith.constant dense<0.000000e+00> : vector<264xf32>
      %40 = vector.multi_reduction <add>, %39, %cst_16 [1] : vector<264x128xf32> to vector<264xf32>
      %41 = vector.shape_cast %40 : vector<264xf32> to vector<264x1xf32>
      %cst_17 = arith.constant 4.54545458E-4 : f32
      %42 = vector.broadcast %cst_17 : f32 to vector<264x1xf32>
      %43 = arith.mulf %41, %42 : vector<264x1xf32>
      %c0_18 = arith.constant 0 : index
      %c0_19 = arith.constant 0 : index
      %44 = vector.load %arg5[%c0_18, %c0_19] : memref<264x1xf32, #tpu.memory_space<vmem>>, vector<264x1xf32>
      tpu.vector_store %arg5[%c0_18, %c0_19], %43 {strides = array<i32>} : memref<264x1xf32, #tpu.memory_space<vmem>>, vector<264x1xf32>,
    } else {
    }
    return
  }
  func.func @transform_0(%arg0: i32, %arg1: i32) -> (i32, i32) {
    %c0_i32 = arith.constant 0 : i32
    %c0_i32_0 = arith.constant 0 : i32
    return %arg0, %c0_i32 : i32, i32
  }
  func.func @transform_1(%arg0: i32, %arg1: i32) -> (i32, i32) {
    %c0_i32 = arith.constant 0 : i32
    %c0_i32_0 = arith.constant 0 : i32
    return %c0_i32, %arg1 : i32, i32
  }
  func.func @transform_2(%arg0: i32, %arg1: i32) -> (i32, i32) {
    %c0_i32 = arith.constant 0 : i32
    return %arg0, %arg1 : i32, i32
  }
  func.func @transform_3(%arg0: i32, %arg1: i32) -> (i32, i32) {
    %c0_i32 = arith.constant 0 : i32
    %c0_i32_0 = arith.constant 0 : i32
    return %arg0, %c0_i32 : i32, i32
  }
}

</mosaic_0001>

<bundles_post_ra>
// kernel: tpu_custom_call.1
= control target key start
LH: loop header
LB: loop body
LE: loop exit
PB: predicated region body
PF: predicated region fallthrough
CT: control target
= control target key end

     0   :  { %s7330_s0 = inlined_call_operand.vmem [shape: f32[528,8], index: 0, kind: input, shape index: {}]   ;;  %s7331_s1 = inlined_call_operand.hbm [shape: f32[8,2304], index: 1, kind: input, shape index: {}]   ;;  %s7332_s2 = inlined_call_operand.hbm [shape: f32[528,2304], index: 2, kind: input, shape index: {}]   ;;  %s7333_s3 = inlined_call_operand.vmem [shape: f32[528,1], index: 3, kind: output, shape index: {}]  }
   0x1   :  { %7338 = sst [smem:[#allocation38_spill]] %s7331_s1 }
   0x2   :  { %8 = vsyncpa [#allocation4], 0 }
   0x3   :  { %10 = vsyncpa [#allocation4 + $0x1], 0 }
   0x4   :  { %11 = vsyncpa [#allocation6], 0 }
   0x5   :  { %13 = vsyncpa [#allocation6 + $0x1], 0  ;;  %s5466_s12 = smov 0   ;;  %s5468_s13 = smov 0  }
   0x6   :  { %s5470_s14 = smov 0   ;;  %s5472_s15 = smov 0  }
   0x7   :  { %s5474_s16 = smov 0   ;;  %s5476_s17 = smov 0  }
   0x8   :  { %s5478_s18 = smov 0   ;;  %s5480_s19 = smov 0  }
   0x9   :  { %s5482_s20 = smov 0   ;;  %s5484_s21 = smov 0  }
   0xa   :  { %s5486_s22 = smov 0  }
   0xb LB: > { %7339 = sst [smem:[#allocation9_spill]] %s5432_s20  ;;  %s4228_s23 = sadd.s32 4294967295, %s5440_s22   ;;  %s5440_s22 = sphi %s5486_s22, %s19_s22   ;;  %s5436_s21 = sphi %s5484_s21, %s7429_s21   ;;  %s5432_s20 = sphi %s5482_s20, %s7428_s20   ;;  %s5428_s19 = sphi %s5480_s19, %s7437_s19   ;;  %s5424_s18 = sphi %s5478_s18, %s7436_s18   ;;  %s5420_s17 = sphi %s5476_s17, %s7435_s17   ;;  %s5416_s16 = sphi %s5474_s16, %s7434_s16   ;;  %s5412_s15 = sphi %s5472_s15, %s7433_s15   ;;  %s5408_s14 = sphi %s5470_s14, %s7432_s14   ;;  %s5404_s13 = sphi %s5468_s13, %s7431_s13   ;;  %s5400_s12 = sphi %s5466_s12, %s7430_s12  }
   0xc   : > { %7340 = sst [smem:[#allocation10_spill]] %s5436_s21  ;;  %s28_s24 = sadd.s32 1, %s5432_s20 }
   0xd   : > { %p29_p0 = scmp.ge.s32.totalorder %s28_s24, 2  ;;  %s31_s25 = sadd.s32 1, %s5436_s21 }
   0xe   : > { %s64_s26 = sadd.s32 1, %s5420_s17  ;;  %p71_p1 = scmp.ne.s32.totalorder %s5420_s17, %s5416_s16 }
   0xf   : > { %s7439_s24 = smov (%p29_p0, %s28_s24), 0  ;;  %s7441_s25 = smov (!%p29_p0, %s31_s25), %s5436_s21 }
  0x10   : > { %7341 = sst [smem:[#allocation11_spill]] %s7439_s24  ;;  %s61_s27 = ssub.s32 %s5432_s20, %s7439_s24 }
  0x11   : > { %p72_p2 = scmp.eq.s32.totalorder %s5440_s22, 0  ;;  %p33_p3 = scmp.ge.s32.totalorder %s7441_s25, 2 }
  0x12   : > { %p62_p4 = scmp.eq.s32.totalorder %s61_s27, 0  ;;  %p77_p6 = scmp.ne.s32.totalorder %s5416_s16, %s5412_s15 }
  0x13   : > { %p5533_p5 = por %p72_p2, %p71_p1  ;;  %s7443_s25 = smov (%p33_p3, %s7441_s25), 0 }
  0x14   : > { %7343 = sst [smem:[#allocation12_spill]] %s7443_s25  ;;  %p78_p7 = scmp.eq.s32.totalorder %s4228_s23, 0 }
  0x15   : > { %s5541_s29 = scalar_select %p62_p4, %s5420_s17, %s64_s26  }
  0x16   : > { %s87_s30 = ssub.s32 %s5436_s21, %s7443_s25  ;;  %s92_s5 = sadd.s32 1, %s5408_s14 }
  0x17   : > { %7344 = sst [smem:[#allocation13_spill]] %s5541_s29  ;;  %s89_s4 = sor.u32 %s87_s30, %s61_s27 }
  0x18   : > { %p5546_p8 = por %p78_p7, %p77_p6  ;;  %p90_p9 = scmp.eq.s32.totalorder %s89_s4, 0 }
  0x19   : > { %p99_p10 = scmp.ne.s32.totalorder %s5408_s14, %s5404_s13  ;;  %p105_p11 = scmp.ne.s32.totalorder %s5404_s13, %s5400_s12 }
  0x1a   : > { %s5555_s7 = scalar_select %p90_p9, %s5408_s14, %s92_s5  }
  0x1b   : > { %p5559_p12 = por %p99_p10, %p72_p2  ;;  %p5563_p13 = por %p105_p11, %p78_p7 }
  0x1c   : > { %p4558_p0 = scmp.lt.s32.totalorder %s5440_s22, 4  ;;  %s164_s10 = sand.u32 1, %s5420_s17  }
  0x1d   : > { %s4538_s11 = smul.u32 72, %s5432_s20  ;;  %s7348_s1 = sld [smem:[#allocation38_spill]] }
  0x1e   : > { %s4542_s12 = smul.u32 72, %s164_s10  ;;  %p4552_p1 = pnand %p4558_p0, %p5533_p5 }
  0x1f   : > { %s165_s5 = scalar_lea.sflag [#allocation4], %s164_s10  ;;  %p5581_p2 = pnand %p4558_p0, %p5559_p12 }
  0x20   : > { %s168_s30 = scalar_lea.vmem [#allocation3], %s4542_s12  ;;  %s190_s24 = smul.u32 9, %s5432_s20 }
  0x21   : > { %s177_s4 = sshll.u32 %s168_s30, 4  ;;  %p4234_p3 = scmp.ge.s32.totalorder %s5440_s22, 1  ;;  %s178_s4 = int_to_ptr.vmem [resolvable:$true] %s177_s4 }
  0x22   : > { %p207_p4 = scmp.lt.s32.totalorder %s5440_s22, 5  ;;  %s4559_s28 = smul.u32 594, %s5436_s21 }
  0x23   : > { %s173_s26 = scalar_lea.hbm %s7348_s1, %s4538_s11  ;;  %s184_s11 = sand.u32 1, %s5408_s14  }
  0x24   : > { %s175_s27 = sshll.u32 %s173_s26, 4  ;;  %p5590_p5 = pnand %p4234_p3, %p207_p4  ;;  %s176_s27 = int_to_ptr.hbm [resolvable:$true] %s175_s27 }
  0x25   : > { %4554 = dma.hbm_to_vmem [thread:$0]  (!%p4552_p1), %s176_s27, 1152, %s178_s4, %s165_s5  }
  0x26   : > { %s4543_s12 = smul.u32 2376, %s184_s11  ;;  %s194_s23 = sadd.s32 %s4559_s28, %s190_s24 }
  0x27   : > { %s4233_s10 = sshll.u32 %s194_s23, 3  ;;  %s185_s1 = scalar_lea.sflag [#allocation6], %s184_s11 }
  0x28   : > { %s196_s27 = scalar_lea.hbm %s7332_s2, %s4233_s10  ;;  %s188_s4 = scalar_lea.vmem [#allocation5], %s4543_s12 }
  0x29   : > { %s197_s30 = sshll.u32 %s196_s27, 4  ;;  %s199_s5 = sshll.u32 %s188_s4, 4  ;;  %s198_s30 = int_to_ptr.hbm [resolvable:$true] %s197_s30  ;;  %s200_s5 = int_to_ptr.vmem [resolvable:$true] %s199_s5 }
  0x2a   : > { %s5442_s20 = smov 2304   ;;  %s5443_s29 = smov 1152  }
  0x2b   : > { %s5444_s21 = smov 72   ;;  %211 = sbr.rel (%p5590_p5) target bundleno = 1053 (0x41d), region = 32 }
  0x2c   : > { %4557 = dma.hbm_to_vmem [thread:$0]  (!%p5581_p2), %s198_s30, 38016, %s200_s5, %s185_s1, %s5442_s20, %s5443_s29, %s5444_s21  }
  0x30   : > { %s213_s24 = sand.u32 1, %s5416_s16  }
  0x31   : > { %s4545_s28 = smul.u32 72, %s213_s24  ;;  %s214_s23 = scalar_lea.sflag [#allocation4], %s213_s24 }
  0x33   : > { %s5602_s10 = scalar_lea.vmem [#allocation3], %s4545_s28 }
  0x34   : > { %5391 = dma.done.wait (%p5546_p8), %s214_s23, 1152  }
  0x35   : > { %5393 = vsyncadd (%p5546_p8), %s214_s23, 4294966144  ;;  %s223_s11 = sand.u32 1, %s5404_s13  }
  0x36   : > { %s4546_s25 = smul.u32 2376, %s223_s11  ;;  %s224_s1 = scalar_lea.sflag [#allocation6], %s223_s11 }
  0x38   : > { %s5609_s20 = scalar_lea.vmem [#allocation5], %s4546_s25 }
  0x39   : > { %5395 = dma.done.wait (%p5563_p13), %s224_s1, 38016  }
  0x3a   : > { %5397 = vsyncadd (%p5563_p13), %s224_s1, 4294929280  ;;  %s261_s21 = smul.u32 33, %s5428_s19  ;;  %p4237_p7 = scmp.ne.s32.totalorder %s5424_s18, 0 }
  0x3c   : > { %p262_p6 = scmp.lt.s32.totalorder %s261_s21, 65  ;;  %279 = sbr.rel (%p4237_p7) target bundleno = 99 (0x63), region = 44 }
  0x3e   : > { %s7445_s21 = smov (!%p262_p6, %s261_s21), 65 }
  0x3f   : > { %s4235_s29 = sshll.u32 %s7445_s21, 3 }
  0x40   : > { %s5619_s12 = scalar_lea.vmem %s7330_s0, %s4235_s29  ;;  %s5624_s27 = scalar_lea.vmem %s7333_s3, %s4235_s29 }
  0x41   : > { %v5445_v0 = vmov 0.0  }
  0x42   : > { %280 = vst [vmem:[#allocation2 + $0xb0] sm:$0xff] %v5445_v0 }
  0x43   : > { %281 = vst [vmem:[#allocation2] sm:$0xff] %v5445_v0 }
  0x44   : > { %282 = vst [vmem:[#allocation2 + $0xd8] sm:$0xff] %v5445_v0 }
  0x45   : > { %283 = vst [vmem:[#allocation2 + $0x18] sm:$0xff] %v5445_v0 }
  0x46   : > { %284 = vst [vmem:[#allocation2 + $0x50] sm:$0xff] %v5445_v0 }
  0x47   : > { %285 = vst [vmem:[#allocation2 + $0x68] sm:$0xff] %v5445_v0 }
  0x48   : > { %286 = vst [vmem:[#allocation2 + $0x30] sm:$0xff] %v5445_v0 }
  0x49   : > { %287 = vst [vmem:[#allocation2 + $0x48] sm:$0xff] %v5445_v0 }
  0x4a   : > { %288 = vst [vmem:[#allocation2 + $0x80] sm:$0xff] %v5445_v0 }
  0x4b   : > { %289 = vst [vmem:[#allocation2 + $0x88] sm:$0xff] %v5445_v0 }
  0x4c   : > { %290 = vst [vmem:[#allocation2 + $0xe8] sm:$0xff] %v5445_v0 }
  0x4d   : > { %291 = vst [vmem:[#allocation2 + $0x100] sm:$0xff] %v5445_v0 }
  0x4e   : > { %292 = vst [vmem:[#allocation2 + $0xc0] sm:$0xff] %v5445_v0 }
  0x4f   : > { %293 = vst [vmem:[#allocation2 + $0x28] sm:$0xff] %v5445_v0 }
  0x50   : > { %294 = vst [vmem:[#allocation2 + $0xf8] sm:$0xff] %v5445_v0 }
  0x51   : > { %295 = vst [vmem:[#allocation2 + $0xb8] sm:$0xff] %v5445_v0 }
  0x52   : > { %296 = vst [vmem:[#allocation2 + $0x40] sm:$0xff] %v5445_v0 }
  0x53   : > { %297 = vst [vmem:[#allocation2 + $0x90] sm:$0xff] %v5445_v0 }
  0x54   : > { %298 = vst [vmem:[#allocation2 + $0x60] sm:$0xff] %v5445_v0 }
  0x55   : > { %299 = vst [vmem:[#allocation2 + $0x38] sm:$0xff] %v5445_v0 }
  0x56   : > { %300 = vst [vmem:[#allocation2 + $0xd0] sm:$0xff] %v5445_v0 }
  0x57   : > { %301 = vst [vmem:[#allocation2 + $0x20] sm:$0xff] %v5445_v0 }
  0x58   : > { %302 = vst [vmem:[#allocation2 + $0x98] sm:$0xff] %v5445_v0 }
  0x59   : > { %303 = vst [vmem:[#allocation2 + $0x78] sm:$0xff] %v5445_v0 }
  0x5a   : > { %304 = vst [vmem:[#allocation2 + $0xc8] sm:$0xff] %v5445_v0 }
  0x5b   : > { %305 = vst [vmem:[#allocation2 + $0x8] sm:$0xff] %v5445_v0 }
  0x5c   : > { %306 = vst [vmem:[#allocation2 + $0x10] sm:$0xff] %v5445_v0 }
  0x5d   : > { %307 = vst [vmem:[#allocation2 + $0xe0] sm:$0xff] %v5445_v0 }
  0x5e   : > { %308 = vst [vmem:[#allocation2 + $0x70] sm:$0xff] %v5445_v0 }
  0x5f   : > { %309 = vst [vmem:[#allocation2 + $0xa8] sm:$0xff] %v5445_v0 }
  0x60   : > { %310 = vst [vmem:[#allocation2 + $0x58] sm:$0xff] %v5445_v0 }
  0x61   : > { %311 = vst [vmem:[#allocation2 + $0xf0] sm:$0xff] %v5445_v0 }
  0x62   : > { %312 = vst [vmem:[#allocation2 + $0xa0] sm:$0xff] %v5445_v0 }
  0x63 PF: > { %v346_v1 = vld [vmem:[%s5602_s10] sm:$0xff]  ;;  %vm355_vm0 = vcmask 64512   ;;  %v348_v4 = vld [vmem:[%s5602_s10 + $0x10] sm:$0xff]  ;;  %v347_v5 = vld [vmem:[%s5602_s10 + $0x8] sm:$0xff]  ;;  %p4535_p8 = scmp.ne.s32.totalorder %s5424_s18, 1 }
  0x64   : > { %v5629_v2 = vld [vmem:[%s5619_s12 + $0x48] sm:$0xff]  ;;  %v5632_v3 = vld [vmem:[%s5619_s12 + $0x90] sm:$0xff]  ;;  %4539 = vmatpush.msra.mxu1 %v346_v1  ;;  %4540 = vmatpush.msra.mxu2 %v346_v1  ;;  %v5641_v6 = vld [vmem:[%s5619_s12] sm:$0xff] }
  0x65   : > { %4247 = vmatmul.msk.f32.vlgmr.msra.gmra.mxu1 %vm355_vm0, %v5629_v2  ;;  %4256 = vmatmul.msk.f32.vlgmr.msra.gmra.mxu2 %vm355_vm0, %v5632_v3  ;;  %v350_v7 = vld [vmem:[%s5602_s10 + $0x20] sm:$0xff]  ;;  %v340_v8 = vld [vmem:[%s5619_s12 + $0xd8] sm:$0xff]  ;;  %v349_v9 = vld [vmem:[%s5602_s10 + $0x18] sm:$0xff] }
  0x66   : > { %702 = vmatpush.msrb.mxu2 %v348_v4  ;;  %586 = vmatpush.msrb.mxu1 %v347_v5  ;;  %v5650_v10 = vld [vmem:[%s5619_s12 + $0x50] sm:$0xff]  ;;  %v5653_v11 = vld [vmem:[%s5619_s12 + $0x98] sm:$0xff]  ;;  %v5660_v12 = vld [vmem:[%s5619_s12 + $0x8] sm:$0xff] }
  0x67   : > { %470 = vmatpush.msra.mxu0 %v346_v1  ;;  %4541 = vmatpush.msra.mxu3 %v346_v1  ;;  %v341_v13 = vld [vmem:[%s5619_s12 + $0xe0] sm:$0xff]  ;;  %v5667_v14 = vld [vmem:[%s5619_s12 + $0x58] sm:$0xff]  ;;  %v5677_v16 = vld [vmem:[%s5619_s12 + $0x10] sm:$0xff] }
  0x68   : > { %4238 = vmatmul.msk.f32.vlgmr.msra.gmra.mxu0 %vm355_vm0, %v5641_v6  ;;  %4265 = vmatmul.msk.f32.vlgmr.msra.gmra.mxu3 %vm355_vm0, %v340_v8  ;;  %v5670_v15 = vld [vmem:[%s5619_s12 + $0xa0] sm:$0xff]  ;;  %v342_v17 = vld [vmem:[%s5619_s12 + $0xe8] sm:$0xff]  ;;  %v5694_v20 = vld [vmem:[%s5619_s12 + $0x18] sm:$0xff] }
  0x69   : > { %934 = vmatpush.msrb.mxu0 %v350_v7  ;;  %818 = vmatpush.msrb.mxu3 %v349_v9  ;;  %v5684_v18 = vld [vmem:[%s5619_s12 + $0x60] sm:$0xff]  ;;  %v5687_v19 = vld [vmem:[%s5619_s12 + $0xa8] sm:$0xff]  ;;  %v343_v21 = vld [vmem:[%s5619_s12 + $0xf0] sm:$0xff] }
  0x6a   : > { %v5701_v22 = vld [vmem:[%s5619_s12 + $0x68] sm:$0xff]  ;;  %v5704_v23 = vld [vmem:[%s5619_s12 + $0xb0] sm:$0xff]  ;;  %v317_v24 = vld [vmem:[%s5619_s12 + $0x20] sm:$0xff] }
  0x6b   : > { %v344_v25 = vld [vmem:[%s5619_s12 + $0xf8] sm:$0xff]  ;;  %v5715_v26 = vld [vmem:[%s5619_s12 + $0x70] sm:$0xff]  ;;  %v318_v28 = vld [vmem:[%s5619_s12 + $0x28] sm:$0xff] }
  0x6c   : > { %v5718_v27 = vld [vmem:[%s5619_s12 + $0xb8] sm:$0xff]  ;;  %v353_v30 = vld [vmem:[%s5602_s10 + $0x38] sm:$0xff]  ;;  %v319_v35 = vld [vmem:[%s5619_s12 + $0x30] sm:$0xff] }
  0x6d   : > { %4248 = vmatmul.msk.f32.gmra.mxu1 %vm355_vm0, %v5650_v10  ;;  %4257 = vmatmul.msk.f32.gmra.mxu2 %vm355_vm0, %v5653_v11  ;;  %v352_v29 = vld [vmem:[%s5602_s10 + $0x30] sm:$0xff]  ;;  %v351_v32 = vld [vmem:[%s5602_s10 + $0x28] sm:$0xff]  ;;  %v354_v36 = vld [vmem:[%s5602_s10 + $0x40] sm:$0xff] }
  0x6e   : > { %v345_v31 = vld [vmem:[%s5619_s12 + $0x100] sm:$0xff]  ;;  %1166 = vmatpush.msra.mxu2 %v352_v29  ;;  %1282 = vmatpush.msra.mxu3 %v353_v30  ;;  %v5732_v33 = vld [vmem:[%s5619_s12 + $0x78] sm:$0xff]  ;;  %v5750_v38 = vld [vmem:[%s5619_s12 + $0xc8] sm:$0xff] }
  0x6f   : > { %1050 = vmatpush.msra.mxu1 %v351_v32  ;;  %v5735_v34 = vld [vmem:[%s5619_s12 + $0xc0] sm:$0xff]  ;;  %1398 = vmatpush.msra.mxu0 %v354_v36  ;;  %v320_v39 = vld [vmem:[%s5619_s12 + $0x38] sm:$0xff]  ;;  %v5761_v40 = vld [vmem:[%s5619_s12 + $0x88] sm:$0xff] }
  0x70   : > { %4239 = vmatmul.msk.f32.gmra.mxu0 %vm355_vm0, %v5660_v12  ;;  %4266 = vmatmul.msk.f32.gmra.mxu3 %vm355_vm0, %v341_v13  ;;  %v5747_v37 = vld [vmem:[%s5619_s12 + $0x80] sm:$0xff]  ;;  %v5764_v41 = vld [vmem:[%s5619_s12 + $0xd0] sm:$0xff] }
  0x71   : > { %v321_v42 = vld [vmem:[%s5619_s12 + $0x40] sm:$0xff] }
  0x75   : > { %4249 = vmatmul.msk.f32.gmra.mxu1 %vm355_vm0, %v5667_v14  ;;  %4258 = vmatmul.msk.f32.gmra.mxu2 %vm355_vm0, %v5670_v15 }
  0x78   : > { %4240 = vmatmul.msk.f32.gmra.mxu0 %vm355_vm0, %v5677_v16  ;;  %4267 = vmatmul.msk.f32.gmra.mxu3 %vm355_vm0, %v342_v17 }
  0x7d   : > { %4250 = vmatmul.msk.f32.gmra.mxu1 %vm355_vm0, %v5684_v18  ;;  %4259 = vmatmul.msk.f32.gmra.mxu2 %vm355_vm0, %v5687_v19 }
  0x80   : > { %4241 = vmatmul.msk.f32.gmra.mxu0 %vm355_vm0, %v5694_v20  ;;  %4268 = vmatmul.msk.f32.gmra.mxu3 %vm355_vm0, %v343_v21 }
  0x85   : > { %4251 = vmatmul.msk.f32.gmra.mxu1 %vm355_vm0, %v5701_v22  ;;  %4260 = vmatmul.msk.f32.gmra.mxu2 %vm355_vm0, %v5704_v23 }
  0x88   : > { %4242 = vmatmul.msk.f32.gmra.mxu0 %vm355_vm0, %v317_v24  ;;  %4269 = vmatmul.msk.f32.gmra.mxu3 %vm355_vm0, %v344_v25 }
  0x8d   : > { %4252 = vmatmul.msk.f32.gmra.mxu1 %vm355_vm0, %v5715_v26  ;;  %4261 = vmatmul.msk.f32.gmra.mxu2 %vm355_vm0, %v5718_v27 }
  0x90   : > { %4243 = vmatmul.msk.f32.gmra.mxu0 %vm355_vm0, %v318_v28  ;;  %4270 = vmatmul.msk.f32.gmra.mxu3 %vm355_vm0, %v345_v31 }
  0x95   : > { %4253 = vmatmul.msk.f32.gmra.mxu1 %vm355_vm0, %v5732_v33  ;;  %4262 = vmatmul.msk.f32.gmra.mxu2 %vm355_vm0, %v5735_v34 }
  0x98   : > { %4244 = vmatmul.msk.f32.gmra.mxu0 %vm355_vm0, %v319_v35  ;;  %4337 = vmatmul.msk.f32.vlgmr.msrb.gmra.mxu3 %vm355_vm0, %v5641_v6 }
  0x9d   : > { %4254 = vmatmul.msk.f32.gmra.mxu1 %vm355_vm0, %v5747_v37  ;;  %4263 = vmatmul.msk.f32.gmra.mxu2 %vm355_vm0, %v5750_v38 }
  0xa0   : > { %4245 = vmatmul.msk.f32.gmra.mxu0 %vm355_vm0, %v320_v39  ;;  %4338 = vmatmul.msk.f32.gmra.mxu3 %vm355_vm0, %v5660_v12 }
  0xa5   : > { %4255 = vmatmul.msk.f32.gmra.mxu1 %vm355_vm0, %v5761_v40  ;;  %4264 = vmatmul.msk.f32.gmra.mxu2 %vm355_vm0, %v5764_v41 }
  0xa8   : > { %4246 = vmatmul.msk.f32.gmra.mxu0 %vm355_vm0, %v321_v42  ;;  %4339 = vmatmul.msk.f32.gmra.mxu3 %vm355_vm0, %v5677_v16 }
  0xad   : > { %4271 = vmatmul.msk.f32.vlgmr.msrb.gmra.mxu1 %vm355_vm0, %v5641_v6  ;;  %4304 = vmatmul.msk.f32.vlgmr.msrb.gmra.mxu2 %vm355_vm0, %v5641_v6 }
  0xb0   : > { %4370 = vmatmul.msk.f32.vlgmr.msrb.gmra.mxu0 %vm355_vm0, %v5641_v6  ;;  %4340 = vmatmul.msk.f32.gmra.mxu3 %vm355_vm0, %v5694_v20 }
  0xb5   : > { %4272 = vmatmul.msk.f32.gmra.mxu1 %vm355_vm0, %v5660_v12  ;;  %4305 = vmatmul.msk.f32.gmra.mxu2 %vm355_vm0, %v5660_v12 }
  0xb8   : > { %4371 = vmatmul.msk.f32.gmra.mxu0 %vm355_vm0, %v5660_v12  ;;  %4341 = vmatmul.msk.f32.gmra.mxu3 %vm355_vm0, %v317_v24 }
  0xbd   : > { %4273 = vmatmul.msk.f32.gmra.mxu1 %vm355_vm0, %v5677_v16  ;;  %4306 = vmatmul.msk.f32.gmra.mxu2 %vm355_vm0, %v5677_v16 }
  0xc0   : > { %4372 = vmatmul.msk.f32.gmra.mxu0 %vm355_vm0, %v5677_v16  ;;  %4342 = vmatmul.msk.f32.gmra.mxu3 %vm355_vm0, %v318_v28 }
  0xc5   : > { %4274 = vmatmul.msk.f32.gmra.mxu1 %vm355_vm0, %v5694_v20  ;;  %4307 = vmatmul.msk.f32.gmra.mxu2 %vm355_vm0, %v5694_v20 }
  0xc8   : > { %4373 = vmatmul.msk.f32.gmra.mxu0 %vm355_vm0, %v5694_v20  ;;  %4343 = vmatmul.msk.f32.gmra.mxu3 %vm355_vm0, %v319_v35 }
  0xcd   : > { %4275 = vmatmul.msk.f32.gmra.mxu1 %vm355_vm0, %v317_v24  ;;  %4308 = vmatmul.msk.f32.gmra.mxu2 %vm355_vm0, %v317_v24 }
  0xd0   : > { %4374 = vmatmul.msk.f32.gmra.mxu0 %vm355_vm0, %v317_v24  ;;  %4344 = vmatmul.msk.f32.gmra.mxu3 %vm355_vm0, %v320_v39 }
  0xd5   : > { %4276 = vmatmul.msk.f32.gmra.mxu1 %vm355_vm0, %v318_v28  ;;  %4309 = vmatmul.msk.f32.gmra.mxu2 %vm355_vm0, %v318_v28 }
  0xd8   : > { %4375 = vmatmul.msk.f32.gmra.mxu0 %vm355_vm0, %v318_v28  ;;  %4345 = vmatmul.msk.f32.gmra.mxu3 %vm355_vm0, %v321_v42 }
  0xdd   : > { %4277 = vmatmul.msk.f32.gmra.mxu1 %vm355_vm0, %v319_v35  ;;  %4310 = vmatmul.msk.f32.gmra.mxu2 %vm355_vm0, %v319_v35 }
  0xe0   : > { %4376 = vmatmul.msk.f32.gmra.mxu0 %vm355_vm0, %v319_v35  ;;  %4346 = vmatmul.msk.f32.gmra.mxu3 %vm355_vm0, %v5629_v2 }
  0xe2   : > { %v5816_v43 = vpop.f32.mrf.mxu1 }
  0xe5   : > { %4278 = vmatmul.msk.f32.gmra.mxu1 %vm355_vm0, %v320_v39  ;;  %4311 = vmatmul.msk.f32.gmra.mxu2 %vm355_vm0, %v320_v39  ;;  %v472_v44 = vpop.f32.mrf.mxu0 }
  0xe8   : > { %v5820_v45 = vpop.f32.mrf.mxu2  ;;  %4377 = vmatmul.msk.f32.gmra.mxu0 %vm355_vm0, %v320_v39  ;;  %4347 = vmatmul.msk.f32.gmra.mxu3 %vm355_vm0, %v5650_v10 }
  0xea   : > { %v5825_v46 = vpop.f32.mrf.mxu1 }
  0xeb   : > { %v5827_v47 = vpop.f32.mrf.mxu3 }
  0xed   : > { %4279 = vmatmul.msk.f32.gmra.mxu1 %vm355_vm0, %v321_v42  ;;  %4312 = vmatmul.msk.f32.gmra.mxu2 %vm355_vm0, %v321_v42  ;;  %v5831_v48 = vpop.f32.mrf.mxu0 }
  0xf0   : > { %v5833_v49 = vpop.f32.mrf.mxu2  ;;  %4378 = vmatmul.msk.f32.gmra.mxu0 %vm355_vm0, %v321_v42  ;;  %4348 = vmatmul.msk.f32.gmra.mxu3 %vm355_vm0, %v5667_v14 }
  0xf2   : > { %v5838_v50 = vpop.f32.mrf.mxu1 }
  0xf3   : > { %v5840_v51 = vpop.f32.mrf.mxu3 }
  0xf5   : > { %4280 = vmatmul.msk.f32.gmra.mxu1 %vm355_vm0, %v5629_v2  ;;  %4313 = vmatmul.msk.f32.gmra.mxu2 %vm355_vm0, %v5629_v2  ;;  %v5846_v52 = vpop.f32.mrf.mxu0 }
  0xf6   : > { %v1517_v39 = vmul.f32 0.5, %v5846_v52 }
  0xf8   : > { %v5848_v53 = vpop.f32.mrf.mxu2  ;;  %4379 = vmatmul.msk.f32.gmra.mxu0 %vm355_vm0, %v5629_v2  ;;  %4349 = vmatmul.msk.f32.gmra.mxu3 %vm355_vm0, %v5684_v18 }
  0xfa   : > { %v5854_v54 = vpop.f32.mrf.mxu1 }
  0xfb   : > { %v5856_v55 = vpop.f32.mrf.mxu3 }
  0xfd   : > { %4281 = vmatmul.msk.f32.gmra.mxu1 %vm355_vm0, %v5650_v10  ;;  %4314 = vmatmul.msk.f32.gmra.mxu2 %vm355_vm0, %v5650_v10  ;;  %v5862_v56 = vpop.f32.mrf.mxu0 }
 0x100   : > { %v5864_v57 = vpop.f32.mrf.mxu2  ;;  %4380 = vmatmul.msk.f32.gmra.mxu0 %vm355_vm0, %v5650_v10  ;;  %4350 = vmatmul.msk.f32.gmra.mxu3 %vm355_vm0, %v5701_v22 }
 0x102   : > { %v5870_v58 = vpop.f32.mrf.mxu1 }
 0x103   : > { %v5872_v59 = vpop.f32.mrf.mxu3 }
 0x105   : > { %4282 = vmatmul.msk.f32.gmra.mxu1 %vm355_vm0, %v5667_v14  ;;  %4315 = vmatmul.msk.f32.gmra.mxu2 %vm355_vm0, %v5667_v14  ;;  %v5878_v60 = vpop.f32.mrf.mxu0 }
 0x108   : > { %v5880_v61 = vpop.f32.mrf.mxu2  ;;  %4381 = vmatmul.msk.f32.gmra.mxu0 %vm355_vm0, %v5667_v14  ;;  %4351 = vmatmul.msk.f32.gmra.mxu3 %vm355_vm0, %v5715_v26  ;;  %v1499_v14 = vmul.f32 0.5, %v472_v44 }
 0x10a   : > { %v5886_v62 = vpop.f32.mrf.mxu1  ;;  %4652 = vtanh.f32 %v1499_v14 }
 0x10b   : > { %v5888_v63 = vpop.f32.mrf.mxu3 }
 0x10d   : > { %4283 = vmatmul.msk.f32.gmra.mxu1 %vm355_vm0, %v5684_v18  ;;  %4316 = vmatmul.msk.f32.gmra.mxu2 %vm355_vm0, %v5684_v18  ;;  %v5894_v0 = vpop.f32.mrf.mxu0 }
 0x110   : > { %v5896_v1 = vpop.f32.mrf.mxu2  ;;  %4382 = vmatmul.msk.f32.gmra.mxu0 %vm355_vm0, %v5684_v18  ;;  %4352 = vmatmul.msk.f32.gmra.mxu3 %vm355_vm0, %v5732_v33  ;;  %v4653_v28 = vpop.eup %4652 }
 0x111   : > { %v2093_v32 = vmul.f32 0.5, %v4653_v28 }
 0x112   : > { %v5902_v2 = vpop.f32.mrf.mxu1 }
 0x113   : > { %v5904_v4 = vpop.f32.mrf.mxu3  ;;  %v2390_v14 = vadd.f32 0.5, %v2093_v32 }
 0x115   : > { %4284 = vmatmul.msk.f32.gmra.mxu1 %vm355_vm0, %v5701_v22  ;;  %4317 = vmatmul.msk.f32.gmra.mxu2 %vm355_vm0, %v5701_v22  ;;  %v5910_v5 = vpop.f32.mrf.mxu0 }
 0x118   : > { %v5912_v6 = vpop.f32.mrf.mxu2  ;;  %4383 = vmatmul.msk.f32.gmra.mxu0 %vm355_vm0, %v5701_v22  ;;  %4353 = vmatmul.msk.f32.gmra.mxu3 %vm355_vm0, %v5747_v37  ;;  %v1508_v22 = vmul.f32 0.5, %v5831_v48 }
 0x119   : > { %7351 = vst [vmem:[#allocation14_spill] sm:$0xff] %v5912_v6 }
 0x11a   : > { %v5918_v7 = vpop.f32.mrf.mxu1 }
 0x11b   : > { %v820_v8 = vpop.f32.mrf.mxu3 }
 0x11c   : > { %v1502_v17 = vmul.f32 0.5, %v820_v8  ;;  %v2688_v8 = vld [vmem:[%s5609_s20 + $0x8] sm:$0xff] }
 0x11d   : > { %4285 = vmatmul.msk.f32.gmra.mxu1 %vm355_vm0, %v5715_v26  ;;  %4318 = vmatmul.msk.f32.gmra.mxu2 %vm355_vm0, %v5715_v26  ;;  %v5924_v9 = vpop.f32.mrf.mxu0 }
 0x11e   : > { %4654 = vtanh.f32 %v1502_v17 }
 0x120   : > { %v5926_v10 = vpop.f32.mrf.mxu2  ;;  %4384 = vmatmul.msk.f32.gmra.mxu0 %vm355_vm0, %v5715_v26  ;;  %4354 = vmatmul.msk.f32.gmra.mxu3 %vm355_vm0, %v5761_v40 }
 0x121   : > { %7352 = vst [vmem:[#allocation15_spill] sm:$0xff] %v5926_v10 }
 0x122   : > { %v5932_v12 = vpop.f32.mrf.mxu1 }
 0x123   : > { %v823_v13 = vpop.f32.mrf.mxu3 }
 0x124   : > { %v1511_v26 = vmul.f32 0.5, %v823_v13  ;;  %v4655_v30 = vpop.eup %4654 }
 0x125   : > { %4286 = vmatmul.msk.f32.gmra.mxu1 %vm355_vm0, %v5732_v33  ;;  %4319 = vmatmul.msk.f32.gmra.mxu2 %vm355_vm0, %v5732_v33  ;;  %v5938_v16 = vpop.f32.mrf.mxu0  ;;  %v2096_v44 = vmul.f32 0.5, %v4655_v30 }
 0x128   : > { %v5940_v18 = vpop.f32.mrf.mxu2  ;;  %4385 = vmatmul.msk.f32.gmra.mxu0 %vm355_vm0, %v5732_v33  ;;  %4355 = vmatmul.msk.f32.gmra.mxu3 %vm355_vm0, %v5632_v3 }
 0x129   : > { %7353 = vst [vmem:[#allocation16_spill] sm:$0xff] %v5940_v18  ;;  %v2697_v18 = vld [vmem:[%s5609_s20 + $0x50] sm:$0xff] }
 0x12a   : > { %v588_v20 = vpop.f32.mrf.mxu1 }
 0x12b   : > { %v1500_v21 = vmul.f32 0.5, %v588_v20  ;;  %v826_v24 = vpop.f32.mrf.mxu3 }
 0x12c   : > { %v1520_v20 = vmul.f32 0.5, %v826_v24 }
 0x12d   : > { %4656 = vtanh.f32 %v1500_v21  ;;  %4287 = vmatmul.msk.f32.gmra.mxu1 %vm355_vm0, %v5747_v37  ;;  %4320 = vmatmul.msk.f32.gmra.mxu2 %vm355_vm0, %v5747_v37  ;;  %v5951_v25 = vpop.f32.mrf.mxu0  ;;  %v2687_v21 = vld [vmem:[%s5609_s20] sm:$0xff] }
 0x12e   : > { %7354 = vst [vmem:[#allocation17_spill] sm:$0xff] %v5951_v25  ;;  %4658 = vtanh.f32 %v1508_v22  ;;  %v2984_v32 = vsub.f32 %v2390_v14, %v2687_v21  ;;  %v2696_v21 = vld [vmem:[%s5609_s20 + $0x48] sm:$0xff] }
 0x12f   : > { %4660 = vtanh.f32 %v1511_v26  ;;  %v2393_v26 = vadd.f32 0.5, %v2096_v44 }
 0x130   : > { %v704_v29 = vpop.f32.mrf.mxu2  ;;  %4386 = vmatmul.msk.f32.gmra.mxu0 %vm355_vm0, %v5747_v37  ;;  %4356 = vmatmul.msk.f32.gmra.mxu3 %vm355_vm0, %v5653_v11 }
 0x131   : > { %v1501_v31 = vmul.f32 0.5, %v704_v29 }
 0x132   : > { %v591_v33 = vpop.f32.mrf.mxu1 }
 0x133   : > { %v4657_v35 = vpop.eup %4656  ;;  %4662 = vtanh.f32 %v1501_v31  ;;  %v1509_v36 = vmul.f32 0.5, %v591_v33  ;;  %v829_v48 = vpop.f32.mrf.mxu3  ;;  %v2690_v31 = vld [vmem:[%s5609_s20 + $0x18] sm:$0xff] }
 0x134   : > { %v2094_v42 = vmul.f32 0.5, %v4657_v35  ;;  %v4659_v13 = vpop.eup %4658 }
 0x135   : > { %4664 = vtanh.f32 %v1509_v36  ;;  %4288 = vmatmul.msk.f32.gmra.mxu1 %vm355_vm0, %v5761_v40  ;;  %4321 = vmatmul.msk.f32.gmra.mxu2 %vm355_vm0, %v5761_v40  ;;  %v5963_v37 = vpop.f32.mrf.mxu0  ;;  %v4661_v52 = vpop.eup %4660  ;;  %v2102_v30 = vmul.f32 0.5, %v4659_v13 }
 0x136   : > { %7355 = vst [vmem:[#allocation18_spill] sm:$0xff] %v5963_v37  ;;  %v2391_v17 = vadd.f32 0.5, %v2094_v42  ;;  %4666 = vtanh.f32 %v1517_v39  ;;  %v1526_v39 = vmul.f32 0.5, %v5862_v56  ;;  %v2689_v42 = vld [vmem:[%s5609_s20 + $0x10] sm:$0xff] }
 0x137   : > { %4668 = vtanh.f32 %v1520_v20  ;;  %v2399_v25 = vadd.f32 0.5, %v2102_v30  ;;  %v3281_v20 = vmul.f32 %v2984_v32, %v2984_v32 }
 0x138   : > { %v2985_v22 = vsub.f32 %v2391_v17, %v2688_v8  ;;  %v707_v28 = vpop.f32.mrf.mxu2  ;;  %4387 = vmatmul.msk.f32.gmra.mxu0 %vm355_vm0, %v5761_v40  ;;  %4357 = vmatmul.msk.f32.gmra.mxu3 %vm355_vm0, %v5670_v15  ;;  %v2105_v40 = vmul.f32 0.5, %v4661_v52 }
 0x139   : > { %v4663_v29 = vpop.eup %4662  ;;  %v1510_v33 = vmul.f32 0.5, %v707_v28  ;;  %v2987_v28 = vsub.f32 %v2393_v26, %v2690_v31  ;;  %v2993_v10 = vsub.f32 %v2399_v25, %v2696_v21 }
 0x13a   : > { %v2095_v24 = vmul.f32 0.5, %v4663_v29  ;;  %v594_v35 = vpop.f32.mrf.mxu1  ;;  %v3282_v8 = vmul.f32 %v2985_v22, %v2985_v22  ;;  %v1529_v29 = vmul.f32 0.5, %v829_v48  ;;  %v2402_v26 = vadd.f32 0.5, %v2105_v40 }
 0x13b   : > { %v4665_v36 = vpop.eup %4664  ;;  %4670 = vtanh.f32 %v1510_v33  ;;  %v1518_v44 = vmul.f32 0.5, %v594_v35  ;;  %v832_v37 = vpop.f32.mrf.mxu3  ;;  %v3284_v35 = vmul.f32 %v2987_v28, %v2987_v28  ;;  %v1535_v48 = vmul.f32 0.5, %v5878_v60 }
 0x13c   : > { %v2392_v13 = vadd.f32 0.5, %v2095_v24  ;;  %v2103_v17 = vmul.f32 0.5, %v4665_v36  ;;  %v4667_v14 = vpop.eup %4666  ;;  %v3578_v31 = vadd.f32 %v3282_v8, %v3281_v20  ;;  %v2699_v36 = vld [vmem:[%s5609_s20 + $0x60] sm:$0xff]  ;;  %v2698_v8 = vld [vmem:[%s5609_s20 + $0x58] sm:$0xff] }
 0x13d   : > { %4672 = vtanh.f32 %v1518_v44  ;;  %4289 = vmatmul.msk.f32.gmra.mxu1 %vm355_vm0, %v5632_v3  ;;  %4322 = vmatmul.msk.f32.gmra.mxu2 %vm355_vm0, %v5632_v3  ;;  %v5978_v56 = vpop.f32.mrf.mxu0  ;;  %v4669_v30 = vpop.eup %4668  ;;  %v2111_v32 = vmul.f32 0.5, %v4667_v14 }
 0x13e   : > { %7356 = vst [vmem:[#allocation19_spill] sm:$0xff] %v5978_v56  ;;  %v2986_v52 = vsub.f32 %v2392_v13, %v2689_v42  ;;  %v2400_v22 = vadd.f32 0.5, %v2103_v17  ;;  %4674 = vtanh.f32 %v1526_v39  ;;  %v2996_v13 = vsub.f32 %v2402_v26, %v2699_v36 }
 0x13f   : > { %4676 = vtanh.f32 %v1529_v29  ;;  %v2114_v17 = vmul.f32 0.5, %v4669_v30  ;;  %v2408_v60 = vadd.f32 0.5, %v2111_v32  ;;  %v2705_v29 = vld [vmem:[%s5609_s20 + $0x90] sm:$0xff] }
 0x140   : > { %v3283_v33 = vmul.f32 %v2986_v52, %v2986_v52  ;;  %v2994_v24 = vsub.f32 %v2400_v22, %v2697_v18  ;;  %v710_v44 = vpop.f32.mrf.mxu2  ;;  %4388 = vmatmul.msk.f32.gmra.mxu0 %vm355_vm0, %v5632_v3  ;;  %4358 = vmatmul.msk.f32.gmra.mxu3 %vm355_vm0, %v5687_v19  ;;  %v2706_v22 = vld [vmem:[%s5609_s20 + $0x98] sm:$0xff]  ;;  %v3293_v32 = vmul.f32 %v2996_v13, %v2996_v13 }
 0x141   : > { %v4671_v56 = vpop.eup %4670  ;;  %v1519_v6 = vmul.f32 0.5, %v710_v44 }
 0x142   : > { %v3611_v39 = vadd.f32 %v3578_v31, %v3283_v33  ;;  %v2104_v42 = vmul.f32 0.5, %v4671_v56  ;;  %v597_v18 = vpop.f32.mrf.mxu1  ;;  %v3291_v25 = vmul.f32 %v2994_v24, %v2994_v24  ;;  %v3290_v56 = vmul.f32 %v2993_v10, %v2993_v10 }
 0x143   : > { %v4673_v40 = vpop.eup %4672  ;;  %4678 = vtanh.f32 %v1519_v6  ;;  %v1527_v3 = vmul.f32 0.5, %v597_v18  ;;  %v835_v21 = vpop.f32.mrf.mxu3  ;;  %v1538_v31 = vmul.f32 0.5, %v832_v37  ;;  %v2411_v33 = vadd.f32 0.5, %v2114_v17 }
 0x144   : > { %v5988_v28 = vadd.f32 %v3611_v39, %v3284_v35  ;;  %v2401_v14 = vadd.f32 0.5, %v2104_v42  ;;  %v2112_v20 = vmul.f32 0.5, %v4673_v40  ;;  %v4675_v52 = vpop.eup %4674  ;;  %v3579_v35 = vadd.f32 %v3291_v25, %v3290_v56  ;;  %v2708_v39 = vld [vmem:[%s5609_s20 + $0xa8] sm:$0xff]  ;;  %v2707_v25 = vld [vmem:[%s5609_s20 + $0xa0] sm:$0xff] }
 0x145   : > { %4680 = vtanh.f32 %v1527_v3  ;;  %4290 = vmatmul.msk.f32.gmra.mxu1 %vm355_vm0, %v5653_v11  ;;  %4323 = vmatmul.msk.f32.gmra.mxu2 %vm355_vm0, %v5653_v11  ;;  %v5995_v6 = vpop.f32.mrf.mxu0  ;;  %v4677_v24 = vpop.eup %4676  ;;  %v3002_v40 = vsub.f32 %v2408_v60, %v2705_v29  ;;  %v2120_v10 = vmul.f32 0.5, %v4675_v52  ;;  %v1544_v37 = vmul.f32 0.5, %v5894_v0 }
 0x146   : > { %v2995_v26 = vsub.f32 %v2401_v14, %v2698_v8  ;;  %v2409_v30 = vadd.f32 0.5, %v2112_v20  ;;  %4682 = vtanh.f32 %v1535_v48  ;;  %v3005_v14 = vsub.f32 %v2411_v33, %v2708_v39 }
 0x147   : > { %4684 = vtanh.f32 %v1538_v31  ;;  %v3299_v0 = vmul.f32 %v3002_v40, %v3002_v40  ;;  %v2417_v33 = vadd.f32 0.5, %v2120_v10 }
 0x148   : > { %v3292_v36 = vmul.f32 %v2995_v26, %v2995_v26  ;;  %v3003_v44 = vsub.f32 %v2409_v30, %v2706_v22  ;;  %v713_v42 = vpop.f32.mrf.mxu2  ;;  %4389 = vmatmul.msk.f32.gmra.mxu0 %vm355_vm0, %v5653_v11  ;;  %4359 = vmatmul.msk.f32.gmra.mxu3 %vm355_vm0, %v5704_v23  ;;  %v2123_v11 = vmul.f32 0.5, %v4677_v24  ;;  %v2715_v30 = vld [vmem:[%s5609_s20 + $0xe0] sm:$0xff] }
 0x149   : > { %v4679_v18 = vpop.eup %4678  ;;  %v1528_v3 = vmul.f32 0.5, %v713_v42 }
 0x14a   : > { %v3612_v48 = vadd.f32 %v3579_v35, %v3292_v36  ;;  %v2113_v8 = vmul.f32 0.5, %v4679_v18  ;;  %v600_v17 = vpop.f32.mrf.mxu1  ;;  %v3300_v22 = vmul.f32 %v3003_v44, %v3003_v44  ;;  %v1547_v36 = vmul.f32 0.5, %v835_v21  ;;  %v2714_v44 = vld [vmem:[%s5609_s20 + $0xd8] sm:$0xff] }
 0x14b   : > { %v4681_v13 = vpop.eup %4680  ;;  %4686 = vtanh.f32 %v1528_v3  ;;  %v1536_v20 = vmul.f32 0.5, %v600_v17  ;;  %v838_v29 = vpop.f32.mrf.mxu3  ;;  %v3302_v3 = vmul.f32 %v3005_v14, %v3005_v14  ;;  %v3011_v21 = vsub.f32 %v2417_v33, %v2714_v44 }
 0x14c   : > { %v6005_v52 = vadd.f32 %v3612_v48, %v3293_v32  ;;  %v2410_v60 = vadd.f32 0.5, %v2113_v8  ;;  %v2121_v56 = vmul.f32 0.5, %v4681_v13  ;;  %v4683_v26 = vpop.eup %4682  ;;  %v2420_v32 = vadd.f32 0.5, %v2123_v11  ;;  %v2717_v48 = vld [vmem:[%s5609_s20 + $0xf0] sm:$0xff] }
 0x14d   : > { %4688 = vtanh.f32 %v1536_v20  ;;  %4291 = vmatmul.msk.f32.gmra.mxu1 %vm355_vm0, %v5670_v15  ;;  %4324 = vmatmul.msk.f32.gmra.mxu2 %vm355_vm0, %v5670_v15  ;;  %v6012_v31 = vpop.f32.mrf.mxu0  ;;  %v4685_v39 = vpop.eup %4684  ;;  %v3580_v42 = vadd.f32 %v3300_v22, %v3299_v0  ;;  %v2129_v13 = vmul.f32 0.5, %v4683_v26  ;;  %v2716_v22 = vld [vmem:[%s5609_s20 + $0xe8] sm:$0xff]  ;;  %v1553_v44 = vmul.f32 0.5, %v5910_v5 }
 0x14e   : > { %v3004_v24 = vsub.f32 %v2410_v60, %v2707_v25  ;;  %v2418_v35 = vadd.f32 0.5, %v2121_v56  ;;  %4690 = vtanh.f32 %v1544_v37  ;;  %v3014_v14 = vsub.f32 %v2420_v32, %v2717_v48 }
 0x14f   : > { %4692 = vtanh.f32 %v1547_v36  ;;  %v2132_v56 = vmul.f32 0.5, %v4685_v39  ;;  %v2426_v33 = vadd.f32 0.5, %v2129_v13  ;;  %v3308_v32 = vmul.f32 %v3011_v21, %v3011_v21  ;;  %v2723_v39 = vld [vmem:[%s5609_s20 + $0x120] sm:$0xff] }
 0x150   : > { %v3301_v18 = vmul.f32 %v3004_v24, %v3004_v24  ;;  %v3012_v40 = vsub.f32 %v2418_v35, %v2715_v30  ;;  %v716_v8 = vpop.f32.mrf.mxu2  ;;  %4390 = vmatmul.msk.f32.gmra.mxu0 %vm355_vm0, %v5670_v15  ;;  %4360 = vmatmul.msk.f32.gmra.mxu3 %vm355_vm0, %v5718_v27 }
 0x151   : > { %v4687_v17 = vpop.eup %4686  ;;  %v1537_v10 = vmul.f32 0.5, %v716_v8  ;;  %v2429_v48 = vadd.f32 0.5, %v2132_v56 }
 0x152   : > { %v3613_v37 = vadd.f32 %v3580_v42, %v3301_v18  ;;  %v2122_v25 = vmul.f32 0.5, %v4687_v17  ;;  %v603_v20 = vpop.f32.mrf.mxu1  ;;  %v3309_v15 = vmul.f32 %v3012_v40, %v3012_v40  ;;  %v2724_v42 = vld [vmem:[%s5609_s20 + $0x128] sm:$0xff] }
 0x153   : > { %v4689_v11 = vpop.eup %4688  ;;  %4694 = vtanh.f32 %v1537_v10  ;;  %v1545_v60 = vmul.f32 0.5, %v603_v20  ;;  %v841_v24 = vpop.f32.mrf.mxu3  ;;  %v3311_v10 = vmul.f32 %v3014_v14, %v3014_v14 }
 0x154   : > { %v6021_v0 = vadd.f32 %v3613_v37, %v3302_v3  ;;  %v2419_v26 = vadd.f32 0.5, %v2122_v25  ;;  %v2130_v30 = vmul.f32 0.5, %v4689_v11  ;;  %v4691_v35 = vpop.eup %4690  ;;  %v1556_v3 = vmul.f32 0.5, %v838_v29  ;;  %v2726_v37 = vld [vmem:[%s5609_s20 + $0x138] sm:$0xff] }
 0x155   : > { %4696 = vtanh.f32 %v1545_v60  ;;  %4292 = vmatmul.msk.f32.gmra.mxu1 %vm355_vm0, %v5687_v19  ;;  %4325 = vmatmul.msk.f32.gmra.mxu2 %vm355_vm0, %v5687_v19  ;;  %v6029_v36 = vpop.f32.mrf.mxu0  ;;  %v4693_v8 = vpop.eup %4692  ;;  %v3581_v17 = vadd.f32 %v3309_v15, %v3308_v32  ;;  %v3020_v11 = vsub.f32 %v2426_v33, %v2723_v39  ;;  %v2138_v60 = vmul.f32 0.5, %v4691_v35 }
 0x156   : > { %v3013_v18 = vsub.f32 %v2419_v26, %v2716_v22  ;;  %v2427_v40 = vadd.f32 0.5, %v2130_v30  ;;  %4698 = vtanh.f32 %v1553_v44  ;;  %v1562_v29 = vmul.f32 0.5, %v5924_v9  ;;  %v2725_v26 = vld [vmem:[%s5609_s20 + $0x130] sm:$0xff] }
 0x157   : > { %4700 = vtanh.f32 %v1556_v3  ;;  %v3023_v30 = vsub.f32 %v2429_v48, %v2726_v37  ;;  %v2141_v33 = vmul.f32 0.5, %v4693_v8  ;;  %v2733_v9 = vld [vmem:[%s5609_s20 + $0x170] sm:$0xff]  ;;  %v3317_v3 = vmul.f32 %v3020_v11, %v3020_v11  ;;  %v2732_v48 = vld [vmem:[%s5609_s20 + $0x168] sm:$0xff] }
 0x158   : > { %v3310_v5 = vmul.f32 %v3013_v18, %v3013_v18  ;;  %v3021_v13 = vsub.f32 %v2427_v40, %v2724_v42  ;;  %v719_v25 = vpop.f32.mrf.mxu2  ;;  %4391 = vmatmul.msk.f32.gmra.mxu0 %vm355_vm0, %v5687_v19  ;;  %4361 = vmatmul.msk.f32.gmra.mxu3 %vm355_vm0, %v5735_v34  ;;  %v2435_v18 = vadd.f32 0.5, %v2138_v60  ;;  %v1580_v11 = vmul.f32 0.5, %v5816_v43 }
 0x159   : > { %v4695_v20 = vpop.eup %4694  ;;  %v1546_v21 = vmul.f32 0.5, %v719_v25 }
 0x15a   : > { %v3614_v22 = vadd.f32 %v3581_v17, %v3310_v5  ;;  %v2131_v56 = vmul.f32 0.5, %v4695_v20  ;;  %v606_v14 = vpop.f32.mrf.mxu1  ;;  %v3318_v35 = vmul.f32 %v3021_v13, %v3021_v13  ;;  %v1565_v5 = vmul.f32 0.5, %v841_v24 }
 0x15b   : > { %v4697_v15 = vpop.eup %4696  ;;  %4702 = vtanh.f32 %v1546_v21  ;;  %v1554_v19 = vmul.f32 0.5, %v606_v14  ;;  %v844_v39 = vpop.f32.mrf.mxu3  ;;  %v3320_v21 = vmul.f32 %v3023_v30, %v3023_v30 }
 0x15c   : > { %v6039_v44 = vadd.f32 %v3614_v22, %v3311_v10  ;;  %v2428_v42 = vadd.f32 0.5, %v2131_v56  ;;  %v2139_v32 = vmul.f32 0.5, %v4697_v15  ;;  %v4699_v13 = vpop.eup %4698  ;;  %v2438_v10 = vadd.f32 0.5, %v2141_v33  ;;  %v2735_v22 = vld [vmem:[%s5609_s20 + $0x180] sm:$0xff] }
 0x15d   : > { %4704 = vtanh.f32 %v1554_v19  ;;  %4293 = vmatmul.msk.f32.gmra.mxu1 %vm355_vm0, %v5704_v23  ;;  %4326 = vmatmul.msk.f32.gmra.mxu2 %vm355_vm0, %v5704_v23  ;;  %v6046_v40 = vpop.f32.mrf.mxu0  ;;  %v4701_v37 = vpop.eup %4700  ;;  %v3582_v25 = vadd.f32 %v3318_v35, %v3317_v3  ;;  %v3029_v15 = vsub.f32 %v2435_v18, %v2732_v48  ;;  %v2147_v24 = vmul.f32 0.5, %v4699_v13  ;;  %v2734_v35 = vld [vmem:[%s5609_s20 + $0x178] sm:$0xff] }
 0x15e   : > { %v3022_v8 = vsub.f32 %v2428_v42, %v2725_v26  ;;  %v2436_v17 = vadd.f32 0.5, %v2139_v32  ;;  %4706 = vtanh.f32 %v1562_v29  ;;  %v3032_v42 = vsub.f32 %v2438_v10, %v2735_v22 }
 0x15f   : > { %4708 = vtanh.f32 %v1565_v5  ;;  %v1571_v13 = vmul.f32 0.5, %v5938_v16  ;;  %v2444_v10 = vadd.f32 0.5, %v2147_v24 }
 0x160   : > { %v3319_v20 = vmul.f32 %v3022_v8, %v3022_v8  ;;  %v3030_v60 = vsub.f32 %v2436_v17, %v2733_v9  ;;  %v722_v56 = vpop.f32.mrf.mxu2  ;;  %4392 = vmatmul.msk.f32.gmra.mxu0 %vm355_vm0, %v5704_v23  ;;  %4362 = vmatmul.msk.f32.gmra.mxu3 %vm355_vm0, %v5750_v38  ;;  %v2150_v23 = vmul.f32 0.5, %v4701_v37  ;;  %v3326_v17 = vmul.f32 %v3029_v15, %v3029_v15 }
 0x161   : > { %v4703_v14 = vpop.eup %4702  ;;  %v1555_v26 = vmul.f32 0.5, %v722_v56 }
 0x162   : > { %v3615_v29 = vadd.f32 %v3582_v25, %v3319_v20  ;;  %v2140_v19 = vmul.f32 0.5, %v4703_v14  ;;  %v609_v33 = vpop.f32.mrf.mxu1  ;;  %v3327_v9 = vmul.f32 %v3030_v60, %v3030_v60  ;;  %v2742_v25 = vld [vmem:[%s5609_s20 + $0x1b8] sm:$0xff]  ;;  %v1574_v60 = vmul.f32 0.5, %v844_v39 }
 0x163   : > { %v4705_v30 = vpop.eup %4704  ;;  %4710 = vtanh.f32 %v1555_v26  ;;  %v1563_v32 = vmul.f32 0.5, %v609_v33  ;;  %v847_v48 = vpop.f32.mrf.mxu3  ;;  %v2447_v22 = vadd.f32 0.5, %v2150_v23  ;;  %v3329_v26 = vmul.f32 %v3032_v42, %v3032_v42  ;;  %v2743_v42 = vld [vmem:[%s5609_s20 + $0x1c0] sm:$0xff] }
 0x164   : > { %v6056_v3 = vadd.f32 %v3615_v29, %v3320_v21  ;;  %v2437_v43 = vadd.f32 0.5, %v2140_v19  ;;  %v2148_v18 = vmul.f32 0.5, %v4705_v30  ;;  %v4707_v8 = vpop.eup %4706  ;;  %v2741_v21 = vld [vmem:[%s5609_s20 + $0x1b0] sm:$0xff]  ;;  %v3583_v16 = vadd.f32 %v3327_v9, %v3326_v17  ;;  %v2744_v29 = vld [vmem:[%s5609_s20 + $0x1c8] sm:$0xff] }
 0x165   : > { %4712 = vtanh.f32 %v1563_v32  ;;  %4294 = vmatmul.msk.f32.gmra.mxu1 %vm355_vm0, %v5718_v27  ;;  %4327 = vmatmul.msk.f32.gmra.mxu2 %vm355_vm0, %v5718_v27  ;;  %v6064_v5 = vpop.f32.mrf.mxu0  ;;  %v4709_v56 = vpop.eup %4708  ;;  %v2156_v30 = vmul.f32 0.5, %v4707_v8  ;;  %v3038_v39 = vsub.f32 %v2444_v10, %v2741_v21  ;;  %v3041_v9 = vsub.f32 %v2447_v22, %v2744_v29  ;;  %v2750_v22 = vld [vmem:[%s5609_s20 + $0x1f8] sm:$0xff] }
 0x166   : > { %v3031_v37 = vsub.f32 %v2437_v43, %v2734_v35  ;;  %v2445_v20 = vadd.f32 0.5, %v2148_v18  ;;  %4714 = vtanh.f32 %v1580_v11  ;;  %v1661_v10 = vmul.f32 0.5, %v5820_v45 }
 0x167   : > { %4716 = vtanh.f32 %v1571_v13  ;;  %v3335_v21 = vmul.f32 %v3038_v39, %v3038_v39  ;;  %v1589_v39 = vmul.f32 0.5, %v5825_v46 }
 0x168   : > { %v3328_v14 = vmul.f32 %v3031_v37, %v3031_v37  ;;  %v3039_v15 = vsub.f32 %v2445_v20, %v2742_v25  ;;  %v725_v19 = vpop.f32.mrf.mxu2  ;;  %4393 = vmatmul.msk.f32.gmra.mxu0 %vm355_vm0, %v5718_v27  ;;  %4363 = vmatmul.msk.f32.gmra.mxu3 %vm355_vm0, %v5764_v41  ;;  %4718 = vtanh.f32 %v1574_v60  ;;  %v2159_v27 = vmul.f32 0.5, %v4709_v56  ;;  %v2751_v20 = vld [vmem:[%s5609_s20 + $0x200] sm:$0xff] }
 0x169   : > { %v4711_v33 = vpop.eup %4710  ;;  %v1564_v24 = vmul.f32 0.5, %v725_v19  ;;  %v2453_v37 = vadd.f32 0.5, %v2156_v30  ;;  %v3338_v30 = vmul.f32 %v3041_v9, %v3041_v9 }
 0x16a   : > { %v3616_v11 = vadd.f32 %v3583_v16, %v3328_v14  ;;  %v2149_v35 = vmul.f32 0.5, %v4711_v33  ;;  %v612_v32 = vpop.f32.mrf.mxu1  ;;  %v3336_v18 = vmul.f32 %v3039_v15, %v3039_v15  ;;  %v1583_v14 = vmul.f32 0.5, %v847_v48 }
 0x16b   : > { %v4713_v23 = vpop.eup %4712  ;;  %4720 = vtanh.f32 %v1564_v24  ;;  %v1572_v43 = vmul.f32 0.5, %v612_v32  ;;  %v850_v25 = vpop.f32.mrf.mxu3  ;;  %v2456_v45 = vadd.f32 0.5, %v2159_v27  ;;  %v2753_v24 = vld [vmem:[%s5609_s20 + $0x210] sm:$0xff]  ;;  %v3047_v32 = vsub.f32 %v2453_v37, %v2750_v22 }
 0x16c   : > { %v6073_v8 = vadd.f32 %v3616_v11, %v3329_v26  ;;  %v2446_v17 = vadd.f32 0.5, %v2149_v35  ;;  %v2157_v13 = vmul.f32 0.5, %v4713_v23  ;;  %v4715_v41 = vpop.eup %4714  ;;  %v3584_v29 = vadd.f32 %v3336_v18, %v3335_v21  ;;  %v6089_v23 = vld [vmem:[%s5619_s12 + $0xd8] sm:$0xff] }
 0x16d   : > { %4722 = vtanh.f32 %v1572_v43  ;;  %4295 = vmatmul.msk.f32.gmra.mxu1 %vm355_vm0, %v5735_v34  ;;  %4328 = vmatmul.msk.f32.gmra.mxu2 %vm355_vm0, %v5735_v34  ;;  %v6081_v60 = vpop.f32.mrf.mxu0  ;;  %v4717_v15 = vpop.eup %4716 }
 0x16e   : > { %v3040_v56 = vsub.f32 %v2446_v17, %v2743_v42  ;;  %v2454_v16 = vadd.f32 0.5, %v2157_v13  ;;  %v4719_v26 = vpop.eup %4718  ;;  %4724 = vtanh.f32 %v1661_v10  ;;  %v2165_v42 = vmul.f32 0.5, %v4717_v15  ;;  %v2752_v17 = vld [vmem:[%s5609_s20 + $0x208] sm:$0xff] }
 0x16f   : > { %4726 = vtanh.f32 %v1583_v14  ;;  %v2168_v10 = vmul.f32 0.5, %v4719_v26  ;;  %v3344_v15 = vmul.f32 %v3047_v32, %v3047_v32 }
 0x170   : > { %v3337_v19 = vmul.f32 %v3040_v56, %v3040_v56  ;;  %v3048_v33 = vsub.f32 %v2454_v16, %v2751_v20  ;;  %v728_v11 = vpop.f32.mrf.mxu2  ;;  %4394 = vmatmul.msk.f32.gmra.mxu0 %vm355_vm0, %v5735_v34  ;;  %4364 = vmatmul.msk.f32.gmra.mxu3 %vm355_vm0, %v6089_v23  ;;  %v3050_v34 = vsub.f32 %v2456_v45, %v2753_v24  ;;  %v2174_v56 = vmul.f32 0.5, %v4715_v41 }
 0x171   : > { %v4721_v35 = vpop.eup %4720  ;;  %v1573_v48 = vmul.f32 0.5, %v728_v11  ;;  %v1742_v16 = vmul.f32 0.5, %v5827_v47  ;;  %v2462_v45 = vadd.f32 0.5, %v2165_v42  ;;  %v2759_v47 = vld [vmem:[%s5609_s20 + $0x240] sm:$0xff]  ;;  %v2465_v41 = vadd.f32 0.5, %v2168_v10 }
 0x172   : > { %v3617_v43 = vadd.f32 %v3584_v29, %v3337_v19  ;;  %v2158_v9 = vmul.f32 0.5, %v4721_v35  ;;  %v615_v27 = vpop.f32.mrf.mxu1  ;;  %v3345_v46 = vmul.f32 %v3048_v33, %v3048_v33  ;;  %v2760_v29 = vld [vmem:[%s5609_s20 + $0x248] sm:$0xff]  ;;  %v1592_v33 = vmul.f32 0.5, %v850_v25 }
 0x173   : > { %v4723_v18 = vpop.eup %4722  ;;  %4728 = vtanh.f32 %v1573_v48  ;;  %v1581_v13 = vmul.f32 0.5, %v615_v27  ;;  %v853_v22 = vpop.f32.mrf.mxu3  ;;  %v3347_v48 = vmul.f32 %v3050_v34, %v3050_v34  ;;  %v2471_v27 = vadd.f32 0.5, %v2174_v56  ;;  %v2768_v56 = vld [vmem:[%s5609_s20 + $0x288] sm:$0xff] }
 0x174   : > { %v6094_v37 = vadd.f32 %v3617_v43, %v3338_v30  ;;  %v2455_v20 = vadd.f32 0.5, %v2158_v9  ;;  %v2166_v21 = vmul.f32 0.5, %v4723_v18  ;;  %v4725_v30 = vpop.eup %4724  ;;  %v3585_v11 = vadd.f32 %v3345_v46, %v3344_v15  ;;  %v2762_v43 = vld [vmem:[%s5609_s20 + $0x258] sm:$0xff]  ;;  %v6110_v18 = vld [vmem:[%s5619_s12 + $0xe0] sm:$0xff] }
 0x175   : > { %4730 = vtanh.f32 %v1581_v13  ;;  %4296 = vmatmul.msk.f32.gmra.mxu1 %vm355_vm0, %v5750_v38  ;;  %4329 = vmatmul.msk.f32.gmra.mxu2 %vm355_vm0, %v5750_v38  ;;  %v6102_v14 = vpop.f32.mrf.mxu0  ;;  %v4727_v24 = vpop.eup %4726  ;;  %v1598_v25 = vmul.f32 0.5, %v5838_v50 }
 0x176   : > { %v3049_v26 = vsub.f32 %v2455_v20, %v2752_v17  ;;  %v2463_v19 = vadd.f32 0.5, %v2166_v21  ;;  %4732 = vtanh.f32 %v1589_v39  ;;  %v3056_v17 = vsub.f32 %v2462_v45, %v2759_v47 }
 0x177   : > { %4734 = vtanh.f32 %v1742_v16  ;;  %v3059_v20 = vsub.f32 %v2465_v41, %v2762_v43  ;;  %v2177_v21 = vmul.f32 0.5, %v4727_v24  ;;  %v2255_v47 = vmul.f32 0.5, %v4725_v30 }
 0x178   : > { %v3346_v35 = vmul.f32 %v3049_v26, %v3049_v26  ;;  %v3057_v32 = vsub.f32 %v2463_v19, %v2760_v29  ;;  %v731_v9 = vpop.f32.mrf.mxu2  ;;  %4395 = vmatmul.msk.f32.gmra.mxu0 %vm355_vm0, %v5750_v38  ;;  %4365 = vmatmul.msk.f32.gmra.mxu3 %vm355_vm0, %v6110_v18  ;;  %4736 = vtanh.f32 %v1592_v33  ;;  %v2761_v38 = vld [vmem:[%s5609_s20 + $0x250] sm:$0xff]  ;;  %v3353_v41 = vmul.f32 %v3056_v17, %v3056_v17 }
 0x179   : > { %v4729_v42 = vpop.eup %4728  ;;  %v1582_v39 = vmul.f32 0.5, %v731_v9  ;;  %v3065_v9 = vsub.f32 %v2471_v27, %v2768_v56  ;;  %v2474_v30 = vadd.f32 0.5, %v2177_v21  ;;  %v6130_v56 = vld [vmem:[%s5619_s12 + $0xe8] sm:$0xff] }
 0x17a   : > { %v3618_v34 = vadd.f32 %v3585_v11, %v3346_v35  ;;  %v2167_v13 = vmul.f32 0.5, %v4729_v42  ;;  %v618_v10 = vpop.f32.mrf.mxu1  ;;  %v3354_v16 = vmul.f32 %v3057_v32, %v3057_v32  ;;  %v2769_v11 = vld [vmem:[%s5609_s20 + $0x290] sm:$0xff] }
 0x17b   : > { %v4731_v46 = vpop.eup %4730  ;;  %4738 = vtanh.f32 %v1582_v39  ;;  %v1590_v50 = vmul.f32 0.5, %v618_v10  ;;  %v856_v19 = vpop.f32.mrf.mxu3  ;;  %v5248_v35 = vld [vmem:[%s5619_s12 + $0xd0] sm:$0xff]  ;;  %v3356_v10 = vmul.f32 %v3059_v20, %v3059_v20 }
 0x17c   : > { %v6116_v15 = vadd.f32 %v3618_v34, %v3347_v48  ;;  %v2464_v29 = vadd.f32 0.5, %v2167_v13  ;;  %v2175_v26 = vmul.f32 0.5, %v4731_v46  ;;  %v4733_v45 = vpop.eup %4732  ;;  %v1601_v48 = vmul.f32 0.5, %v853_v22  ;;  %v2771_v46 = vld [vmem:[%s5609_s20 + $0x2a0] sm:$0xff] }
 0x17d   : > { %4740 = vtanh.f32 %v1590_v50  ;;  %4297 = vmatmul.msk.f32.gmra.mxu1 %vm355_vm0, %v5248_v35  ;;  %4330 = vmatmul.msk.f32.gmra.mxu2 %vm355_vm0, %v5248_v35  ;;  %v6122_v33 = vpop.f32.mrf.mxu0  ;;  %v6124_v43 = vpop.eup %4734  ;;  %v3586_v39 = vadd.f32 %v3354_v16, %v3353_v41  ;;  %v1670_v22 = vmul.f32 0.5, %v5833_v49  ;;  %v2849_v49 = vld [vmem:[%s5609_s20 + $0x510] sm:$0xff] }
 0x17e   : > { %7357 = vst [vmem:[#allocation20_spill] sm:$0xff] %v6116_v15  ;;  %v3058_v24 = vsub.f32 %v2464_v29, %v2761_v38  ;;  %v2472_v32 = vadd.f32 0.5, %v2175_v26  ;;  %4742 = vtanh.f32 %v1598_v25  ;;  %v4737_v42 = vpop.eup %4736  ;;  %v2552_v38 = vadd.f32 0.5, %v2255_v47 }
 0x17f   : > { %v2183_v29 = vmul.f32 0.5, %v4733_v45  ;;  %v1607_v25 = vmul.f32 0.5, %v5854_v54  ;;  %4744 = vtanh.f32 %v1601_v48  ;;  %v3068_v47 = vsub.f32 %v2474_v30, %v2771_v46 }
 0x180   : > { %v3355_v34 = vmul.f32 %v3058_v24, %v3058_v24  ;;  %v3066_v13 = vsub.f32 %v2472_v32, %v2769_v11  ;;  %v734_v50 = vpop.f32.mrf.mxu2  ;;  %4396 = vmatmul.msk.f32.gmra.mxu0 %vm355_vm0, %v5248_v35  ;;  %4366 = vmatmul.msk.f32.gmra.mxu3 %vm355_vm0, %v6130_v56  ;;  %v2770_v11 = vld [vmem:[%s5609_s20 + $0x298] sm:$0xff]  ;;  %v2186_v35 = vmul.f32 0.5, %v4737_v42  ;;  %v1751_v48 = vmul.f32 0.5, %v5840_v51  ;;  %v2777_v42 = vld [vmem:[%s5609_s20 + $0x2d0] sm:$0xff] }
 0x181   : > { %v4739_v17 = vpop.eup %4738  ;;  %v1591_v27 = vmul.f32 0.5, %v734_v50  ;;  %v1610_v46 = vmul.f32 0.5, %v856_v19 }
 0x182   : > { %v3619_v20 = vadd.f32 %v3586_v39, %v3355_v34  ;;  %v2176_v21 = vmul.f32 0.5, %v4739_v17  ;;  %v621_v16 = vpop.f32.mrf.mxu1  ;;  %v3363_v41 = vmul.f32 %v3066_v13, %v3066_v13  ;;  %v3362_v39 = vmul.f32 %v3065_v9, %v3065_v9  ;;  %v2778_v17 = vld [vmem:[%s5609_s20 + $0x2d8] sm:$0xff] }
 0x183   : > { %v4741_v26 = vpop.eup %4740  ;;  %4746 = vtanh.f32 %v1591_v27  ;;  %v1599_v45 = vmul.f32 0.5, %v621_v16  ;;  %v859_v15 = vpop.f32.mrf.mxu3  ;;  %v2480_v34 = vadd.f32 0.5, %v2183_v29  ;;  %v3146_v9 = vsub.f32 %v2552_v38, %v2849_v49  ;;  %v6152_v38 = vld [vmem:[%s5619_s12 + $0xf0] sm:$0xff] }
 0x184   : > { %v6137_v24 = vadd.f32 %v3619_v20, %v3356_v10  ;;  %v2473_v32 = vadd.f32 0.5, %v2176_v21  ;;  %v2184_v50 = vmul.f32 0.5, %v4741_v26  ;;  %v4743_v54 = vpop.eup %4742  ;;  %v2483_v51 = vadd.f32 0.5, %v2186_v35  ;;  %v2780_v26 = vld [vmem:[%s5609_s20 + $0x2e8] sm:$0xff] }
 0x185   : > { %4748 = vtanh.f32 %v1599_v45  ;;  %4298 = vmatmul.msk.f32.gmra.mxu1 %vm355_vm0, %v6089_v23  ;;  %4331 = vmatmul.msk.f32.gmra.mxu2 %vm355_vm0, %v6089_v23  ;;  %v6145_v30 = vpop.f32.mrf.mxu0  ;;  %v4745_v29 = vpop.eup %4744  ;;  %v3587_v27 = vadd.f32 %v3363_v41, %v3362_v39  ;;  %v3365_v16 = vmul.f32 %v3068_v47, %v3068_v47 }
 0x186   : > { %7358 = vst [vmem:[#allocation21_spill] sm:$0xff] %v6137_v24  ;;  %4750 = vtanh.f32 %v1670_v22  ;;  %v3067_v13 = vsub.f32 %v2473_v32, %v2770_v11  ;;  %v2481_v10 = vadd.f32 0.5, %v2184_v50  ;;  %v3074_v22 = vsub.f32 %v2480_v34, %v2777_v42  ;;  %v2779_v32 = vld [vmem:[%s5609_s20 + $0x2e0] sm:$0xff] }
 0x187   : > { %4752 = vtanh.f32 %v1607_v25  ;;  %v2192_v11 = vmul.f32 0.5, %v4743_v54  ;;  %v1616_v25 = vmul.f32 0.5, %v5870_v58  ;;  %v2195_v54 = vmul.f32 0.5, %v4745_v29 }
 0x188   : > { %v3364_v20 = vmul.f32 %v3067_v13, %v3067_v13  ;;  %v3075_v21 = vsub.f32 %v2481_v10, %v2778_v17  ;;  %v737_v45 = vpop.f32.mrf.mxu2  ;;  %4397 = vmatmul.msk.f32.gmra.mxu0 %vm355_vm0, %v6089_v23  ;;  %4754 = vtanh.f32 %v1751_v48  ;;  %4367 = vmatmul.msk.f32.gmra.mxu3 %vm355_vm0, %v6152_v38  ;;  %v3077_v23 = vsub.f32 %v2483_v51, %v2780_v26 }
 0x189   : > { %v4747_v24 = vpop.eup %4746  ;;  %v1600_v19 = vmul.f32 0.5, %v737_v45  ;;  %4756 = vtanh.f32 %v1610_v46  ;;  %v2489_v10 = vadd.f32 0.5, %v2192_v11  ;;  %v2336_v46 = vmul.f32 0.5, %v6124_v43 }
 0x18a   : > { %v3620_v35 = vadd.f32 %v3587_v27, %v3364_v20  ;;  %v2185_v47 = vmul.f32 0.5, %v4747_v24  ;;  %v624_v49 = vpop.f32.mrf.mxu1  ;;  %v3372_v34 = vmul.f32 %v3075_v21, %v3075_v21  ;;  %v1679_v24 = vmul.f32 0.5, %v5848_v53  ;;  %v2787_v27 = vld [vmem:[%s5609_s20 + $0x320] sm:$0xff]  ;;  %v2786_v20 = vld [vmem:[%s5609_s20 + $0x318] sm:$0xff] }
 0x18b   : > { %v4749_v41 = vpop.eup %4748  ;;  %4758 = vtanh.f32 %v1600_v19  ;;  %v1608_v50 = vmul.f32 0.5, %v624_v49  ;;  %v862_v13 = vpop.f32.mrf.mxu3  ;;  %v3371_v29 = vmul.f32 %v3074_v22, %v3074_v22  ;;  %v1619_v26 = vmul.f32 0.5, %v859_v15 }
 0x18c   : > { %v4751_v39 = vpop.eup %4750  ;;  %v6158_v48 = vadd.f32 %v3620_v35, %v3365_v16  ;;  %v2482_v17 = vadd.f32 0.5, %v2185_v47  ;;  %v2193_v42 = vmul.f32 0.5, %v4749_v41  ;;  %v6170_v53 = vmul.f32 %v3146_v9, %v3146_v9 }
 0x18d   : > { %v4753_v58 = vpop.eup %4752  ;;  %4760 = vtanh.f32 %v1608_v50  ;;  %4299 = vmatmul.msk.f32.gmra.mxu1 %vm355_vm0, %v6110_v18  ;;  %4332 = vmatmul.msk.f32.gmra.mxu2 %vm355_vm0, %v6110_v18  ;;  %v6167_v51 = vpop.f32.mrf.mxu0  ;;  %v2264_v43 = vmul.f32 0.5, %v4751_v39  ;;  %v2492_v11 = vadd.f32 0.5, %v2195_v54  ;;  %v3588_v35 = vadd.f32 %v3372_v34, %v3371_v29  ;;  %v2789_v50 = vld [vmem:[%s5609_s20 + $0x330] sm:$0xff]  ;;  %v6176_v39 = vld [vmem:[%s5619_s12 + $0xf8] sm:$0xff] }
 0x18e   : > { %7359 = vst [vmem:[#allocation22_spill] sm:$0xff] %v6158_v48  ;;  %v3076_v21 = vsub.f32 %v2482_v17, %v2779_v32  ;;  %v2490_v16 = vadd.f32 0.5, %v2193_v42  ;;  %v4755_v45 = vpop.eup %4754  ;;  %4762 = vtanh.f32 %v1616_v25  ;;  %v3374_v41 = vmul.f32 %v3077_v23, %v3077_v23  ;;  %v2788_v42 = vld [vmem:[%s5609_s20 + $0x328] sm:$0xff] }
 0x18f   : > { %v4757_v19 = vpop.eup %4756  ;;  %v3083_v15 = vsub.f32 %v2489_v10, %v2786_v20  ;;  %4764 = vtanh.f32 %v1679_v24  ;;  %v2201_v9 = vmul.f32 0.5, %v4753_v58  ;;  %v1625_v25 = vmul.f32 0.5, %v5886_v62 }
 0x190   : > { %v3373_v47 = vmul.f32 %v3076_v21, %v3076_v21  ;;  %v3084_v49 = vsub.f32 %v2490_v16, %v2787_v27  ;;  %v740_v48 = vpop.f32.mrf.mxu2  ;;  %4398 = vmatmul.msk.f32.gmra.mxu0 %vm355_vm0, %v6110_v18  ;;  %4368 = vmatmul.msk.f32.gmra.mxu3 %vm355_vm0, %v6176_v39  ;;  %4766 = vtanh.f32 %v1619_v26  ;;  %v3086_v18 = vsub.f32 %v2492_v11, %v2789_v50 }
 0x191   : > { %v4759_v22 = vpop.eup %4758  ;;  %v1609_v32 = vmul.f32 0.5, %v740_v48  ;;  %v2204_v24 = vmul.f32 0.5, %v4757_v19  ;;  %v3380_v21 = vmul.f32 %v3083_v15, %v3083_v15  ;;  %v2633_v16 = vadd.f32 0.5, %v2336_v46 }
 0x192   : > { %v3621_v54 = vadd.f32 %v3588_v35, %v3373_v47  ;;  %v2194_v23 = vmul.f32 0.5, %v4759_v22  ;;  %v627_v34 = vpop.f32.mrf.mxu1  ;;  %v3381_v58 = vmul.f32 %v3084_v49, %v3084_v49  ;;  %v1760_v26 = vmul.f32 0.5, %v5856_v55  ;;  %v2796_v35 = vld [vmem:[%s5609_s20 + $0x368] sm:$0xff]  ;;  %v2795_v22 = vld [vmem:[%s5609_s20 + $0x360] sm:$0xff] }
 0x193   : > { %v4761_v17 = vpop.eup %4760  ;;  %4768 = vtanh.f32 %v1609_v32  ;;  %v1617_v10 = vmul.f32 0.5, %v627_v34  ;;  %v6184_v20 = vpop.f32.mrf.mxu3  ;;  %v2498_v19 = vadd.f32 0.5, %v2201_v9  ;;  %v2561_v46 = vadd.f32 0.5, %v2264_v43 }
 0x194   : > { %v6182_v48 = vadd.f32 %v3621_v54, %v3374_v41  ;;  %v2491_v27 = vadd.f32 0.5, %v2194_v23  ;;  %v2202_v29 = vmul.f32 0.5, %v4761_v17  ;;  %v4763_v62 = vpop.eup %4762  ;;  %v1628_v41 = vmul.f32 0.5, %v862_v13 }
 0x195   : > { %4770 = vtanh.f32 %v1617_v10  ;;  %4300 = vmatmul.msk.f32.gmra.mxu1 %vm355_vm0, %v6130_v56  ;;  %4333 = vmatmul.msk.f32.gmra.mxu2 %vm355_vm0, %v6130_v56  ;;  %v6192_v11 = vpop.f32.mrf.mxu0  ;;  %v6194_v50 = vpop.eup %4764  ;;  %v2345_v55 = vmul.f32 0.5, %v4755_v45  ;;  %v2501_v15 = vadd.f32 0.5, %v2204_v24  ;;  %v3589_v54 = vadd.f32 %v3381_v58, %v3380_v21  ;;  %v2798_v10 = vld [vmem:[%s5609_s20 + $0x378] sm:$0xff] }
 0x196   : > { %7360 = vst [vmem:[#allocation23_spill] sm:$0xff] %v6182_v48  ;;  %v3085_v47 = vsub.f32 %v2491_v27, %v2788_v42  ;;  %v2499_v49 = vadd.f32 0.5, %v2202_v29  ;;  %4772 = vtanh.f32 %v1625_v25  ;;  %v4767_v32 = vpop.eup %4766  ;;  %v3383_v17 = vmul.f32 %v3086_v18, %v3086_v18  ;;  %v6202_v25 = vld [vmem:[%s5619_s12 + $0x100] sm:$0xff]  ;;  %v2930_v18 = vld [vmem:[%s5609_s20 + $0x798] sm:$0xff] }
 0x197   : > { %v1688_v43 = vmul.f32 0.5, %v5864_v57  ;;  %v2210_v9 = vmul.f32 0.5, %v4763_v62  ;;  %4774 = vtanh.f32 %v1760_v26  ;;  %v3092_v42 = vsub.f32 %v2498_v19, %v2795_v22  ;;  %v2858_v26 = vld [vmem:[%s5609_s20 + $0x558] sm:$0xff] }
 0x198   : > { %v3382_v23 = vmul.f32 %v3085_v47, %v3085_v47  ;;  %v3093_v34 = vsub.f32 %v2499_v49, %v2796_v35  ;;  %v743_v48 = vpop.f32.mrf.mxu2  ;;  %4399 = vmatmul.msk.f32.gmra.mxu0 %vm355_vm0, %v6130_v56  ;;  %4369 = vmatmul.msk.f32.gmra.mxu3 %vm355_vm0, %v6202_v25  ;;  %4776 = vtanh.f32 %v1628_v41  ;;  %v2797_v56 = vld [vmem:[%s5609_s20 + $0x370] sm:$0xff]  ;;  %v3095_v21 = vsub.f32 %v2501_v15, %v2798_v10 }
 0x199   : > { %v4769_v13 = vpop.eup %4768  ;;  %v1618_v45 = vmul.f32 0.5, %v743_v48  ;;  %v2213_v62 = vmul.f32 0.5, %v4767_v32  ;;  %v1634_v41 = vmul.f32 0.5, %v5902_v2  ;;  %v3389_v32 = vmul.f32 %v3092_v42, %v3092_v42 }
 0x19a   : > { %v3622_v24 = vadd.f32 %v3589_v54, %v3382_v23  ;;  %v2203_v58 = vmul.f32 0.5, %v4769_v13  ;;  %v630_v27 = vpop.f32.mrf.mxu1  ;;  %v3390_v48 = vmul.f32 %v3093_v34, %v3093_v34  ;;  %v2507_v54 = vadd.f32 0.5, %v2210_v9  ;;  %v2805_v13 = vld [vmem:[%s5609_s20 + $0x3b0] sm:$0xff]  ;;  %v2804_v34 = vld [vmem:[%s5609_s20 + $0x3a8] sm:$0xff] }
 0x19b   : > { %v4771_v29 = vpop.eup %4770  ;;  %4778 = vtanh.f32 %v1618_v45  ;;  %v1626_v57 = vmul.f32 0.5, %v630_v27  ;;  %v6211_v19 = vpop.f32.mrf.mxu3  ;;  %v3227_v23 = vsub.f32 %v2633_v16, %v2930_v18  ;;  %v1637_v9 = vmul.f32 0.5, %v6184_v20 }
 0x19c   : > { %v6209_v35 = vadd.f32 %v3622_v24, %v3383_v17  ;;  %v2500_v47 = vadd.f32 0.5, %v2203_v58  ;;  %v2211_v49 = vmul.f32 0.5, %v4771_v29  ;;  %v4773_v22 = vpop.eup %4772  ;;  %v3155_v2 = vsub.f32 %v2561_v46, %v2858_v26 }
 0x19d   : > { %4780 = vtanh.f32 %v1626_v57  ;;  %4301 = vmatmul.msk.f32.gmra.mxu1 %vm355_vm0, %v6152_v38  ;;  %4334 = vmatmul.msk.f32.gmra.mxu2 %vm355_vm0, %v6152_v38  ;;  %v6219_v15 = vpop.f32.mrf.mxu0  ;;  %v6223_v16 = vpop.eup %4774  ;;  %v2642_v45 = vadd.f32 0.5, %v2345_v55  ;;  %v2510_v18 = vadd.f32 0.5, %v2213_v62  ;;  %v3590_v58 = vadd.f32 %v3390_v48, %v3389_v32 }
 0x19e   : > { %7361 = vst [vmem:[#allocation24_spill] sm:$0xff] %v6209_v35  ;;  %v3094_v17 = vsub.f32 %v2500_v47, %v2797_v56  ;;  %v2508_v10 = vadd.f32 0.5, %v2211_v49  ;;  %4782 = vtanh.f32 %v1688_v43  ;;  %v4777_v24 = vpop.eup %4776  ;;  %v3392_v57 = vmul.f32 %v3095_v21, %v3095_v21  ;;  %v2807_v35 = vld [vmem:[%s5609_s20 + $0x3c0] sm:$0xff] }
 0x19f   : > { %v3101_v20 = vsub.f32 %v2507_v54, %v2804_v34  ;;  %v2219_v47 = vmul.f32 0.5, %v4773_v22  ;;  %4784 = vtanh.f32 %v1634_v41  ;;  %v6229_v43 = vld [vmem:[%s5619_s12] sm:$0xff]  ;;  %v1643_v55 = vmul.f32 0.5, %v5918_v7 }
 0x1a0   : > { %v3391_v27 = vmul.f32 %v3094_v17, %v3094_v17  ;;  %v3102_v29 = vsub.f32 %v2508_v10, %v2805_v13  ;;  %v746_v42 = vpop.f32.mrf.mxu2  ;;  %4400 = vmatmul.msk.f32.gmra.mxu0 %vm355_vm0, %v6152_v38  ;;  %4469 = vmatmul.msk.f32.vlgmr.msra.gmra.mxu3 %vm355_vm0, %v6229_v43  ;;  %4786 = vtanh.f32 %v1637_v9  ;;  %v2806_v38 = vld [vmem:[%s5609_s20 + $0x3b8] sm:$0xff]  ;;  %v3104_v49 = vsub.f32 %v2510_v18, %v2807_v35  ;;  %v2939_v41 = vld [vmem:[%s5609_s20 + $0x7e0] sm:$0xff] }
 0x1a1   : > { %v4779_v56 = vpop.eup %4778  ;;  %v1627_v46 = vmul.f32 0.5, %v746_v42  ;;  %v2222_v54 = vmul.f32 0.5, %v4777_v24  ;;  %v2273_v9 = vmul.f32 0.5, %v6194_v50  ;;  %v2814_v35 = vld [vmem:[%s5609_s20 + $0x3f8] sm:$0xff]  ;;  %v3398_v24 = vmul.f32 %v3101_v20, %v3101_v20 }
 0x1a2   : > { %v3623_v21 = vadd.f32 %v3590_v58, %v3391_v27  ;;  %v2212_v62 = vmul.f32 0.5, %v4779_v56  ;;  %v633_v26 = vpop.f32.mrf.mxu1  ;;  %v3399_v13 = vmul.f32 %v3102_v29, %v3102_v29  ;;  %v6243_v58 = vmul.f32 %v3227_v23, %v3227_v23  ;;  %v2813_v29 = vld [vmem:[%s5609_s20 + $0x3f0] sm:$0xff] }
 0x1a3   : > { %v4781_v48 = vpop.eup %4780  ;;  %4788 = vtanh.f32 %v1627_v46  ;;  %v1635_v22 = vmul.f32 0.5, %v633_v26  ;;  %v6238_v10 = vpop.f32.mrf.mxu3  ;;  %v2516_v27 = vadd.f32 0.5, %v2219_v47  ;;  %v1646_v50 = vmul.f32 0.5, %v6211_v19 }
 0x1a4   : > { %v6236_v32 = vadd.f32 %v3623_v21, %v3392_v57  ;;  %v2509_v34 = vadd.f32 0.5, %v2212_v62  ;;  %v2220_v17 = vmul.f32 0.5, %v4781_v48  ;;  %v6240_v7 = vpop.eup %4782  ;;  %v6254_v56 = vmul.f32 %v3155_v2, %v3155_v2 }
 0x1a5   : > { %4790 = vtanh.f32 %v1635_v22  ;;  %4302 = vmatmul.msk.f32.gmra.mxu1 %vm355_vm0, %v6176_v39  ;;  %4335 = vmatmul.msk.f32.gmra.mxu2 %vm355_vm0, %v6176_v39  ;;  %v6250_v18 = vpop.f32.mrf.mxu0  ;;  %v4785_v23 = vpop.eup %4784  ;;  %v3236_v47 = vsub.f32 %v2642_v45, %v2939_v41  ;;  %v2519_v46 = vadd.f32 0.5, %v2222_v54  ;;  %v3591_v62 = vadd.f32 %v3399_v13, %v3398_v24  ;;  %v2867_v24 = vld [vmem:[%s5609_s20 + $0x5a0] sm:$0xff] }
 0x1a6   : > { %7362 = vst [vmem:[#allocation25_spill] sm:$0xff] %v6236_v32  ;;  %v3103_v57 = vsub.f32 %v2509_v34, %v2806_v38  ;;  %v2517_v42 = vadd.f32 0.5, %v2220_v17  ;;  %4792 = vtanh.f32 %v1643_v55  ;;  %v4787_v21 = vpop.eup %4786  ;;  %v3401_v22 = vmul.f32 %v3104_v49, %v3104_v49  ;;  %v2816_v32 = vld [vmem:[%s5609_s20 + $0x408] sm:$0xff] }
 0x1a7   : > { %v2570_v19 = vadd.f32 0.5, %v2273_v9  ;;  %v3110_v34 = vsub.f32 %v2516_v27, %v2813_v29  ;;  %v1769_v2 = vmul.f32 0.5, %v5872_v59  ;;  %v6261_v55 = vld [vmem:[%s5619_s12 + $0x8] sm:$0xff]  ;;  %v2228_v54 = vmul.f32 0.5, %v4785_v23 }
 0x1a8   : > { %v3400_v26 = vmul.f32 %v3103_v57, %v3103_v57  ;;  %v3111_v48 = vsub.f32 %v2517_v42, %v2814_v35  ;;  %v749_v20 = vpop.f32.mrf.mxu2  ;;  %4401 = vmatmul.msk.f32.gmra.mxu0 %vm355_vm0, %v6176_v39  ;;  %4470 = vmatmul.msk.f32.gmra.mxu3 %vm355_vm0, %v6261_v55  ;;  %4794 = vtanh.f32 %v1646_v50  ;;  %v2815_v39 = vld [vmem:[%s5609_s20 + $0x400] sm:$0xff]  ;;  %v3113_v35 = vsub.f32 %v2519_v46, %v2816_v32 }
 0x1a9   : > { %v4789_v38 = vpop.eup %4788  ;;  %v1636_v45 = vmul.f32 0.5, %v749_v20  ;;  %v2231_v27 = vmul.f32 0.5, %v4787_v21  ;;  %v1652_v50 = vmul.f32 0.5, %v5932_v12  ;;  %v2525_v46 = vadd.f32 0.5, %v2228_v54 }
 0x1aa   : > { %v3624_v49 = vadd.f32 %v3591_v62, %v3400_v26  ;;  %v2221_v41 = vmul.f32 0.5, %v4789_v38  ;;  %v636_v13 = vpop.f32.mrf.mxu1  ;;  %v3408_v59 = vmul.f32 %v3111_v48, %v3111_v48  ;;  %v3407_v62 = vmul.f32 %v3110_v34, %v3110_v34  ;;  %v2823_v38 = vld [vmem:[%s5609_s20 + $0x440] sm:$0xff]  ;;  %v2822_v34 = vld [vmem:[%s5609_s20 + $0x438] sm:$0xff] }
 0x1ab   : > { %v4791_v17 = vpop.eup %4790  ;;  %4796 = vtanh.f32 %v1636_v45  ;;  %v1644_v9 = vmul.f32 0.5, %v636_v13  ;;  %v874_v20 = vpop.f32.mrf.mxu3  ;;  %v6269_v26 = vmul.f32 %v3236_v47, %v3236_v47  ;;  %v3164_v47 = vsub.f32 %v2570_v19, %v2867_v24 }
 0x1ac   : > { %v6267_v29 = vadd.f32 %v3624_v49, %v3401_v22  ;;  %v2518_v57 = vadd.f32 0.5, %v2221_v41  ;;  %v2229_v42 = vmul.f32 0.5, %v4791_v17  ;;  %v4793_v23 = vpop.eup %4792  ;;  %v1655_v22 = vmul.f32 0.5, %v6238_v10 }
 0x1ad   : > { %7364 = vst [vmem:[#allocation27_spill] sm:$0xff] %v6269_v26  ;;  %4798 = vtanh.f32 %v1644_v9  ;;  %4303 = vmatmul.msk.f32.gmra.mxu1 %vm355_vm0, %v6202_v25  ;;  %4336 = vmatmul.msk.f32.gmra.mxu2 %vm355_vm0, %v6202_v25  ;;  %v6277_v32 = vpop.f32.mrf.mxu0  ;;  %v2354_v12 = vmul.f32 0.5, %v6223_v16  ;;  %v2528_v45 = vadd.f32 0.5, %v2231_v27  ;;  %v3592_v41 = vadd.f32 %v3408_v59, %v3407_v62 }
 0x1ae   : > { %7363 = vst [vmem:[#allocation26_spill] sm:$0xff] %v6267_v29  ;;  %v3112_v21 = vsub.f32 %v2518_v57, %v2815_v39  ;;  %v2526_v48 = vadd.f32 0.5, %v2229_v42  ;;  %4800 = vtanh.f32 %v1769_v2  ;;  %v4795_v49 = vpop.eup %4794  ;;  %v3410_v9 = vmul.f32 %v3113_v35, %v3113_v35  ;;  %v2825_v29 = vld [vmem:[%s5609_s20 + $0x450] sm:$0xff]  ;;  %v2824_v57 = vld [vmem:[%s5609_s20 + $0x448] sm:$0xff] }
 0x1af   : > { %v1697_v10 = vmul.f32 0.5, %v5880_v61  ;;  %v2237_v19 = vmul.f32 0.5, %v4793_v23  ;;  %4802 = vtanh.f32 %v1652_v50  ;;  %v6287_v39 = vld [vmem:[%s5619_s12 + $0x10] sm:$0xff]  ;;  %v3119_v2 = vsub.f32 %v2525_v46, %v2822_v34  ;;  %v2832_v34 = vld [vmem:[%s5609_s20 + $0x488] sm:$0xff] }
 0x1b0   : > { %v3409_v13 = vmul.f32 %v3112_v21, %v3112_v21  ;;  %v3120_v17 = vsub.f32 %v2526_v48, %v2823_v38  ;;  %v752_v26 = vpop.f32.mrf.mxu2  ;;  %4402 = vmatmul.msk.f32.gmra.mxu0 %vm355_vm0, %v6202_v25  ;;  %4471 = vmatmul.msk.f32.gmra.mxu3 %vm355_vm0, %v6287_v39  ;;  %4804 = vtanh.f32 %v1655_v22  ;;  %v3122_v25 = vsub.f32 %v2528_v45, %v2825_v29 }
 0x1b1   : > { %v4797_v54 = vpop.eup %4796  ;;  %v1645_v16 = vmul.f32 0.5, %v752_v26  ;;  %v2240_v61 = vmul.f32 0.5, %v4795_v49  ;;  %v6296_v21 = vmul.f32 %v3164_v47, %v3164_v47  ;;  %v2534_v48 = vadd.f32 0.5, %v2237_v19  ;;  %v2831_v49 = vld [vmem:[%s5609_s20 + $0x480] sm:$0xff] }
 0x1b2   : > { %v3625_v27 = vadd.f32 %v3592_v41, %v3409_v13  ;;  %v2230_v35 = vmul.f32 0.5, %v4797_v54  ;;  %v639_v24 = vpop.f32.mrf.mxu1  ;;  %v3417_v23 = vmul.f32 %v3120_v17, %v3120_v17  ;;  %v1778_v22 = vmul.f32 0.5, %v5888_v63 }
 0x1b3   : > { %v4799_v59 = vpop.eup %4798  ;;  %4806 = vtanh.f32 %v1645_v16  ;;  %v1653_v42 = vmul.f32 0.5, %v639_v24  ;;  %v6294_v38 = vpop.f32.mrf.mxu3  ;;  %v3416_v45 = vmul.f32 %v3119_v2, %v3119_v2  ;;  %v1664_v47 = vmul.f32 0.5, %v874_v20 }
 0x1b4   : > { %v6292_v62 = vadd.f32 %v3625_v27, %v3410_v9  ;;  %v2527_v26 = vadd.f32 0.5, %v2230_v35  ;;  %v2238_v50 = vmul.f32 0.5, %v4799_v59  ;;  %v4801_v46 = vpop.eup %4800  ;;  %v2282_v9 = vmul.f32 0.5, %v6240_v7  ;;  %v2834_v59 = vld [vmem:[%s5609_s20 + $0x498] sm:$0xff] }
 0x1b5   : > { %4808 = vtanh.f32 %v1653_v42  ;;  %4403 = vmatmul.msk.f32.vlgmr.msra.gmra.mxu1 %vm355_vm0, %v6229_v43  ;;  %4436 = vmatmul.msk.f32.vlgmr.msra.gmra.mxu2 %vm355_vm0, %v6229_v43  ;;  %v6304_v29 = vpop.f32.mrf.mxu0  ;;  %v4803_v17 = vpop.eup %4802  ;;  %v2651_v63 = vadd.f32 0.5, %v2354_v12  ;;  %v2537_v54 = vadd.f32 0.5, %v2240_v61  ;;  %v3593_v16 = vadd.f32 %v3417_v23, %v3416_v45  ;;  %v6313_v12 = vld [vmem:[%s5619_s12 + $0x18] sm:$0xff] }
 0x1b6   : > { %7365 = vst [vmem:[#allocation28_spill] sm:$0xff] %v6292_v62  ;;  %v3121_v41 = vsub.f32 %v2527_v26, %v2824_v57  ;;  %v2535_v13 = vadd.f32 0.5, %v2238_v50  ;;  %4810 = vtanh.f32 %v1697_v10  ;;  %v4805_v19 = vpop.eup %4804  ;;  %v3419_v24 = vmul.f32 %v3122_v25, %v3122_v25 }
 0x1b7   : > { %7366 = vst [vmem:[#allocation29_spill] sm:$0xff] %v6304_v29  ;;  %v1706_v20 = vmul.f32 0.5, %v5896_v1  ;;  %v3128_v57 = vsub.f32 %v2534_v48, %v2831_v49  ;;  %4812 = vtanh.f32 %v1778_v22  ;;  %v2246_v10 = vmul.f32 0.5, %v4803_v17  ;;  %v2859_v29 = vld [vmem:[%s5609_s20 + $0x560] sm:$0xff] }
 0x1b8   : > { %v3418_v27 = vmul.f32 %v3121_v41, %v3121_v41  ;;  %v3129_v35 = vsub.f32 %v2535_v13, %v2832_v34  ;;  %v755_v42 = vpop.f32.mrf.mxu2  ;;  %4502 = vmatmul.msk.f32.vlgmr.msra.gmra.mxu0 %vm355_vm0, %v6229_v43  ;;  %4472 = vmatmul.msk.f32.gmra.mxu3 %vm355_vm0, %v6313_v12  ;;  %4814 = vtanh.f32 %v1664_v47  ;;  %v2833_v43 = vld [vmem:[%s5609_s20 + $0x490] sm:$0xff]  ;;  %v3131_v50 = vsub.f32 %v2537_v54, %v2834_v59  ;;  %v2948_v34 = vld [vmem:[%s5609_s20 + $0x828] sm:$0xff] }
 0x1b9   : > { %v4807_v2 = vpop.eup %4806  ;;  %v1654_v7 = vmul.f32 0.5, %v755_v42  ;;  %v2249_v48 = vmul.f32 0.5, %v4805_v19  ;;  %v1787_v47 = vmul.f32 0.5, %v5904_v4  ;;  %v2841_v42 = vld [vmem:[%s5609_s20 + $0x4d0] sm:$0xff]  ;;  %v2543_v19 = vadd.f32 0.5, %v2246_v10 }
 0x1ba   : > { %v3626_v25 = vadd.f32 %v3593_v16, %v3418_v27  ;;  %v2239_v61 = vmul.f32 0.5, %v4807_v2  ;;  %v642_v23 = vpop.f32.mrf.mxu1  ;;  %v3426_v22 = vmul.f32 %v3129_v35, %v3129_v35  ;;  %v3425_v16 = vmul.f32 %v3128_v57, %v3128_v57  ;;  %v2840_v57 = vld [vmem:[%s5609_s20 + $0x4c8] sm:$0xff] }
 0x1bb   : > { %v4809_v26 = vpop.eup %4808  ;;  %4816 = vtanh.f32 %v1654_v7  ;;  %v1662_v1 = vmul.f32 0.5, %v642_v23  ;;  %v6321_v13 = vpop.f32.mrf.mxu3  ;;  %v2363_v27 = vmul.f32 0.5, %v4801_v46  ;;  %v1673_v59 = vmul.f32 0.5, %v6294_v38  ;;  %v7369_v38 = vld [vmem:[#allocation14_spill] sm:$0xff] }
 0x1bc   : > { %v6319_v45 = vadd.f32 %v3626_v25, %v3419_v24  ;;  %v2536_v49 = vadd.f32 0.5, %v2239_v61  ;;  %v2247_v41 = vmul.f32 0.5, %v4809_v26  ;;  %v4811_v17 = vpop.eup %4810  ;;  %v2579_v46 = vadd.f32 0.5, %v2282_v9 }
 0x1bd   : > { %4818 = vtanh.f32 %v1662_v1  ;;  %4404 = vmatmul.msk.f32.gmra.mxu1 %vm355_vm0, %v6261_v55  ;;  %4437 = vmatmul.msk.f32.gmra.mxu2 %vm355_vm0, %v6261_v55  ;;  %v6329_v54 = vpop.f32.mrf.mxu0  ;;  %v4813_v2 = vpop.eup %4812  ;;  %v3245_v4 = vsub.f32 %v2651_v63, %v2948_v34  ;;  %v2546_v7 = vadd.f32 0.5, %v2249_v48  ;;  %v3594_v61 = vadd.f32 %v3426_v22, %v3425_v16 }
 0x1be   : > { %7367 = vst [vmem:[#allocation30_spill] sm:$0xff] %v6319_v45  ;;  %v3130_v35 = vsub.f32 %v2536_v49, %v2833_v43  ;;  %v2544_v24 = vadd.f32 0.5, %v2247_v41  ;;  %4820 = vtanh.f32 %v1706_v20  ;;  %v4815_v25 = vpop.eup %4814  ;;  %v3428_v1 = vmul.f32 %v3131_v50, %v3131_v50  ;;  %v2843_v45 = vld [vmem:[%s5609_s20 + $0x4e0] sm:$0xff] }
 0x1bf   : > { %7368 = vst [vmem:[#allocation31_spill] sm:$0xff] %v6329_v54  ;;  %v1715_v43 = vmul.f32 0.5, %v7369_v38  ;;  %v2660_v9 = vadd.f32 0.5, %v2363_v27  ;;  %4822 = vtanh.f32 %v1787_v47  ;;  %v6338_v20 = vld [vmem:[%s5619_s12 + $0x20] sm:$0xff]  ;;  %v3137_v50 = vsub.f32 %v2543_v19, %v2840_v57 }
 0x1c0   : > { %v3427_v23 = vmul.f32 %v3130_v35, %v3130_v35  ;;  %v3138_v26 = vsub.f32 %v2544_v24, %v2841_v42  ;;  %v758_v62 = vpop.f32.mrf.mxu2  ;;  %4503 = vmatmul.msk.f32.gmra.mxu0 %vm355_vm0, %v6261_v55  ;;  %4473 = vmatmul.msk.f32.gmra.mxu3 %vm355_vm0, %v6338_v20  ;;  %4824 = vtanh.f32 %v1673_v59  ;;  %v2842_v55 = vld [vmem:[%s5609_s20 + $0x4d8] sm:$0xff]  ;;  %v3140_v41 = vsub.f32 %v2546_v7, %v2843_v45  ;;  %v2876_v47 = vld [vmem:[%s5609_s20 + $0x5e8] sm:$0xff]  ;;  %v2957_v42 = vld [vmem:[%s5609_s20 + $0x870] sm:$0xff] }
 0x1c1   : > { %v4817_v10 = vpop.eup %4816  ;;  %v1663_v63 = vmul.f32 0.5, %v758_v62  ;;  %v2258_v27 = vmul.f32 0.5, %v4815_v25  ;;  %v2291_v57 = vmul.f32 0.5, %v4811_v17  ;;  %v2372_v59 = vmul.f32 0.5, %v4813_v2 }
 0x1c2   : > { %v3627_v48 = vadd.f32 %v3594_v61, %v3427_v23  ;;  %v2248_v34 = vmul.f32 0.5, %v4817_v10  ;;  %v645_v22 = vpop.f32.mrf.mxu1  ;;  %v3435_v62 = vmul.f32 %v3138_v26, %v3138_v26  ;;  %v6349_v61 = vmul.f32 %v3245_v4, %v3245_v4  ;;  %v2850_v23 = vld [vmem:[%s5609_s20 + $0x518] sm:$0xff] }
 0x1c3   : > { %v4819_v49 = vpop.eup %4818  ;;  %4826 = vtanh.f32 %v1663_v63  ;;  %v1671_v16 = vmul.f32 0.5, %v645_v22  ;;  %v6347_v54 = vpop.f32.mrf.mxu3  ;;  %v3434_v7 = vmul.f32 %v3137_v50, %v3137_v50  ;;  %v3173_v4 = vsub.f32 %v2579_v46, %v2876_v47 }
 0x1c4   : > { %v6345_v35 = vadd.f32 %v3627_v48, %v3428_v1  ;;  %v2545_v24 = vadd.f32 0.5, %v2248_v34  ;;  %v2256_v38 = vmul.f32 0.5, %v4819_v49  ;;  %v4821_v19 = vpop.eup %4820  ;;  %v1682_v1 = vmul.f32 0.5, %v6321_v13 }
 0x1c5   : > { %4828 = vtanh.f32 %v1671_v16  ;;  %4405 = vmatmul.msk.f32.gmra.mxu1 %vm355_vm0, %v6287_v39  ;;  %4438 = vmatmul.msk.f32.gmra.mxu2 %vm355_vm0, %v6287_v39  ;;  %v6356_v45 = vpop.f32.mrf.mxu0  ;;  %v6359_v17 = vpop.eup %4822  ;;  %v3254_v2 = vsub.f32 %v2660_v9, %v2957_v42  ;;  %v2555_v10 = vadd.f32 0.5, %v2258_v27  ;;  %v3595_v48 = vadd.f32 %v3435_v62, %v3434_v7  ;;  %v2852_v16 = vld [vmem:[%s5609_s20 + $0x528] sm:$0xff]  ;;  %v7372_v27 = vld [vmem:[#allocation15_spill] sm:$0xff] }
 0x1c6   : > { %7370 = vst [vmem:[#allocation14_spill] sm:$0xff] %v6345_v35  ;;  %v3139_v25 = vsub.f32 %v2545_v24, %v2842_v55  ;;  %v2553_v26 = vadd.f32 0.5, %v2256_v38  ;;  %4830 = vtanh.f32 %v1715_v43  ;;  %v4825_v63 = vpop.eup %4824  ;;  %v3437_v49 = vmul.f32 %v3140_v41, %v3140_v41  ;;  %v6365_v9 = vld [vmem:[%s5619_s12 + $0x28] sm:$0xff] }
 0x1c7   : > { %7371 = vst [vmem:[#allocation32_spill] sm:$0xff] %v6356_v45  ;;  %v2588_v50 = vadd.f32 0.5, %v2291_v57  ;;  %v2300_v55 = vmul.f32 0.5, %v4821_v19  ;;  %v2669_v46 = vadd.f32 0.5, %v2372_v59  ;;  %v1724_v41 = vmul.f32 0.5, %v7372_v27  ;;  %v2885_v38 = vld [vmem:[%s5609_s20 + $0x630] sm:$0xff] }
 0x1c8   : > { %v3436_v34 = vmul.f32 %v3139_v25, %v3139_v25  ;;  %v3147_v22 = vsub.f32 %v2553_v26, %v2850_v23  ;;  %v761_v35 = vpop.f32.mrf.mxu2  ;;  %4504 = vmatmul.msk.f32.gmra.mxu0 %vm355_vm0, %v6287_v39  ;;  %4474 = vmatmul.msk.f32.gmra.mxu3 %vm355_vm0, %v6365_v9  ;;  %4832 = vtanh.f32 %v1682_v1  ;;  %v2851_v39 = vld [vmem:[%s5609_s20 + $0x520] sm:$0xff]  ;;  %v3149_v57 = vsub.f32 %v2555_v10, %v2852_v16 }
 0x1c9   : > { %v4827_v13 = vpop.eup %4826  ;;  %v1672_v43 = vmul.f32 0.5, %v761_v35  ;;  %v2267_v59 = vmul.f32 0.5, %v4825_v63  ;;  %v2966_v35 = vld [vmem:[%s5609_s20 + $0x8b8] sm:$0xff]  ;;  %v3182_v63 = vsub.f32 %v2588_v50, %v2885_v38 }
 0x1ca   : > { %v3628_v47 = vadd.f32 %v3595_v48, %v3436_v34  ;;  %v2257_v42 = vmul.f32 0.5, %v4827_v13  ;;  %v648_v62 = vpop.f32.mrf.mxu1  ;;  %v3444_v23 = vmul.f32 %v3147_v22, %v3147_v22  ;;  %v6375_v48 = vmul.f32 %v3173_v4, %v3173_v4  ;;  %v7374_v1 = vld [vmem:[#allocation16_spill] sm:$0xff] }
 0x1cb   : > { %v4829_v24 = vpop.eup %4828  ;;  %4834 = vtanh.f32 %v1672_v43  ;;  %v1680_v19 = vmul.f32 0.5, %v648_v62  ;;  %v886_v45 = vpop.f32.mrf.mxu3  ;;  %v6377_v34 = vmul.f32 %v3254_v2, %v3254_v2  ;;  %v1733_v13 = vmul.f32 0.5, %v7374_v1  ;;  %v2861_v1 = vld [vmem:[%s5609_s20 + $0x570] sm:$0xff] }
 0x1cc   : > { %v6373_v7 = vadd.f32 %v3628_v47, %v3437_v49  ;;  %v2554_v25 = vadd.f32 0.5, %v2257_v42  ;;  %v2265_v26 = vmul.f32 0.5, %v4829_v24  ;;  %v4831_v27 = vpop.eup %4830  ;;  %v1691_v4 = vmul.f32 0.5, %v6347_v54 }
 0x1cd   : > { %4836 = vtanh.f32 %v1680_v19  ;;  %4406 = vmatmul.msk.f32.gmra.mxu1 %vm355_vm0, %v6313_v12  ;;  %4439 = vmatmul.msk.f32.gmra.mxu2 %vm355_vm0, %v6313_v12  ;;  %v6385_v10 = vpop.f32.mrf.mxu0  ;;  %v2597_v2 = vadd.f32 0.5, %v2300_v55  ;;  %v3263_v16 = vsub.f32 %v2669_v46, %v2966_v35  ;;  %v2564_v43 = vadd.f32 0.5, %v2267_v59  ;;  %v2860_v35 = vld [vmem:[%s5609_s20 + $0x568] sm:$0xff] }
 0x1ce   : > { %7373 = vst [vmem:[#allocation15_spill] sm:$0xff] %v6373_v7  ;;  %v3148_v22 = vsub.f32 %v2554_v25, %v2851_v39  ;;  %v2562_v49 = vadd.f32 0.5, %v2265_v26  ;;  %4838 = vtanh.f32 %v1724_v41  ;;  %v4833_v47 = vpop.eup %4832  ;;  %v3596_v42 = vadd.f32 %v3444_v23, %v6170_v53  ;;  %v6394_v41 = vld [vmem:[%s5619_s12 + $0x30] sm:$0xff]  ;;  %v7376_v53 = vld [vmem:[#allocation17_spill] sm:$0xff] }
 0x1cf   : > { %7375 = vst [vmem:[#allocation16_spill] sm:$0xff] %v6385_v10  ;;  %v3446_v19 = vmul.f32 %v3149_v57, %v3149_v57  ;;  %v2309_v54 = vmul.f32 0.5, %v4831_v27  ;;  %4840 = vtanh.f32 %v1733_v13  ;;  %v2381_v55 = vmul.f32 0.5, %v6359_v17  ;;  %v2877_v10 = vld [vmem:[%s5609_s20 + $0x5f0] sm:$0xff] }
 0x1d0   : > { %v3445_v62 = vmul.f32 %v3148_v22, %v3148_v22  ;;  %v3156_v24 = vsub.f32 %v2562_v49, %v2859_v29  ;;  %v764_v7 = vpop.f32.mrf.mxu2  ;;  %4505 = vmatmul.msk.f32.gmra.mxu0 %vm355_vm0, %v6313_v12  ;;  %4475 = vmatmul.msk.f32.gmra.mxu3 %vm355_vm0, %v6394_v41  ;;  %v1503_v29 = vmul.f32 0.5, %v7376_v53  ;;  %4842 = vtanh.f32 %v1691_v4  ;;  %v2894_v12 = vld [vmem:[%s5609_s20 + $0x678] sm:$0xff]  ;;  %v7378_v4 = vld [vmem:[#allocation18_spill] sm:$0xff] }
 0x1d1   : > { %v4835_v50 = vpop.eup %4834  ;;  %v1681_v46 = vmul.f32 0.5, %v764_v7  ;;  %v3158_v23 = vsub.f32 %v2564_v43, %v2861_v1  ;;  %v2276_v17 = vmul.f32 0.5, %v4833_v47  ;;  %v2868_v53 = vld [vmem:[%s5609_s20 + $0x5a8] sm:$0xff]  ;;  %v6417_v47 = vsub.f32 %v2597_v2, %v2894_v12  ;;  %v6425_v12 = vld [vmem:[%s5619_s12 + $0x38] sm:$0xff] }
 0x1d2   : > { %v3629_v38 = vadd.f32 %v3596_v42, %v3445_v62  ;;  %v2266_v39 = vmul.f32 0.5, %v4835_v50  ;;  %v651_v57 = vpop.f32.mrf.mxu1  ;;  %v3453_v7 = vmul.f32 %v3156_v24, %v3156_v24  ;;  %v6405_v42 = vmul.f32 %v3182_v63, %v3182_v63 }
 0x1d3   : > { %v4837_v59 = vpop.eup %4836  ;;  %4844 = vtanh.f32 %v1681_v46  ;;  %v1689_v25 = vmul.f32 0.5, %v651_v57  ;;  %v6403_v22 = vpop.f32.mrf.mxu3  ;;  %v6407_v62 = vmul.f32 %v3263_v16, %v3263_v16  ;;  %v1512_v50 = vmul.f32 0.5, %v7378_v4 }
 0x1d4   : > { %v6401_v26 = vadd.f32 %v3629_v38, %v3446_v19  ;;  %v2563_v27 = vadd.f32 0.5, %v2266_v39  ;;  %v2274_v13 = vmul.f32 0.5, %v4837_v59  ;;  %v4839_v49 = vpop.eup %4838  ;;  %v1700_v19 = vmul.f32 0.5, %v886_v45 }
 0x1d5   : > { %4846 = vtanh.f32 %v1689_v25  ;;  %4407 = vmatmul.msk.f32.gmra.mxu1 %vm355_vm0, %v6338_v20  ;;  %4440 = vmatmul.msk.f32.gmra.mxu2 %vm355_vm0, %v6338_v20  ;;  %v6415_v43 = vpop.f32.mrf.mxu0  ;;  %v4841_v16 = vpop.eup %4840  ;;  %v2606_v1 = vadd.f32 0.5, %v2309_v54  ;;  %v2678_v46 = vadd.f32 0.5, %v2381_v55  ;;  %v2573_v38 = vadd.f32 0.5, %v2276_v17  ;;  %v7380_v54 = vld [vmem:[#allocation19_spill] sm:$0xff] }
 0x1d6   : > { %7377 = vst [vmem:[#allocation17_spill] sm:$0xff] %v6401_v26  ;;  %v3157_v24 = vsub.f32 %v2563_v27, %v2860_v35  ;;  %v2571_v63 = vadd.f32 0.5, %v2274_v13  ;;  %4848 = vtanh.f32 %v1503_v29  ;;  %v4843_v39 = vpop.eup %4842  ;;  %v3597_v57 = vadd.f32 %v3453_v7, %v6254_v56  ;;  %v2870_v26 = vld [vmem:[%s5609_s20 + $0x5b8] sm:$0xff]  ;;  %v2869_v7 = vld [vmem:[%s5609_s20 + $0x5b0] sm:$0xff] }
 0x1d7   : > { %7379 = vst [vmem:[#allocation18_spill] sm:$0xff] %v6415_v43  ;;  %v3455_v4 = vmul.f32 %v3158_v23, %v3158_v23  ;;  %v2318_v45 = vmul.f32 0.5, %v4839_v49  ;;  %4850 = vtanh.f32 %v1512_v50  ;;  %v1521_v55 = vmul.f32 0.5, %v7380_v54  ;;  %v2903_v50 = vld [vmem:[%s5609_s20 + $0x6c0] sm:$0xff] }
 0x1d8   : > { %v3454_v59 = vmul.f32 %v3157_v24, %v3157_v24  ;;  %v3165_v25 = vsub.f32 %v2571_v63, %v2868_v53  ;;  %v767_v43 = vpop.f32.mrf.mxu2  ;;  %4506 = vmatmul.msk.f32.gmra.mxu0 %vm355_vm0, %v6338_v20  ;;  %4476 = vmatmul.msk.f32.gmra.mxu3 %vm355_vm0, %v6425_v12  ;;  %v1530_v56 = vmul.f32 0.5, %v5995_v6  ;;  %4852 = vtanh.f32 %v1700_v19  ;;  %v2975_v53 = vld [vmem:[%s5609_s20 + $0x900] sm:$0xff] }
 0x1d9   : > { %v4845_v2 = vpop.eup %4844  ;;  %v1690_v29 = vmul.f32 0.5, %v767_v43  ;;  %v3167_v27 = vsub.f32 %v2573_v38, %v2870_v26  ;;  %v2285_v49 = vmul.f32 0.5, %v4843_v39  ;;  %v2327_v19 = vmul.f32 0.5, %v4841_v16  ;;  %v2912_v38 = vld [vmem:[%s5609_s20 + $0x708] sm:$0xff] }
 0x1da   : > { %v3630_v35 = vadd.f32 %v3597_v57, %v3454_v59  ;;  %v2275_v23 = vmul.f32 0.5, %v4845_v2  ;;  %v654_v17 = vpop.f32.mrf.mxu1  ;;  %v3462_v43 = vmul.f32 %v3165_v25, %v3165_v25  ;;  %v2615_v59 = vadd.f32 0.5, %v2318_v45 }
 0x1db   : > { %v4847_v20 = vpop.eup %4846  ;;  %4854 = vtanh.f32 %v1690_v29  ;;  %v1698_v13 = vmul.f32 0.5, %v654_v17  ;;  %v6435_v6 = vpop.f32.mrf.mxu3  ;;  %v1539_v2 = vmul.f32 0.5, %v6012_v31  ;;  %v3200_v45 = vsub.f32 %v2606_v1, %v2903_v50  ;;  %v2878_v50 = vld [vmem:[%s5609_s20 + $0x5f8] sm:$0xff] }
 0x1dc   : > { %v6433_v24 = vadd.f32 %v3630_v35, %v3455_v4  ;;  %v2572_v63 = vadd.f32 0.5, %v2275_v23  ;;  %v2283_v54 = vmul.f32 0.5, %v4847_v20  ;;  %v4849_v57 = vpop.eup %4848  ;;  %v1709_v4 = vmul.f32 0.5, %v6403_v22 }
 0x1dd   : > { %4856 = vtanh.f32 %v1698_v13  ;;  %4408 = vmatmul.msk.f32.gmra.mxu1 %vm355_vm0, %v6365_v9  ;;  %4441 = vmatmul.msk.f32.gmra.mxu2 %vm355_vm0, %v6365_v9  ;;  %v6443_v26 = vpop.f32.mrf.mxu0  ;;  %v4851_v16 = vpop.eup %4850  ;;  %v3272_v31 = vsub.f32 %v2678_v46, %v2975_v53  ;;  %v2582_v29 = vadd.f32 0.5, %v2285_v49  ;;  %v3598_v23 = vadd.f32 %v3462_v43, %v6296_v21  ;;  %v6452_v46 = vld [vmem:[%s5619_s12 + $0x40] sm:$0xff] }
 0x1de   : > { %7381 = vst [vmem:[#allocation19_spill] sm:$0xff] %v6433_v24  ;;  %4858 = vtanh.f32 %v1521_v55  ;;  %v3166_v39 = vsub.f32 %v2572_v63, %v2869_v7  ;;  %v2580_v25 = vadd.f32 0.5, %v2283_v54  ;;  %v4853_v35 = vpop.eup %4852  ;;  %v3464_v13 = vmul.f32 %v3167_v27, %v3167_v27  ;;  %v2879_v24 = vld [vmem:[%s5609_s20 + $0x600] sm:$0xff]  ;;  %v2921_v54 = vld [vmem:[%s5609_s20 + $0x750] sm:$0xff] }
 0x1df   : > { %7382 = vst [vmem:[#allocation33_spill] sm:$0xff] %v6443_v26  ;;  %4860 = vtanh.f32 %v1530_v56  ;;  %v3209_v22 = vsub.f32 %v2615_v59, %v2912_v38  ;;  %v2097_v7 = vmul.f32 0.5, %v4849_v57  ;;  %v2624_v21 = vadd.f32 0.5, %v2327_v19 }
 0x1e0   : > { %v3463_v17 = vmul.f32 %v3166_v39, %v3166_v39  ;;  %v3174_v20 = vsub.f32 %v2580_v25, %v2877_v10  ;;  %v770_v26 = vpop.f32.mrf.mxu2  ;;  %4507 = vmatmul.msk.f32.gmra.mxu0 %vm355_vm0, %v6365_v9  ;;  %4862 = vtanh.f32 %v1539_v2  ;;  %4477 = vmatmul.msk.f32.gmra.mxu3 %vm355_vm0, %v6452_v46  ;;  %v3176_v9 = vsub.f32 %v2582_v29, %v2879_v24  ;;  %v2886_v24 = vld [vmem:[%s5609_s20 + $0x638] sm:$0xff] }
 0x1e1   : > { %v4855_v55 = vpop.eup %4854  ;;  %v1699_v1 = vmul.f32 0.5, %v770_v26  ;;  %4864 = vtanh.f32 %v1709_v4  ;;  %v2294_v43 = vmul.f32 0.5, %v4853_v35  ;;  %v6462_v39 = vmul.f32 %v6417_v47, %v6417_v47 }
 0x1e2   : > { %v3631_v10 = vadd.f32 %v3598_v23, %v3463_v17  ;;  %v2284_v56 = vmul.f32 0.5, %v4855_v55  ;;  %v657_v27 = vpop.f32.mrf.mxu1  ;;  %v3471_v57 = vmul.f32 %v3174_v20, %v3174_v20  ;;  %v2394_v25 = vadd.f32 0.5, %v2097_v7  ;;  %v2691_v23 = vld [vmem:[%s5609_s20 + $0x20] sm:$0xff] }
 0x1e3   : > { %v4857_v49 = vpop.eup %4856  ;;  %4866 = vtanh.f32 %v1699_v1  ;;  %v1707_v53 = vmul.f32 0.5, %v657_v27  ;;  %v895_v19 = vpop.f32.mrf.mxu3  ;;  %v2106_v4 = vmul.f32 0.5, %v4851_v16  ;;  %v6471_v35 = vmul.f32 %v3272_v31, %v3272_v31 }
 0x1e4   : > { %v4859_v63 = vpop.eup %4858  ;;  %v6458_v59 = vadd.f32 %v3631_v10, %v3464_v13  ;;  %v2581_v2 = vadd.f32 0.5, %v2284_v56  ;;  %v2292_v26 = vmul.f32 0.5, %v4857_v49  ;;  %v1718_v47 = vmul.f32 0.5, %v6435_v6 }
 0x1e5   : > { %v4861_v38 = vpop.eup %4860  ;;  %4868 = vtanh.f32 %v1707_v53  ;;  %4409 = vmatmul.msk.f32.gmra.mxu1 %vm355_vm0, %v6394_v41  ;;  %4442 = vmatmul.msk.f32.gmra.mxu2 %vm355_vm0, %v6394_v41  ;;  %v6469_v29 = vpop.f32.mrf.mxu0  ;;  %v6475_v16 = vmul.f32 %v3200_v45, %v3200_v45  ;;  %v6477_v55 = vmul.f32 %v3209_v22, %v3209_v22  ;;  %v3218_v7 = vsub.f32 %v2624_v21, %v2921_v54  ;;  %v2888_v53 = vld [vmem:[%s5609_s20 + $0x648] sm:$0xff] }
 0x1e6   : > { %7383 = vst [vmem:[#allocation34_spill] sm:$0xff] %v6469_v29  ;;  %v3175_v17 = vsub.f32 %v2581_v2, %v2878_v50  ;;  %v2589_v20 = vadd.f32 0.5, %v2292_v26  ;;  %v4863_v13 = vpop.eup %4862  ;;  %v2591_v1 = vadd.f32 0.5, %v2294_v43  ;;  %v3599_v56 = vadd.f32 %v3471_v57, %v6375_v48  ;;  %v6485_v21 = vld [vmem:[%s5619_s12 + $0x48] sm:$0xff] }
 0x1e7   : > { %v4865_v10 = vpop.eup %4864  ;;  %v3473_v31 = vmul.f32 %v3176_v9, %v3176_v9  ;;  %v2988_v45 = vsub.f32 %v2394_v25, %v2691_v23  ;;  %v2403_v2 = vadd.f32 0.5, %v2106_v4  ;;  %v1548_v22 = vmul.f32 0.5, %v6029_v36 }
 0x1e8   : > { %v3472_v27 = vmul.f32 %v3175_v17, %v3175_v17  ;;  %v3183_v49 = vsub.f32 %v2589_v20, %v2886_v24  ;;  %v773_v50 = vpop.f32.mrf.mxu2  ;;  %4508 = vmatmul.msk.f32.gmra.mxu0 %vm355_vm0, %v6394_v41  ;;  %4478 = vmatmul.msk.f32.gmra.mxu3 %vm355_vm0, %v6485_v21  ;;  %v1557_v48 = vmul.f32 0.5, %v6046_v40  ;;  %4870 = vtanh.f32 %v1718_v47  ;;  %v2887_v41 = vld [vmem:[%s5609_s20 + $0x640] sm:$0xff] }
 0x1e9   : > { %v4867_v6 = vpop.eup %4866  ;;  %v1708_v26 = vmul.f32 0.5, %v773_v50  ;;  %v3185_v24 = vsub.f32 %v2591_v1, %v2888_v53  ;;  %v2303_v36 = vmul.f32 0.5, %v4865_v10  ;;  %v2115_v40 = vmul.f32 0.5, %v4859_v63  ;;  %v2700_v1 = vld [vmem:[%s5609_s20 + $0x68] sm:$0xff] }
 0x1ea   : > { %v3632_v9 = vadd.f32 %v3599_v56, %v3472_v27  ;;  %v2293_v43 = vmul.f32 0.5, %v4867_v6  ;;  %v660_v54 = vpop.f32.mrf.mxu1  ;;  %v3480_v4 = vmul.f32 %v3183_v49, %v3183_v49  ;;  %v2124_v56 = vmul.f32 0.5, %v4861_v38  ;;  %v2895_v6 = vld [vmem:[%s5609_s20 + $0x680] sm:$0xff] }
 0x1eb   : > { %v4869_v57 = vpop.eup %4868  ;;  %4872 = vtanh.f32 %v1708_v26  ;;  %v1716_v25 = vmul.f32 0.5, %v660_v54  ;;  %v6493_v50 = vpop.f32.mrf.mxu3  ;;  %v2133_v27 = vmul.f32 0.5, %v4863_v13  ;;  %v6503_v53 = vmul.f32 %v3218_v7, %v3218_v7 }
 0x1ec   : > { %v6491_v23 = vadd.f32 %v3632_v9, %v3473_v31  ;;  %v2590_v17 = vadd.f32 0.5, %v2293_v43  ;;  %v2301_v20 = vmul.f32 0.5, %v4869_v57  ;;  %v1727_v31 = vmul.f32 0.5, %v895_v19  ;;  %v2897_v57 = vld [vmem:[%s5609_s20 + $0x690] sm:$0xff] }
 0x1ed   : > { %4874 = vtanh.f32 %v1716_v25  ;;  %4410 = vmatmul.msk.f32.gmra.mxu1 %vm355_vm0, %v6425_v12  ;;  %4443 = vmatmul.msk.f32.gmra.mxu2 %vm355_vm0, %v6425_v12  ;;  %v6500_v47 = vpop.f32.mrf.mxu0  ;;  %v3285_v63 = vmul.f32 %v2988_v45, %v2988_v45  ;;  %v2600_v38 = vadd.f32 0.5, %v2303_v36  ;;  %v3600_v26 = vadd.f32 %v3480_v4, %v6405_v42 }
 0x1ee   : > { %7384 = vst [vmem:[#allocation35_spill] sm:$0xff] %v6491_v23  ;;  %4876 = vtanh.f32 %v1548_v22  ;;  %v3184_v10 = vsub.f32 %v2590_v17, %v2887_v41  ;;  %v2598_v49 = vadd.f32 0.5, %v2301_v20  ;;  %v4871_v13 = vpop.eup %4870  ;;  %v3482_v54 = vmul.f32 %v3185_v24, %v3185_v24  ;;  %v2709_v20 = vld [vmem:[%s5609_s20 + $0xb0] sm:$0xff] }
 0x1ef   : > { %7385 = vst [vmem:[#allocation36_spill] sm:$0xff] %v6500_v47  ;;  %4878 = vtanh.f32 %v1557_v48  ;;  %v2997_v7 = vsub.f32 %v2403_v2, %v2700_v1  ;;  %v2412_v22 = vadd.f32 0.5, %v2115_v40  ;;  %v2421_v45 = vadd.f32 0.5, %v2124_v56  ;;  %v6510_v48 = vld [vmem:[%s5619_s12 + $0x50] sm:$0xff] }
 0x1f0   : > { %v3481_v9 = vmul.f32 %v3184_v10, %v3184_v10  ;;  %v3192_v43 = vsub.f32 %v2598_v49, %v2895_v6  ;;  %v776_v25 = vpop.f32.mrf.mxu2  ;;  %4509 = vmatmul.msk.f32.gmra.mxu0 %vm355_vm0, %v6425_v12  ;;  %4479 = vmatmul.msk.f32.gmra.mxu3 %vm355_vm0, %v6510_v48  ;;  %v2430_v42 = vadd.f32 0.5, %v2133_v27  ;;  %4880 = vtanh.f32 %v1727_v31  ;;  %v2896_v12 = vld [vmem:[%s5609_s20 + $0x688] sm:$0xff]  ;;  %v2718_v1 = vld [vmem:[%s5609_s20 + $0xf8] sm:$0xff]  ;;  %v2727_v10 = vld [vmem:[%s5609_s20 + $0x140] sm:$0xff] }
 0x1f1   : > { %v4873_v19 = vpop.eup %4872  ;;  %v1717_v41 = vmul.f32 0.5, %v776_v25  ;;  %v3194_v6 = vsub.f32 %v2600_v38, %v2897_v57  ;;  %v2312_v40 = vmul.f32 0.5, %v4871_v13  ;;  %v6521_v31 = vadd.f32 %v5988_v28, %v3285_v63  ;;  %v2904_v57 = vld [vmem:[%s5609_s20 + $0x6c8] sm:$0xff]  ;;  %v2906_v47 = vld [vmem:[%s5609_s20 + $0x6d8] sm:$0xff] }
 0x1f2   : > { %v3633_v24 = vadd.f32 %v3600_v26, %v3481_v9  ;;  %v2302_v36 = vmul.f32 0.5, %v4873_v19  ;;  %v663_v4 = vpop.f32.mrf.mxu1  ;;  %v3489_v49 = vmul.f32 %v3192_v43, %v3192_v43  ;;  %v6523_v19 = vmul.f32 %v2997_v7, %v2997_v7 }
 0x1f3   : > { %v4875_v17 = vpop.eup %4874  ;;  %4882 = vtanh.f32 %v1717_v41  ;;  %v1725_v2 = vmul.f32 0.5, %v663_v4  ;;  %v901_v26 = vpop.f32.mrf.mxu3  ;;  %v1566_v38 = vmul.f32 0.5, %v6064_v5  ;;  %v3006_v43 = vsub.f32 %v2412_v22, %v2709_v20 }
 0x1f4   : > { %v4877_v56 = vpop.eup %4876  ;;  %v6518_v25 = vadd.f32 %v3633_v24, %v3482_v54  ;;  %v2599_v23 = vadd.f32 0.5, %v2302_v36  ;;  %v2310_v27 = vmul.f32 0.5, %v4875_v17  ;;  %v1736_v28 = vmul.f32 0.5, %v6493_v50 }
 0x1f5   : > { %v4879_v9 = vpop.eup %4878  ;;  %4884 = vtanh.f32 %v1725_v2  ;;  %4411 = vmatmul.msk.f32.gmra.mxu1 %vm355_vm0, %v6452_v46  ;;  %4444 = vmatmul.msk.f32.gmra.mxu2 %vm355_vm0, %v6452_v46  ;;  %v6531_v13 = vpop.f32.mrf.mxu0  ;;  %v3015_v63 = vsub.f32 %v2421_v45, %v2718_v1  ;;  %v3024_v7 = vsub.f32 %v2430_v42, %v2727_v10  ;;  %v2142_v5 = vmul.f32 0.5, %v4877_v56  ;;  %v6540_v42 = vld [vmem:[%s5619_s12 + $0x58] sm:$0xff] }
 0x1f6   : > { %7386 = vst [vmem:[#allocation37_spill] sm:$0xff] %v6518_v25  ;;  %v3193_v54 = vsub.f32 %v2599_v23, %v2896_v12  ;;  %v2607_v41 = vadd.f32 0.5, %v2310_v27  ;;  %v2609_v24 = vadd.f32 0.5, %v2312_v40  ;;  %v4881_v36 = vpop.eup %4880  ;;  %v3601_v4 = vadd.f32 %v3489_v49, %v6462_v39 }
 0x1f7   : > { %v3491_v25 = vmul.f32 %v3194_v6, %v3194_v6  ;;  %v2151_v22 = vmul.f32 0.5, %v4879_v9  ;;  %4886 = vtanh.f32 %v1566_v38  ;;  %v1575_v50 = vmul.f32 0.5, %v6081_v60 }
 0x1f8   : > { %v3490_v17 = vmul.f32 %v3193_v54, %v3193_v54  ;;  %v3201_v2 = vsub.f32 %v2607_v41, %v2904_v57  ;;  %v779_v29 = vpop.f32.mrf.mxu2  ;;  %4510 = vmatmul.msk.f32.gmra.mxu0 %vm355_vm0, %v6452_v46  ;;  %4480 = vmatmul.msk.f32.gmra.mxu3 %vm355_vm0, %v6540_v42  ;;  %v1584_v39 = vmul.f32 0.5, %v6102_v14  ;;  %4888 = vtanh.f32 %v1736_v28  ;;  %v2905_v46 = vld [vmem:[%s5609_s20 + $0x6d0] sm:$0xff] }
 0x1f9   : > { %v4883_v23 = vpop.eup %4882  ;;  %v1726_v45 = vmul.f32 0.5, %v779_v29  ;;  %v3203_v56 = vsub.f32 %v2609_v24, %v2906_v47  ;;  %v2321_v60 = vmul.f32 0.5, %v4881_v36  ;;  %v2439_v14 = vadd.f32 0.5, %v2142_v5  ;;  %v2913_v54 = vld [vmem:[%s5609_s20 + $0x710] sm:$0xff] }
 0x1fa   : > { %v3634_v20 = vadd.f32 %v3601_v4, %v3490_v17  ;;  %v2311_v12 = vmul.f32 0.5, %v4883_v23  ;;  %v666_v6 = vpop.f32.mrf.mxu1  ;;  %v3498_v29 = vmul.f32 %v3201_v2, %v3201_v2  ;;  %v2448_v38 = vadd.f32 0.5, %v2151_v22 }
 0x1fb   : > { %v4885_v40 = vpop.eup %4884  ;;  %4890 = vtanh.f32 %v1726_v45  ;;  %v1734_v1 = vmul.f32 0.5, %v666_v6  ;;  %v6548_v9 = vpop.f32.mrf.mxu3  ;;  %v1593_v57 = vmul.f32 0.5, %v6122_v33  ;;  %v1745_v5 = vmul.f32 0.5, %v901_v26  ;;  %v2745_v33 = vld [vmem:[%s5609_s20 + $0x1d0] sm:$0xff] }
 0x1fc   : > { %v6546_v10 = vadd.f32 %v3634_v20, %v3491_v25  ;;  %v2608_v49 = vadd.f32 0.5, %v2311_v12  ;;  %v2319_v27 = vmul.f32 0.5, %v4885_v40  ;;  %v2736_v25 = vld [vmem:[%s5609_s20 + $0x188] sm:$0xff]  ;;  %v3303_v36 = vmul.f32 %v3006_v43, %v3006_v43  ;;  %v2915_v12 = vld [vmem:[%s5609_s20 + $0x720] sm:$0xff] }
 0x1fd   : > { %4892 = vtanh.f32 %v1734_v1  ;;  %4412 = vmatmul.msk.f32.gmra.mxu1 %vm355_vm0, %v6485_v21  ;;  %4445 = vmatmul.msk.f32.gmra.mxu2 %vm355_vm0, %v6485_v21  ;;  %v6556_v47 = vpop.f32.mrf.mxu0  ;;  %v4887_v24 = vpop.eup %4886  ;;  %v3312_v4 = vmul.f32 %v3015_v63, %v3015_v63  ;;  %v2618_v17 = vadd.f32 0.5, %v2321_v60  ;;  %v3602_v23 = vadd.f32 %v3498_v29, %v6475_v16  ;;  %v6565_v40 = vld [vmem:[%s5619_s12 + $0x60] sm:$0xff]  ;;  %v2914_v60 = vld [vmem:[%s5609_s20 + $0x718] sm:$0xff] }
 0x1fe   : > { %4894 = vtanh.f32 %v1575_v50  ;;  %v3202_v41 = vsub.f32 %v2608_v49, %v2905_v46  ;;  %v2616_v28 = vadd.f32 0.5, %v2319_v27  ;;  %v4889_v2 = vpop.eup %4888  ;;  %v3500_v20 = vmul.f32 %v3203_v56, %v3203_v56 }
 0x1ff   : > { %4896 = vtanh.f32 %v1584_v39  ;;  %v3321_v50 = vmul.f32 %v3024_v7, %v3024_v7  ;;  %v3033_v43 = vsub.f32 %v2439_v14, %v2736_v25  ;;  %v3042_v16 = vsub.f32 %v2448_v38, %v2745_v33  ;;  %v2922_v33 = vld [vmem:[%s5609_s20 + $0x758] sm:$0xff] }
 0x200   : > { %v3499_v22 = vmul.f32 %v3202_v41, %v3202_v41  ;;  %v3210_v45 = vsub.f32 %v2616_v28, %v2913_v54  ;;  %v782_v6 = vpop.f32.mrf.mxu2  ;;  %4511 = vmatmul.msk.f32.gmra.mxu0 %vm355_vm0, %v6485_v21  ;;  %4898 = vtanh.f32 %v1593_v57  ;;  %4481 = vmatmul.msk.f32.gmra.mxu3 %vm355_vm0, %v6565_v40  ;;  %v3212_v29 = vsub.f32 %v2618_v17, %v2915_v12 }
 0x201   : > { %v4891_v26 = vpop.eup %4890  ;;  %v1735_v63 = vmul.f32 0.5, %v782_v6  ;;  %4900 = vtanh.f32 %v1745_v5  ;;  %v2330_v7 = vmul.f32 0.5, %v4889_v2  ;;  %v6574_v38 = vadd.f32 %v6005_v52, %v6523_v19 }
 0x202   : > { %v3635_v39 = vadd.f32 %v3602_v23, %v3499_v22  ;;  %v2320_v46 = vmul.f32 0.5, %v4891_v26  ;;  %v669_v56 = vpop.f32.mrf.mxu1  ;;  %v3507_v27 = vmul.f32 %v3210_v45, %v3210_v45  ;;  %v6577_v28 = vadd.f32 %v6021_v0, %v3303_v36 }
 0x203   : > { %v4893_v1 = vpop.eup %4892  ;;  %4902 = vtanh.f32 %v1735_v63  ;;  %v1743_v21 = vmul.f32 0.5, %v669_v56  ;;  %v907_v25 = vpop.f32.mrf.mxu3  ;;  %v2160_v5 = vmul.f32 0.5, %v4887_v24  ;;  %v6587_v2 = vadd.f32 %v6039_v44, %v3312_v4  ;;  %v2924_v4 = vld [vmem:[%s5609_s20 + $0x768] sm:$0xff] }
 0x204   : > { %v4895_v49 = vpop.eup %4894  ;;  %v6570_v14 = vadd.f32 %v3635_v39, %v3500_v20  ;;  %v2617_v57 = vadd.f32 0.5, %v2320_v46  ;;  %v2328_v54 = vmul.f32 0.5, %v4893_v1  ;;  %v1754_v0 = vmul.f32 0.5, %v6548_v9  ;;  %v6601_v39 = vld [vmem:[%s5619_s12 + $0x68] sm:$0xff] }
 0x205   : > { %v4897_v41 = vpop.eup %4896  ;;  %4904 = vtanh.f32 %v1743_v21  ;;  %4413 = vmatmul.msk.f32.gmra.mxu1 %vm355_vm0, %v6510_v48  ;;  %4446 = vmatmul.msk.f32.gmra.mxu2 %vm355_vm0, %v6510_v48  ;;  %v6584_v17 = vpop.f32.mrf.mxu0  ;;  %v6591_v24 = vadd.f32 %v6056_v3, %v3321_v50  ;;  %v3330_v23 = vmul.f32 %v3033_v43, %v3033_v43  ;;  %v6593_v22 = vmul.f32 %v3042_v16, %v3042_v16 }
 0x206   : > { %v3211_v52 = vsub.f32 %v2617_v57, %v2914_v60  ;;  %v2625_v19 = vadd.f32 0.5, %v2328_v54  ;;  %v4899_v36 = vpop.eup %4898  ;;  %v2627_v45 = vadd.f32 0.5, %v2330_v7  ;;  %v3603_v12 = vadd.f32 %v3507_v27, %v6477_v55  ;;  %v2923_v60 = vld [vmem:[%s5609_s20 + $0x760] sm:$0xff]  ;;  %v2754_v7 = vld [vmem:[%s5609_s20 + $0x218] sm:$0xff] }
 0x207   : > { %v4901_v20 = vpop.eup %4900  ;;  %v3509_v44 = vmul.f32 %v3212_v29, %v3212_v29  ;;  %v2457_v3 = vadd.f32 0.5, %v2160_v5  ;;  %v2169_v50 = vmul.f32 0.5, %v4895_v49  ;;  %v1602_v43 = vmul.f32 0.5, %v6145_v30 }
 0x208   : > { %v3508_v6 = vmul.f32 %v3211_v52, %v3211_v52  ;;  %v3219_v26 = vsub.f32 %v2625_v19, %v2922_v33  ;;  %v785_v63 = vpop.f32.mrf.mxu2  ;;  %4512 = vmatmul.msk.f32.gmra.mxu0 %vm355_vm0, %v6510_v48  ;;  %4482 = vmatmul.msk.f32.gmra.mxu3 %vm355_vm0, %v6601_v39  ;;  %v1611_v55 = vmul.f32 0.5, %v6167_v51  ;;  %4906 = vtanh.f32 %v1754_v0  ;;  %v2931_v19 = vld [vmem:[%s5609_s20 + $0x7a0] sm:$0xff] }
 0x209   : > { %v4903_v9 = vpop.eup %4902  ;;  %v1744_v16 = vmul.f32 0.5, %v785_v63  ;;  %v3221_v29 = vsub.f32 %v2627_v45, %v2924_v4  ;;  %v2339_v30 = vmul.f32 0.5, %v4901_v20  ;;  %v2466_v51 = vadd.f32 0.5, %v2169_v50  ;;  %v2763_v45 = vld [vmem:[%s5609_s20 + $0x260] sm:$0xff] }
 0x20a   : > { %v3636_v46 = vadd.f32 %v3603_v12, %v3508_v6  ;;  %v2329_v56 = vmul.f32 0.5, %v4903_v9  ;;  %v672_v1 = vpop.f32.mrf.mxu1  ;;  %v3516_v49 = vmul.f32 %v3219_v26, %v3219_v26  ;;  %v2178_v33 = vmul.f32 0.5, %v4897_v41 }
 0x20b   : > { %v4905_v48 = vpop.eup %4904  ;;  %4908 = vtanh.f32 %v1744_v16  ;;  %v1752_v21 = vmul.f32 0.5, %v672_v1  ;;  %v6610_v5 = vpop.f32.mrf.mxu3  ;;  %v2187_v52 = vmul.f32 0.5, %v4899_v36  ;;  %v1763_v6 = vmul.f32 0.5, %v907_v25  ;;  %v2933_v16 = vld [vmem:[%s5609_s20 + $0x7b0] sm:$0xff] }
 0x20c   : > { %v6608_v27 = vadd.f32 %v3636_v46, %v3509_v44  ;;  %v2626_v57 = vadd.f32 0.5, %v2329_v56  ;;  %v2337_v54 = vmul.f32 0.5, %v4905_v48  ;;  %v6621_v26 = vadd.f32 %v6073_v8, %v3330_v23 }
 0x20d   : > { %4910 = vtanh.f32 %v1752_v21  ;;  %4414 = vmatmul.msk.f32.gmra.mxu1 %vm355_vm0, %v6540_v42  ;;  %4447 = vmatmul.msk.f32.gmra.mxu2 %vm355_vm0, %v6540_v42  ;;  %v6617_v0 = vpop.f32.mrf.mxu0  ;;  %v3051_v41 = vsub.f32 %v2457_v3, %v2754_v7  ;;  %v2636_v36 = vadd.f32 0.5, %v2339_v30  ;;  %v3604_v4 = vadd.f32 %v3516_v49, %v6503_v53  ;;  %v2772_v49 = vld [vmem:[%s5609_s20 + $0x2a8] sm:$0xff] }
 0x20e   : > { %4912 = vtanh.f32 %v1602_v43  ;;  %v3220_v20 = vsub.f32 %v2626_v57, %v2923_v60  ;;  %v2634_v12 = vadd.f32 0.5, %v2337_v54  ;;  %v4907_v44 = vpop.eup %4906  ;;  %v3518_v50 = vmul.f32 %v3221_v29, %v3221_v29  ;;  %v2781_v57 = vld [vmem:[%s5609_s20 + $0x2f0] sm:$0xff] }
 0x20f   : > { %4914 = vtanh.f32 %v1611_v55  ;;  %v3060_v43 = vsub.f32 %v2466_v51, %v2763_v45  ;;  %v2475_v8 = vadd.f32 0.5, %v2178_v33  ;;  %v2484_v23 = vadd.f32 0.5, %v2187_v52  ;;  %v6628_v55 = vld [vmem:[%s5619_s12 + $0x70] sm:$0xff] }
 0x210   : > { %v3517_v63 = vmul.f32 %v3220_v20, %v3220_v20  ;;  %v3228_v9 = vsub.f32 %v2634_v12, %v2931_v19  ;;  %v788_v46 = vpop.f32.mrf.mxu2  ;;  %4513 = vmatmul.msk.f32.gmra.mxu0 %vm355_vm0, %v6540_v42  ;;  %4483 = vmatmul.msk.f32.gmra.mxu3 %vm355_vm0, %v6628_v55  ;;  %v1620_v53 = vmul.f32 0.5, %v6192_v11  ;;  %4916 = vtanh.f32 %v1763_v6  ;;  %v2932_v42 = vld [vmem:[%s5609_s20 + $0x7a8] sm:$0xff] }
 0x211   : > { %v4909_v25 = vpop.eup %4908  ;;  %v1753_v3 = vmul.f32 0.5, %v788_v46  ;;  %v3230_v29 = vsub.f32 %v2636_v36, %v2933_v16  ;;  %v2348_v30 = vmul.f32 0.5, %v4907_v44  ;;  %v6640_v45 = vadd.f32 %v6094_v37, %v6593_v22  ;;  %v2940_v6 = vld [vmem:[%s5609_s20 + $0x7e8] sm:$0xff] }
 0x212   : > { %v3637_v56 = vadd.f32 %v3604_v4, %v3517_v63  ;;  %v2338_v1 = vmul.f32 0.5, %v4909_v25  ;;  %v675_v48 = vpop.f32.mrf.mxu1  ;;  %v3525_v54 = vmul.f32 %v3228_v9, %v3228_v9  ;;  %v3348_v20 = vmul.f32 %v3051_v41, %v3051_v41 }
 0x213   : > { %v4911_v60 = vpop.eup %4910  ;;  %4918 = vtanh.f32 %v1753_v3  ;;  %v1761_v21 = vmul.f32 0.5, %v675_v48  ;;  %v913_v11 = vpop.f32.mrf.mxu3  ;;  %v1629_v12 = vmul.f32 0.5, %v6219_v15  ;;  %v6650_v44 = vmul.f32 %v3060_v43, %v3060_v43  ;;  %v2942_v3 = vld [vmem:[%s5609_s20 + $0x7f8] sm:$0xff] }
 0x214   : > { %v4913_v7 = vpop.eup %4912  ;;  %v6636_v51 = vadd.f32 %v3637_v56, %v3518_v50  ;;  %v2635_v33 = vadd.f32 0.5, %v2338_v1  ;;  %v2346_v52 = vmul.f32 0.5, %v4911_v60  ;;  %v1772_v37 = vmul.f32 0.5, %v6610_v5 }
 0x215   : > { %v4915_v19 = vpop.eup %4914  ;;  %4920 = vtanh.f32 %v1761_v21  ;;  %4415 = vmatmul.msk.f32.gmra.mxu1 %vm355_vm0, %v6565_v40  ;;  %4448 = vmatmul.msk.f32.gmra.mxu2 %vm355_vm0, %v6565_v40  ;;  %v6648_v36 = vpop.f32.mrf.mxu0  ;;  %v3069_v22 = vsub.f32 %v2475_v8, %v2772_v49  ;;  %v3078_v41 = vsub.f32 %v2484_v23, %v2781_v57  ;;  %v2645_v15 = vadd.f32 0.5, %v2348_v30  ;;  %v6658_v23 = vld [vmem:[%s5619_s12 + $0x78] sm:$0xff] }
 0x216   : > { %v3229_v4 = vsub.f32 %v2635_v33, %v2932_v42  ;;  %v2643_v63 = vadd.f32 0.5, %v2346_v52  ;;  %4922 = vtanh.f32 %v1620_v53  ;;  %v4917_v9 = vpop.eup %4916  ;;  %v3605_v50 = vadd.f32 %v3525_v54, %v6243_v58  ;;  %v7387_v52 = vld [vmem:[#allocation20_spill] sm:$0xff] }
 0x217   : > { %v3527_v25 = vmul.f32 %v3230_v29, %v3230_v29  ;;  %v2196_v1 = vmul.f32 0.5, %v4913_v7  ;;  %v2205_v5 = vmul.f32 0.5, %v4915_v19  ;;  %4924 = vtanh.f32 %v1629_v12  ;;  %v2941_v29 = vld [vmem:[%s5609_s20 + $0x7f0] sm:$0xff] }
 0x218   : > { %v3526_v16 = vmul.f32 %v3229_v4, %v3229_v4  ;;  %v3237_v46 = vsub.f32 %v2643_v63, %v2940_v6  ;;  %v791_v56 = vpop.f32.mrf.mxu2  ;;  %4514 = vmatmul.msk.f32.gmra.mxu0 %vm355_vm0, %v6565_v40  ;;  %4484 = vmatmul.msk.f32.gmra.mxu3 %vm355_vm0, %v6658_v23  ;;  %v1638_v58 = vmul.f32 0.5, %v6250_v18  ;;  %4926 = vtanh.f32 %v1772_v37  ;;  %v2949_v6 = vld [vmem:[%s5609_s20 + $0x830] sm:$0xff]  ;;  %v2790_v37 = vld [vmem:[%s5609_s20 + $0x338] sm:$0xff] }
 0x219   : > { %v4919_v43 = vpop.eup %4918  ;;  %v1762_v8 = vmul.f32 0.5, %v791_v56  ;;  %v3239_v40 = vsub.f32 %v2645_v15, %v2942_v3  ;;  %v2357_v30 = vmul.f32 0.5, %v4917_v9  ;;  %v6669_v19 = vadd.f32 %v7387_v52, %v3348_v20  ;;  %v2799_v3 = vld [vmem:[%s5609_s20 + $0x380] sm:$0xff] }
 0x21a   : > { %v3638_v53 = vadd.f32 %v3605_v50, %v3526_v16  ;;  %v2347_v48 = vmul.f32 0.5, %v4919_v43  ;;  %v678_v60 = vpop.f32.mrf.mxu1  ;;  %v3534_v7 = vmul.f32 %v3237_v46, %v3237_v46  ;;  %v2493_v12 = vadd.f32 0.5, %v2196_v1  ;;  %v7388_v1 = vld [vmem:[#allocation27_spill] sm:$0xff] }
 0x21b   : > { %v4921_v42 = vpop.eup %4920  ;;  %4928 = vtanh.f32 %v1762_v8  ;;  %v1770_v21 = vmul.f32 0.5, %v678_v60  ;;  %v6666_v33 = vpop.f32.mrf.mxu3  ;;  %v1781_v63 = vmul.f32 0.5, %v913_v11  ;;  %v2502_v15 = vadd.f32 0.5, %v2205_v5  ;;  %v2951_v60 = vld [vmem:[%s5609_s20 + $0x840] sm:$0xff] }
 0x21c   : > { %v6664_v49 = vadd.f32 %v3638_v53, %v3527_v25  ;;  %v2644_v57 = vadd.f32 0.5, %v2347_v48  ;;  %v2355_v54 = vmul.f32 0.5, %v4921_v42  ;;  %v4923_v18 = vpop.eup %4922  ;;  %v1647_v9 = vmul.f32 0.5, %v6277_v32 }
 0x21d   : > { %4930 = vtanh.f32 %v1770_v21  ;;  %4416 = vmatmul.msk.f32.gmra.mxu1 %vm355_vm0, %v6601_v39  ;;  %4449 = vmatmul.msk.f32.gmra.mxu2 %vm355_vm0, %v6601_v39  ;;  %v6676_v4 = vpop.f32.mrf.mxu0  ;;  %v4925_v16 = vpop.eup %4924  ;;  %v3366_v46 = vmul.f32 %v3069_v22, %v3069_v22  ;;  %v3375_v25 = vmul.f32 %v3078_v41, %v3078_v41  ;;  %v2654_v56 = vadd.f32 0.5, %v2357_v30 }
 0x21e   : > { %v3238_v20 = vsub.f32 %v2644_v57, %v2941_v29  ;;  %v2652_v50 = vadd.f32 0.5, %v2355_v54  ;;  %4932 = vtanh.f32 %v1638_v58  ;;  %v4927_v43 = vpop.eup %4926  ;;  %v3606_v8 = vadd.f32 %v3534_v7, %v7388_v1  ;;  %v6686_v29 = vld [vmem:[%s5619_s12 + $0x80] sm:$0xff]  ;;  %v2950_v57 = vld [vmem:[%s5609_s20 + $0x838] sm:$0xff] }
 0x21f   : > { %v3536_v11 = vmul.f32 %v3239_v40, %v3239_v40  ;;  %v3087_v42 = vsub.f32 %v2493_v12, %v2790_v37  ;;  %v2214_v22 = vmul.f32 0.5, %v4923_v18  ;;  %4934 = vtanh.f32 %v1781_v63  ;;  %v2958_v1 = vld [vmem:[%s5609_s20 + $0x878] sm:$0xff] }
 0x220   : > { %v3535_v53 = vmul.f32 %v3238_v20, %v3238_v20  ;;  %v3246_v48 = vsub.f32 %v2652_v50, %v2949_v6  ;;  %v794_v5 = vpop.f32.mrf.mxu2  ;;  %4515 = vmatmul.msk.f32.gmra.mxu0 %vm355_vm0, %v6601_v39  ;;  %4485 = vmatmul.msk.f32.gmra.mxu3 %vm355_vm0, %v6686_v29  ;;  %v3096_v58 = vsub.f32 %v2502_v15, %v2799_v3  ;;  %4936 = vtanh.f32 %v1647_v9  ;;  %v7390_v9 = vld [vmem:[#allocation21_spill] sm:$0xff] }
 0x221   : > { %v4929_v32 = vpop.eup %4928  ;;  %v1771_v41 = vmul.f32 0.5, %v794_v5  ;;  %v3248_v54 = vsub.f32 %v2654_v56, %v2951_v60  ;;  %v2366_v52 = vmul.f32 0.5, %v4927_v43  ;;  %v6697_v20 = vadd.f32 %v7390_v9, %v6650_v44  ;;  %v7392_v43 = vld [vmem:[#allocation22_spill] sm:$0xff]  ;;  %v7393_v60 = vld [vmem:[#allocation23_spill] sm:$0xff] }
 0x222   : > { %v3639_v21 = vadd.f32 %v3606_v8, %v3535_v53  ;;  %v2356_v40 = vmul.f32 0.5, %v4929_v32  ;;  %v681_v30 = vpop.f32.mrf.mxu1  ;;  %v3543_v18 = vmul.f32 %v3246_v48, %v3246_v48  ;;  %v2511_v50 = vadd.f32 0.5, %v2214_v22  ;;  %v2808_v53 = vld [vmem:[%s5609_s20 + $0x3c8] sm:$0xff] }
 0x223   : > { %v4931_v7 = vpop.eup %4930  ;;  %4938 = vtanh.f32 %v1771_v41  ;;  %v1779_v39 = vmul.f32 0.5, %v681_v30  ;;  %v6693_v37 = vpop.f32.mrf.mxu3  ;;  %v2223_v3 = vmul.f32 0.5, %v4925_v16  ;;  %v6707_v8 = vadd.f32 %v7392_v43, %v3366_v46  ;;  %v2959_v43 = vld [vmem:[%s5609_s20 + $0x880] sm:$0xff] }
 0x224   : > { %v6691_v12 = vadd.f32 %v3639_v21, %v3536_v11  ;;  %v2653_v6 = vadd.f32 0.5, %v2356_v40  ;;  %v2364_v63 = vmul.f32 0.5, %v4931_v7  ;;  %v4933_v15 = vpop.eup %4932  ;;  %v1790_v11 = vmul.f32 0.5, %v6666_v33 }
 0x225   : > { %4940 = vtanh.f32 %v1779_v39  ;;  %4417 = vmatmul.msk.f32.gmra.mxu1 %vm355_vm0, %v6628_v55  ;;  %4450 = vmatmul.msk.f32.gmra.mxu2 %vm355_vm0, %v6628_v55  ;;  %v6704_v56 = vpop.f32.mrf.mxu0  ;;  %v4935_v16 = vpop.eup %4934  ;;  %v6712_v5 = vadd.f32 %v7393_v60, %v3375_v25  ;;  %v3384_v32 = vmul.f32 %v3087_v42, %v3087_v42  ;;  %v6714_v22 = vmul.f32 %v3096_v58, %v3096_v58  ;;  %v2960_v39 = vld [vmem:[%s5609_s20 + $0x888] sm:$0xff] }
 0x226   : > { %7389 = vst [vmem:[#allocation20_spill] sm:$0xff] %v6691_v12  ;;  %v3247_v48 = vsub.f32 %v2653_v6, %v2950_v57  ;;  %v2661_v44 = vadd.f32 0.5, %v2364_v63  ;;  %v2663_v41 = vadd.f32 0.5, %v2366_v52  ;;  %v4937_v21 = vpop.eup %4936  ;;  %v3607_v40 = vadd.f32 %v3543_v18, %v6349_v61  ;;  %v6721_v63 = vld [vmem:[%s5619_s12 + $0x88] sm:$0xff] }
 0x227   : > { %7391 = vst [vmem:[#allocation27_spill] sm:$0xff] %v6704_v56  ;;  %v3545_v7 = vmul.f32 %v3248_v54, %v3248_v54  ;;  %v3105_v25 = vsub.f32 %v2511_v50, %v2808_v53  ;;  %v2520_v6 = vadd.f32 0.5, %v2223_v3  ;;  %v2232_v42 = vmul.f32 0.5, %v4933_v15  ;;  %v2817_v3 = vld [vmem:[%s5609_s20 + $0x410] sm:$0xff] }
 0x228   : > { %v3544_v30 = vmul.f32 %v3247_v48, %v3247_v48  ;;  %v3255_v46 = vsub.f32 %v2661_v44, %v2958_v1  ;;  %v797_v57 = vpop.f32.mrf.mxu2  ;;  %4516 = vmatmul.msk.f32.gmra.mxu0 %vm355_vm0, %v6628_v55  ;;  %4486 = vmatmul.msk.f32.gmra.mxu3 %vm355_vm0, %v6721_v63  ;;  %v2375_v18 = vmul.f32 0.5, %v4935_v16  ;;  %4942 = vtanh.f32 %v1790_v11  ;;  %v7394_v1 = vld [vmem:[#allocation29_spill] sm:$0xff]  ;;  %v7396_v16 = vld [vmem:[#allocation31_spill] sm:$0xff] }
 0x229   : > { %v4939_v33 = vpop.eup %4938  ;;  %v1780_v58 = vmul.f32 0.5, %v797_v57  ;;  %v1656_v55 = vmul.f32 0.5, %v7394_v1  ;;  %v3257_v50 = vsub.f32 %v2663_v41, %v2960_v39  ;;  %v2241_v57 = vmul.f32 0.5, %v4937_v21  ;;  %v7398_v21 = vld [vmem:[#allocation24_spill] sm:$0xff] }
 0x22a   : > { %v3640_v61 = vadd.f32 %v3607_v40, %v3544_v30  ;;  %v2365_v52 = vmul.f32 0.5, %v4939_v33  ;;  %v684_v54 = vpop.f32.mrf.mxu1  ;;  %v3552_v53 = vmul.f32 %v3255_v46, %v3255_v46  ;;  %v2529_v30 = vadd.f32 0.5, %v2232_v42  ;;  %v2967_v33 = vld [vmem:[%s5609_s20 + $0x8c0] sm:$0xff]  ;;  %v2826_v46 = vld [vmem:[%s5609_s20 + $0x458] sm:$0xff] }
 0x22b   : > { %v4941_v9 = vpop.eup %4940  ;;  %4944 = vtanh.f32 %v1780_v58  ;;  %v1788_v15 = vmul.f32 0.5, %v684_v54  ;;  %v1287_v40 = vpop.f32.mrf.mxu3  ;;  %v1665_v11 = vmul.f32 0.5, %v7396_v16  ;;  %v2672_v58 = vadd.f32 0.5, %v2375_v18 }
 0x22c   : > { %v6728_v48 = vadd.f32 %v3640_v61, %v3545_v7  ;;  %v2662_v44 = vadd.f32 0.5, %v2365_v52  ;;  %v2373_v60 = vmul.f32 0.5, %v4941_v9  ;;  %v1506_v42 = vmul.f32 0.5, %v6693_v37  ;;  %v2969_v9 = vld [vmem:[%s5609_s20 + $0x8d0] sm:$0xff] }
 0x22d   : > { %4946 = vtanh.f32 %v1788_v15  ;;  %4418 = vmatmul.msk.f32.gmra.mxu1 %vm355_vm0, %v6658_v23  ;;  %4451 = vmatmul.msk.f32.gmra.mxu2 %vm355_vm0, %v6658_v23  ;;  %v6736_v41 = vpop.f32.mrf.mxu0  ;;  %v6741_v61 = vadd.f32 %v7398_v21, %v3384_v32  ;;  %v3402_v52 = vmul.f32 %v3105_v25, %v3105_v25  ;;  %v3114_v54 = vsub.f32 %v2520_v6, %v2817_v3  ;;  %v6748_v6 = vld [vmem:[%s5619_s12 + $0x90] sm:$0xff] }
 0x22e   : > { %7395 = vst [vmem:[#allocation21_spill] sm:$0xff] %v6728_v48  ;;  %v3256_v7 = vsub.f32 %v2662_v44, %v2959_v43  ;;  %v2670_v39 = vadd.f32 0.5, %v2373_v60  ;;  %4948 = vtanh.f32 %v1656_v55  ;;  %v4943_v1 = vpop.eup %4942  ;;  %v3608_v15 = vadd.f32 %v3552_v53, %v6377_v34  ;;  %v2835_v55 = vld [vmem:[%s5609_s20 + $0x4a0] sm:$0xff]  ;;  %v2968_v60 = vld [vmem:[%s5609_s20 + $0x8c8] sm:$0xff] }
 0x22f   : > { %7397 = vst [vmem:[#allocation22_spill] sm:$0xff] %v6736_v41  ;;  %v3554_v48 = vmul.f32 %v3257_v50, %v3257_v50  ;;  %v3123_v32 = vsub.f32 %v2529_v30, %v2826_v46  ;;  %v2538_v18 = vadd.f32 0.5, %v2241_v57  ;;  %4950 = vtanh.f32 %v1665_v11 }
 0x230   : > { %v3553_v16 = vmul.f32 %v3256_v7, %v3256_v7  ;;  %v3264_v41 = vsub.f32 %v2670_v39, %v2967_v33  ;;  %v800_v43 = vpop.f32.mrf.mxu2  ;;  %4517 = vmatmul.msk.f32.gmra.mxu0 %vm355_vm0, %v6658_v23  ;;  %4487 = vmatmul.msk.f32.gmra.mxu3 %vm355_vm0, %v6748_v6  ;;  %v3266_v53 = vsub.f32 %v2672_v58, %v2969_v9  ;;  %4952 = vtanh.f32 %v1506_v42  ;;  %v2976_v9 = vld [vmem:[%s5609_s20 + $0x908] sm:$0xff] }
 0x231   : > { %v4945_v37 = vpop.eup %4944  ;;  %v1789_v25 = vmul.f32 0.5, %v800_v43  ;;  %v2384_v23 = vmul.f32 0.5, %v4943_v1  ;;  %v1515_v57 = vmul.f32 0.5, %v1287_v40  ;;  %v3411_v58 = vmul.f32 %v3114_v54, %v3114_v54  ;;  %v7401_v40 = vld [vmem:[#allocation26_spill] sm:$0xff] }
 0x232   : > { %v3641_v34 = vadd.f32 %v3608_v15, %v3553_v16  ;;  %v2374_v3 = vmul.f32 0.5, %v4945_v37  ;;  %v1052_v50 = vpop.f32.mrf.mxu1  ;;  %v3561_v11 = vmul.f32 %v3264_v41, %v3264_v41  ;;  %v7400_v15 = vld [vmem:[#allocation25_spill] sm:$0xff]  ;;  %v3132_v42 = vsub.f32 %v2538_v18, %v2835_v55 }
 0x233   : > { %v4947_v44 = vpop.eup %4946  ;;  %4954 = vtanh.f32 %v1789_v25  ;;  %v1504_v30 = vmul.f32 0.5, %v1052_v50  ;;  %v1290_v39 = vpop.f32.mrf.mxu3  ;;  %v6758_v16 = vadd.f32 %v7400_v15, %v6714_v22  ;;  %v6766_v41 = vadd.f32 %v7401_v40, %v3402_v52  ;;  %v2977_v40 = vld [vmem:[%s5609_s20 + $0x910] sm:$0xff] }
 0x234   : > { %v6754_v33 = vadd.f32 %v3641_v34, %v3554_v48  ;;  %v2671_v46 = vadd.f32 0.5, %v2374_v3  ;;  %v2382_v7 = vmul.f32 0.5, %v4947_v44  ;;  %v4949_v21 = vpop.eup %4948  ;;  %v3420_v25 = vmul.f32 %v3123_v32, %v3123_v32  ;;  %v2978_v44 = vld [vmem:[%s5609_s20 + $0x918] sm:$0xff] }
 0x235   : > { %4956 = vtanh.f32 %v1504_v30  ;;  %4419 = vmatmul.msk.f32.gmra.mxu1 %vm355_vm0, %v6686_v29  ;;  %4452 = vmatmul.msk.f32.gmra.mxu2 %vm355_vm0, %v6686_v29  ;;  %v1400_v48 = vpop.f32.mrf.mxu0  ;;  %v4951_v22 = vpop.eup %4950  ;;  %v3563_v54 = vmul.f32 %v3266_v53, %v3266_v53  ;;  %v2681_v18 = vadd.f32 0.5, %v2384_v23  ;;  %v3609_v34 = vadd.f32 %v3561_v11, %v6407_v62  ;;  %v7403_v11 = vld [vmem:[#allocation32_spill] sm:$0xff] }
 0x236   : > { %7399 = vst [vmem:[#allocation23_spill] sm:$0xff] %v6754_v33  ;;  %v3265_v1 = vsub.f32 %v2671_v46, %v2968_v60  ;;  %v2679_v43 = vadd.f32 0.5, %v2382_v7  ;;  %v1507_v37 = vmul.f32 0.5, %v1400_v48  ;;  %4958 = vtanh.f32 %v1515_v57  ;;  %v4953_v55 = vpop.eup %4952  ;;  %v7402_v60 = vld [vmem:[#allocation28_spill] sm:$0xff] }
 0x237   : > { %v6773_v46 = vadd.f32 %v7402_v60, %v3411_v58  ;;  %v6775_v32 = vmul.f32 %v3132_v42, %v3132_v42  ;;  %v2250_v53 = vmul.f32 0.5, %v4949_v21  ;;  %v6778_v57 = vld [vmem:[%s5619_s12 + $0x98] sm:$0xff]  ;;  %v2259_v62 = vmul.f32 0.5, %v4951_v22 }
 0x238   : > { %v3562_v3 = vmul.f32 %v3265_v1, %v3265_v1  ;;  %v3273_v50 = vsub.f32 %v2679_v43, %v2976_v9  ;;  %v1168_v30 = vpop.f32.mrf.mxu2  ;;  %4960 = vtanh.f32 %v1507_v37  ;;  %4518 = vmatmul.msk.f32.gmra.mxu0 %vm355_vm0, %v6686_v29  ;;  %4488 = vmatmul.msk.f32.gmra.mxu3 %vm355_vm0, %v6778_v57  ;;  %v1674_v7 = vmul.f32 0.5, %v7403_v11  ;;  %v7405_v11 = vld [vmem:[#allocation30_spill] sm:$0xff]  ;;  %v2694_v33 = vld [vmem:[%s5609_s20 + $0x38] sm:$0xff] }
 0x239   : > { %v4955_v52 = vpop.eup %4954  ;;  %v1505_v23 = vmul.f32 0.5, %v1168_v30  ;;  %v3275_v58 = vsub.f32 %v2681_v18, %v2978_v44  ;;  %v2100_v1 = vmul.f32 0.5, %v4953_v55  ;;  %v2556_v44 = vadd.f32 0.5, %v2259_v62 }
 0x23a   : > { %v3642_v15 = vadd.f32 %v3609_v34, %v3562_v3  ;;  %v2383_v9 = vmul.f32 0.5, %v4955_v52  ;;  %v1055_v29 = vpop.f32.mrf.mxu1  ;;  %v3570_v21 = vmul.f32 %v3273_v50, %v3273_v50  ;;  %v6787_v34 = vadd.f32 %v7405_v11, %v3420_v25  ;;  %v2692_v52 = vld [vmem:[%s5609_s20 + $0x28] sm:$0xff]  ;;  %v2853_v25 = vld [vmem:[%s5609_s20 + $0x530] sm:$0xff] }
 0x23b   : > { %v4957_v48 = vpop.eup %4956  ;;  %4962 = vtanh.f32 %v1505_v23  ;;  %v1513_v42 = vmul.f32 0.5, %v1055_v29  ;;  %v1293_v60 = vpop.f32.mrf.mxu3  ;;  %v2547_v3 = vadd.f32 0.5, %v2250_v53  ;;  %v2844_v50 = vld [vmem:[%s5609_s20 + $0x4e8] sm:$0xff]  ;;  %v3572_v53 = vmul.f32 %v3275_v58, %v3275_v58 }
 0x23c   : > { %v6784_v43 = vadd.f32 %v3642_v15, %v3563_v54  ;;  %v2680_v37 = vadd.f32 0.5, %v2383_v9  ;;  %v2098_v30 = vmul.f32 0.5, %v4957_v48  ;;  %v4959_v22 = vpop.eup %4958  ;;  %v1524_v54 = vmul.f32 0.5, %v1290_v39  ;;  %v6801_v58 = vld [vmem:[%s5619_s12 + $0xa0] sm:$0xff] }
 0x23d   : > { %4964 = vtanh.f32 %v1513_v42  ;;  %4420 = vmatmul.msk.f32.gmra.mxu1 %vm355_vm0, %v6721_v63  ;;  %4453 = vmatmul.msk.f32.gmra.mxu2 %vm355_vm0, %v6721_v63  ;;  %v1403_v18 = vpop.f32.mrf.mxu0  ;;  %v2397_v29 = vadd.f32 0.5, %v2100_v1  ;;  %v3610_v42 = vadd.f32 %v3570_v21, %v6471_v35  ;;  %v3141_v62 = vsub.f32 %v2547_v3, %v2844_v50 }
 0x23e   : > { %7404 = vst [vmem:[#allocation29_spill] sm:$0xff] %v6784_v43  ;;  %v4961_v55 = vpop.eup %4960  ;;  %v3274_v23 = vsub.f32 %v2680_v37, %v2977_v40  ;;  %v2395_v15 = vadd.f32 0.5, %v2098_v30  ;;  %v1516_v9 = vmul.f32 0.5, %v1403_v18  ;;  %4966 = vtanh.f32 %v1674_v7  ;;  %v2693_v18 = vld [vmem:[%s5609_s20 + $0x30] sm:$0xff] }
 0x23f   : > { %v2101_v48 = vmul.f32 0.5, %v4961_v55  ;;  %v2109_v7 = vmul.f32 0.5, %v4959_v22  ;;  %v3150_v35 = vsub.f32 %v2556_v44, %v2853_v25  ;;  %v2695_v55 = vld [vmem:[%s5609_s20 + $0x40] sm:$0xff] }
 0x240   : > { %v3571_v11 = vmul.f32 %v3274_v23, %v3274_v23  ;;  %v2989_v43 = vsub.f32 %v2395_v15, %v2692_v52  ;;  %v1171_v12 = vpop.f32.mrf.mxu2  ;;  %4968 = vtanh.f32 %v1516_v9  ;;  %4519 = vmatmul.msk.f32.gmra.mxu0 %vm355_vm0, %v6721_v63  ;;  %4489 = vmatmul.msk.f32.gmra.mxu3 %vm355_vm0, %v6801_v58  ;;  %v2991_v63 = vsub.f32 %v2397_v29, %v2694_v33  ;;  %v7407_v9 = vld [vmem:[#allocation14_spill] sm:$0xff] }
 0x241   : > { %v4963_v39 = vpop.eup %4962  ;;  %v1514_v40 = vmul.f32 0.5, %v1171_v12  ;;  %4970 = vtanh.f32 %v1524_v54  ;;  %v2398_v37 = vadd.f32 0.5, %v2101_v48  ;;  %v1533_v12 = vmul.f32 0.5, %v1293_v60 }
 0x242   : > { %v3643_v1 = vadd.f32 %v3610_v42, %v3571_v11  ;;  %v2099_v21 = vmul.f32 0.5, %v4963_v39  ;;  %v1058_v30 = vpop.f32.mrf.mxu1  ;;  %v3286_v54 = vmul.f32 %v2989_v43, %v2989_v43  ;;  %v6811_v25 = vadd.f32 %v7407_v9, %v6775_v32  ;;  %v2701_v42 = vld [vmem:[%s5609_s20 + $0x70] sm:$0xff]  ;;  %v2703_v39 = vld [vmem:[%s5609_s20 + $0x80] sm:$0xff] }
 0x243   : > { %v4965_v52 = vpop.eup %4964  ;;  %4972 = vtanh.f32 %v1514_v40  ;;  %v1522_v3 = vmul.f32 0.5, %v1058_v30  ;;  %v1296_v15 = vpop.f32.mrf.mxu3  ;;  %v6813_v48 = vmul.f32 %v3141_v62, %v3141_v62  ;;  %v2406_v33 = vadd.f32 0.5, %v2109_v7 }
 0x244   : > { %v6807_v22 = vadd.f32 %v3643_v1, %v3572_v53  ;;  %v2396_v50 = vadd.f32 0.5, %v2099_v21  ;;  %v2107_v23 = vmul.f32 0.5, %v4965_v52  ;;  %v4967_v44 = vpop.eup %4966  ;;  %v2992_v11 = vsub.f32 %v2398_v37, %v2695_v55 }
 0x245   : > { %4974 = vtanh.f32 %v1522_v3  ;;  %4421 = vmatmul.msk.f32.gmra.mxu1 %vm355_vm0, %v6748_v6  ;;  %4454 = vmatmul.msk.f32.gmra.mxu2 %vm355_vm0, %v6748_v6  ;;  %v1406_v43 = vpop.f32.mrf.mxu0  ;;  %v6821_v62 = vmul.f32 %v3150_v35, %v3150_v35  ;;  %v3288_v1 = vmul.f32 %v2991_v63, %v2991_v63  ;;  %v3710_v7 = vadd.f32 %v6521_v31, %v3286_v54  ;;  %v2704_v54 = vld [vmem:[%s5609_s20 + $0x88] sm:$0xff] }
 0x246   : > { %7406 = vst [vmem:[#allocation31_spill] sm:$0xff] %v6807_v22  ;;  %v4969_v60 = vpop.eup %4968  ;;  %v2990_v53 = vsub.f32 %v2396_v50, %v2693_v18  ;;  %v2404_v29 = vadd.f32 0.5, %v2107_v23  ;;  %v1525_v40 = vmul.f32 0.5, %v1406_v43  ;;  %4976 = vtanh.f32 %v1533_v12  ;;  %v6827_v23 = vld [vmem:[%s5619_s12 + $0xa8] sm:$0xff] }
 0x247   : > { %v4971_v32 = vpop.eup %4970  ;;  %v2110_v21 = vmul.f32 0.5, %v4969_v60  ;;  %v2268_v18 = vmul.f32 0.5, %v4967_v44  ;;  %v3000_v55 = vsub.f32 %v2406_v33, %v2703_v39  ;;  %v3289_v63 = vmul.f32 %v2992_v11, %v2992_v11  ;;  %v2702_v60 = vld [vmem:[%s5609_s20 + $0x78] sm:$0xff] }
 0x248   : > { %v3287_v30 = vmul.f32 %v2990_v53, %v2990_v53  ;;  %v2998_v52 = vsub.f32 %v2404_v29, %v2701_v42  ;;  %v1174_v3 = vpop.f32.mrf.mxu2  ;;  %4978 = vtanh.f32 %v1525_v40  ;;  %4520 = vmatmul.msk.f32.gmra.mxu0 %vm355_vm0, %v6748_v6  ;;  %4490 = vmatmul.msk.f32.gmra.mxu3 %vm355_vm0, %v6827_v23  ;;  %v2118_v42 = vmul.f32 0.5, %v4971_v32  ;;  %v7408_v53 = vld [vmem:[#allocation16_spill] sm:$0xff] }
 0x249   : > { %v4973_v37 = vpop.eup %4972  ;;  %v2407_v50 = vadd.f32 0.5, %v2110_v21  ;;  %v1523_v35 = vmul.f32 0.5, %v1174_v3  ;;  %v1542_v33 = vmul.f32 0.5, %v1296_v15  ;;  %v1683_v29 = vmul.f32 0.5, %v7408_v53 }
 0x24a   : > { %v3743_v31 = vadd.f32 %v3710_v7, %v3287_v30  ;;  %v2108_v12 = vmul.f32 0.5, %v4973_v37  ;;  %v1061_v9 = vpop.f32.mrf.mxu1  ;;  %v3295_v6 = vmul.f32 %v2998_v52, %v2998_v52  ;;  %v2565_v11 = vadd.f32 0.5, %v2268_v18  ;;  %v3842_v30 = vld [vmem:[#allocation2 + $0xb0] sm:$0xff] }
 0x24b   : > { %v4975_v43 = vpop.eup %4974  ;;  %4980 = vtanh.f32 %v1523_v35  ;;  %v1531_v44 = vmul.f32 0.5, %v1061_v9  ;;  %v1299_v3 = vpop.f32.mrf.mxu3  ;;  %v2710_v37 = vld [vmem:[%s5609_s20 + $0xb8] sm:$0xff]  ;;  %v3297_v22 = vmul.f32 %v3000_v55, %v3000_v55  ;;  %v3001_v56 = vsub.f32 %v2407_v50, %v2704_v54 }
 0x24c   : > { %v3776_v39 = vadd.f32 %v3743_v31, %v3288_v1  ;;  %v2405_v40 = vadd.f32 0.5, %v2108_v12  ;;  %v2116_v21 = vmul.f32 0.5, %v4975_v43  ;;  %v4977_v7 = vpop.eup %4976  ;;  %v2862_v12 = vld [vmem:[%s5609_s20 + $0x578] sm:$0xff]  ;;  %v3711_v18 = vadd.f32 %v6574_v38, %v3295_v6 }
 0x24d   : > { %4982 = vtanh.f32 %v1531_v44  ;;  %4422 = vmatmul.msk.f32.gmra.mxu1 %vm355_vm0, %v6778_v57  ;;  %4455 = vmatmul.msk.f32.gmra.mxu2 %vm355_vm0, %v6778_v57  ;;  %v1409_v15 = vpop.f32.mrf.mxu0  ;;  %v2415_v55 = vadd.f32 0.5, %v2118_v42  ;;  %v2712_v44 = vld [vmem:[%s5609_s20 + $0xc8] sm:$0xff]  ;;  %v2127_v6 = vmul.f32 0.5, %v4977_v7 }
 0x24e   : > { %v4979_v32 = vpop.eup %4978  ;;  %v3809_v1 = vadd.f32 %v3776_v39, %v3289_v63  ;;  %v2999_v52 = vsub.f32 %v2405_v40, %v2702_v60  ;;  %v2413_v35 = vadd.f32 0.5, %v2116_v21  ;;  %v1534_v31 = vmul.f32 0.5, %v1409_v15  ;;  %v7409_v60 = vld [vmem:[#allocation15_spill] sm:$0xff] }
 0x24f   : > { %v2119_v50 = vmul.f32 0.5, %v4979_v32  ;;  %4984 = vtanh.f32 %v1542_v33  ;;  %v6846_v39 = vadd.f32 %v7409_v60, %v6813_v48  ;;  %v6849_v33 = vld [vmem:[%s5619_s12 + $0xb0] sm:$0xff]  ;;  %v3159_v40 = vsub.f32 %v2565_v11, %v2862_v12  ;;  %v2711_v48 = vld [vmem:[%s5609_s20 + $0xc0] sm:$0xff] }
 0x250   : > { %v3875_v54 = vadd.f32 %v3842_v30, %v3809_v1  ;;  %v3296_v9 = vmul.f32 %v2999_v52, %v2999_v52  ;;  %v3007_v43 = vsub.f32 %v2413_v35, %v2710_v37  ;;  %v1177_v53 = vpop.f32.mrf.mxu2  ;;  %4986 = vtanh.f32 %v1534_v31  ;;  %4521 = vmatmul.msk.f32.gmra.mxu0 %vm355_vm0, %v6778_v57  ;;  %4491 = vmatmul.msk.f32.gmra.mxu3 %vm355_vm0, %v6849_v33  ;;  %v2713_v57 = vld [vmem:[%s5609_s20 + $0xd0] sm:$0xff]  ;;  %v3843_v11 = vld [vmem:[#allocation2] sm:$0xff] }
 0x251   : > { %v4981_v63 = vpop.eup %4980  ;;  %v2416_v38 = vadd.f32 0.5, %v2119_v50  ;;  %v1532_v42 = vmul.f32 0.5, %v1177_v53  ;;  %v3298_v30 = vmul.f32 %v3001_v56, %v3001_v56  ;;  %v3009_v52 = vsub.f32 %v2415_v55, %v2712_v44  ;;  %v2719_v12 = vld [vmem:[%s5609_s20 + $0x100] sm:$0xff] }
 0x252   : > { %3908 = vst [vmem:[#allocation2 + $0xb0] sm:$0xff] %v3875_v54  ;;  %v3744_v21 = vadd.f32 %v3711_v18, %v3296_v9  ;;  %v2117_v37 = vmul.f32 0.5, %v4981_v63  ;;  %v1064_v15 = vpop.f32.mrf.mxu1  ;;  %v3304_v1 = vmul.f32 %v3007_v43, %v3007_v43  ;;  %v2424_v18 = vadd.f32 0.5, %v2127_v6  ;;  %v2721_v6 = vld [vmem:[%s5609_s20 + $0x110] sm:$0xff] }
 0x253   : > { %v4983_v32 = vpop.eup %4982  ;;  %4988 = vtanh.f32 %v1532_v42  ;;  %v1540_v35 = vmul.f32 0.5, %v1064_v15  ;;  %v1302_v53 = vpop.f32.mrf.mxu3  ;;  %v3010_v56 = vsub.f32 %v2416_v38, %v2713_v57  ;;  %v1551_v54 = vmul.f32 0.5, %v1299_v3 }
 0x254   : > { %4990 = vtanh.f32 %v1683_v29  ;;  %v3777_v7 = vadd.f32 %v3744_v21, %v3297_v22  ;;  %v2414_v31 = vadd.f32 0.5, %v2117_v37  ;;  %v2125_v50 = vmul.f32 0.5, %v4983_v32 }
 0x255   : > { %v4985_v60 = vpop.eup %4984  ;;  %4992 = vtanh.f32 %v1540_v35  ;;  %4423 = vmatmul.msk.f32.gmra.mxu1 %vm355_vm0, %v6801_v58  ;;  %4456 = vmatmul.msk.f32.gmra.mxu2 %vm355_vm0, %v6801_v58  ;;  %v1412_v55 = vpop.f32.mrf.mxu0  ;;  %v6860_v63 = vmul.f32 %v3159_v40, %v3159_v40  ;;  %v3712_v38 = vadd.f32 %v6577_v28, %v3304_v1  ;;  %v3306_v42 = vmul.f32 %v3009_v52, %v3009_v52  ;;  %v6867_v35 = vld [vmem:[%s5619_s12 + $0xb8] sm:$0xff] }
 0x256   : > { %v4987_v29 = vpop.eup %4986  ;;  %v3810_v22 = vadd.f32 %v3777_v7, %v3298_v30  ;;  %v3008_v9 = vsub.f32 %v2414_v31, %v2711_v48  ;;  %v2422_v43 = vadd.f32 0.5, %v2125_v50  ;;  %v1543_v44 = vmul.f32 0.5, %v1412_v55  ;;  %v2722_v50 = vld [vmem:[%s5609_s20 + $0x118] sm:$0xff]  ;;  %v2720_v55 = vld [vmem:[%s5609_s20 + $0x108] sm:$0xff] }
 0x257   : > { %v2128_v21 = vmul.f32 0.5, %v4987_v29  ;;  %v2136_v48 = vmul.f32 0.5, %v4985_v60  ;;  %v3307_v52 = vmul.f32 %v3010_v56, %v3010_v56  ;;  %v3018_v31 = vsub.f32 %v2424_v18, %v2721_v6  ;;  %v7410_v29 = vld [vmem:[#allocation18_spill] sm:$0xff]  ;;  %v3844_v56 = vld [vmem:[#allocation2 + $0xd8] sm:$0xff] }
 0x258   : > { %v3876_v37 = vadd.f32 %v3843_v11, %v3810_v22  ;;  %v3305_v57 = vmul.f32 %v3008_v9, %v3008_v9  ;;  %v3016_v15 = vsub.f32 %v2422_v43, %v2719_v12  ;;  %v1180_v32 = vpop.f32.mrf.mxu2  ;;  %4994 = vtanh.f32 %v1543_v44  ;;  %4522 = vmatmul.msk.f32.gmra.mxu0 %vm355_vm0, %v6801_v58  ;;  %4492 = vmatmul.msk.f32.gmra.mxu3 %vm355_vm0, %v6867_v35 }
 0x259   : > { %v4989_v3 = vpop.eup %4988  ;;  %v2425_v30 = vadd.f32 0.5, %v2128_v21  ;;  %v1541_v40 = vmul.f32 0.5, %v1180_v32  ;;  %4996 = vtanh.f32 %v1551_v54  ;;  %v1560_v54 = vmul.f32 0.5, %v1302_v53 }
 0x25a   : > { %v4991_v28 = vpop.eup %4990  ;;  %3909 = vst [vmem:[#allocation2] sm:$0xff] %v3876_v37  ;;  %v3745_v1 = vadd.f32 %v3712_v38, %v3305_v57  ;;  %v2126_v7 = vmul.f32 0.5, %v4989_v3  ;;  %v1067_v58 = vpop.f32.mrf.mxu1  ;;  %v3313_v12 = vmul.f32 %v3016_v15, %v3016_v15  ;;  %v1692_v22 = vmul.f32 0.5, %v7410_v29  ;;  %v2728_v37 = vld [vmem:[%s5609_s20 + $0x148] sm:$0xff]  ;;  %v2730_v3 = vld [vmem:[%s5609_s20 + $0x158] sm:$0xff] }
 0x25b   : > { %v4993_v11 = vpop.eup %4992  ;;  %4998 = vtanh.f32 %v1541_v40  ;;  %v1549_v60 = vmul.f32 0.5, %v1067_v58  ;;  %v1305_v21 = vpop.f32.mrf.mxu3  ;;  %v2277_v38 = vmul.f32 0.5, %v4991_v28  ;;  %v3019_v18 = vsub.f32 %v2425_v30, %v2722_v50 }
 0x25c   : > { %v3778_v9 = vadd.f32 %v3745_v1, %v3306_v42  ;;  %v2423_v43 = vadd.f32 0.5, %v2126_v7  ;;  %v2134_v44 = vmul.f32 0.5, %v4993_v11  ;;  %v2433_v6 = vadd.f32 0.5, %v2136_v48 }
 0x25d   : > { %5000 = vtanh.f32 %v1549_v60  ;;  %4424 = vmatmul.msk.f32.gmra.mxu1 %vm355_vm0, %v6827_v23  ;;  %4457 = vmatmul.msk.f32.gmra.mxu2 %vm355_vm0, %v6827_v23  ;;  %v1415_v53 = vpop.f32.mrf.mxu0  ;;  %v3713_v28 = vadd.f32 %v6587_v2, %v3313_v12  ;;  %v3315_v30 = vmul.f32 %v3018_v31, %v3018_v31  ;;  %v6884_v2 = vld [vmem:[%s5619_s12 + $0xc0] sm:$0xff] }
 0x25e   : > { %v4995_v57 = vpop.eup %4994  ;;  %v3811_v15 = vadd.f32 %v3778_v9, %v3307_v52  ;;  %v3017_v42 = vsub.f32 %v2423_v43, %v2720_v55  ;;  %v2431_v32 = vadd.f32 0.5, %v2134_v44  ;;  %v1552_v40 = vmul.f32 0.5, %v1415_v53  ;;  %v2871_v31 = vld [vmem:[%s5609_s20 + $0x5c0] sm:$0xff]  ;;  %v2729_v53 = vld [vmem:[%s5609_s20 + $0x150] sm:$0xff] }
 0x25f   : > { %v4997_v1 = vpop.eup %4996  ;;  %v2137_v48 = vmul.f32 0.5, %v4995_v57  ;;  %5002 = vtanh.f32 %v1560_v54  ;;  %v2574_v55 = vadd.f32 0.5, %v2277_v38  ;;  %v3027_v60 = vsub.f32 %v2433_v6, %v2730_v3  ;;  %v2731_v44 = vld [vmem:[%s5609_s20 + $0x160] sm:$0xff] }
 0x260   : > { %v3877_v7 = vadd.f32 %v3844_v56, %v3811_v15  ;;  %v3314_v50 = vmul.f32 %v3017_v42, %v3017_v42  ;;  %v3025_v58 = vsub.f32 %v2431_v32, %v2728_v37  ;;  %v1183_v11 = vpop.f32.mrf.mxu2  ;;  %5004 = vtanh.f32 %v1552_v40  ;;  %4523 = vmatmul.msk.f32.gmra.mxu0 %vm355_vm0, %v6827_v23  ;;  %4493 = vmatmul.msk.f32.gmra.mxu3 %vm355_vm0, %v6884_v2 }
 0x261   : > { %v4999_v52 = vpop.eup %4998  ;;  %v2434_v29 = vadd.f32 0.5, %v2137_v48  ;;  %v1550_v9 = vmul.f32 0.5, %v1183_v11  ;;  %v3316_v54 = vmul.f32 %v3019_v18, %v3019_v18  ;;  %v2145_v23 = vmul.f32 0.5, %v4997_v1  ;;  %v2737_v18 = vld [vmem:[%s5609_s20 + $0x190] sm:$0xff] }
 0x262   : > { %3910 = vst [vmem:[#allocation2 + $0xd8] sm:$0xff] %v3877_v7  ;;  %v3746_v12 = vadd.f32 %v3713_v28, %v3314_v50  ;;  %v2135_v43 = vmul.f32 0.5, %v4999_v52  ;;  %v1070_v56 = vpop.f32.mrf.mxu1  ;;  %v3322_v38 = vmul.f32 %v3025_v58, %v3025_v58  ;;  %v1569_v57 = vmul.f32 0.5, %v1305_v21  ;;  %v3845_v28 = vld [vmem:[#allocation2 + $0x18] sm:$0xff] }
 0x263   : > { %v5001_v37 = vpop.eup %5000  ;;  %5006 = vtanh.f32 %v1550_v9  ;;  %v1558_v6 = vmul.f32 0.5, %v1070_v56  ;;  %v1308_v3 = vpop.f32.mrf.mxu3  ;;  %v3168_v48 = vsub.f32 %v2574_v55, %v2871_v31  ;;  %v3324_v7 = vmul.f32 %v3027_v60, %v3027_v60 }
 0x264   : > { %5008 = vtanh.f32 %v1692_v22  ;;  %v3779_v15 = vadd.f32 %v3746_v12, %v3315_v30  ;;  %v2432_v42 = vadd.f32 0.5, %v2135_v43  ;;  %v2143_v32 = vmul.f32 0.5, %v5001_v37  ;;  %v2739_v12 = vld [vmem:[%s5609_s20 + $0x1a0] sm:$0xff] }
 0x265   : > { %v5003_v40 = vpop.eup %5002  ;;  %v3028_v50 = vsub.f32 %v2434_v29, %v2731_v44  ;;  %5010 = vtanh.f32 %v1558_v6  ;;  %4425 = vmatmul.msk.f32.gmra.mxu1 %vm355_vm0, %v6849_v33  ;;  %4458 = vmatmul.msk.f32.gmra.mxu2 %vm355_vm0, %v6849_v33  ;;  %v1418_v21 = vpop.f32.mrf.mxu0  ;;  %v3714_v52 = vadd.f32 %v6591_v24, %v3322_v38  ;;  %v2442_v55 = vadd.f32 0.5, %v2145_v23  ;;  %v7411_v44 = vld [vmem:[#allocation17_spill] sm:$0xff]  ;;  %v6905_v38 = vld [vmem:[%s5619_s12 + $0xc8] sm:$0xff] }
 0x266   : > { %v5005_v22 = vpop.eup %5004  ;;  %v3812_v1 = vadd.f32 %v3779_v15, %v3316_v54  ;;  %v3026_v30 = vsub.f32 %v2432_v42, %v2729_v53  ;;  %v2440_v58 = vadd.f32 0.5, %v2143_v32  ;;  %v1561_v11 = vmul.f32 0.5, %v1418_v21  ;;  %v2740_v42 = vld [vmem:[%s5609_s20 + $0x1a8] sm:$0xff] }
 0x267   : > { %v2146_v60 = vmul.f32 0.5, %v5005_v22  ;;  %5012 = vtanh.f32 %v1569_v57  ;;  %v6902_v56 = vadd.f32 %v7411_v44, %v6821_v62  ;;  %v2154_v37 = vmul.f32 0.5, %v5003_v40  ;;  %v7412_v22 = vld [vmem:[#allocation33_spill] sm:$0xff] }
 0x268   : > { %v3878_v29 = vadd.f32 %v3845_v28, %v3812_v1  ;;  %v3323_v9 = vmul.f32 %v3026_v30, %v3026_v30  ;;  %v3034_v31 = vsub.f32 %v2440_v58, %v2737_v18  ;;  %v1186_v43 = vpop.f32.mrf.mxu2  ;;  %5014 = vtanh.f32 %v1561_v11  ;;  %4524 = vmatmul.msk.f32.gmra.mxu0 %vm355_vm0, %v6849_v33  ;;  %4494 = vmatmul.msk.f32.gmra.mxu3 %vm355_vm0, %v6905_v38  ;;  %v2738_v18 = vld [vmem:[%s5609_s20 + $0x198] sm:$0xff] }
 0x269   : > { %v5007_v54 = vpop.eup %5006  ;;  %v2443_v24 = vadd.f32 0.5, %v2146_v60  ;;  %v1559_v23 = vmul.f32 0.5, %v1186_v43  ;;  %v6909_v6 = vmul.f32 %v3168_v48, %v3168_v48  ;;  %v3325_v33 = vmul.f32 %v3028_v50, %v3028_v50 }
 0x26a   : > { %v5009_v53 = vpop.eup %5008  ;;  %3911 = vst [vmem:[#allocation2 + $0x18] sm:$0xff] %v3878_v29  ;;  %v3747_v57 = vadd.f32 %v3714_v52, %v3323_v9  ;;  %v2144_v15 = vmul.f32 0.5, %v5007_v54  ;;  %v1073_v62 = vpop.f32.mrf.mxu1  ;;  %v3331_v28 = vmul.f32 %v3034_v31, %v3034_v31  ;;  %v3036_v21 = vsub.f32 %v2442_v55, %v2739_v12  ;;  %v3846_v29 = vld [vmem:[#allocation2 + $0x50] sm:$0xff] }
 0x26b   : > { %v5011_v32 = vpop.eup %5010  ;;  %5016 = vtanh.f32 %v1559_v23  ;;  %v1567_v40 = vmul.f32 0.5, %v1073_v62  ;;  %v1701_v1 = vmul.f32 0.5, %v7412_v22  ;;  %v1311_v48 = vpop.f32.mrf.mxu3  ;;  %v2746_v52 = vld [vmem:[%s5609_s20 + $0x1d8] sm:$0xff]  ;;  %v3037_v50 = vsub.f32 %v2443_v24, %v2740_v42 }
 0x26c   : > { %v3780_v30 = vadd.f32 %v3747_v57, %v3324_v7  ;;  %v2441_v58 = vadd.f32 0.5, %v2144_v15  ;;  %v2152_v11 = vmul.f32 0.5, %v5011_v32  ;;  %v2451_v9 = vadd.f32 0.5, %v2154_v37  ;;  %v2748_v15 = vld [vmem:[%s5609_s20 + $0x1e8] sm:$0xff]  ;;  %v6924_v22 = vld [vmem:[%s5619_s12 + $0xd0] sm:$0xff] }
 0x26d   : > { %v5013_v60 = vpop.eup %5012  ;;  %5018 = vtanh.f32 %v1567_v40  ;;  %4426 = vmatmul.msk.f32.gmra.mxu1 %vm355_vm0, %v6867_v35  ;;  %4459 = vmatmul.msk.f32.gmra.mxu2 %vm355_vm0, %v6867_v35  ;;  %v1421_v55 = vpop.f32.mrf.mxu0  ;;  %v1578_v31 = vmul.f32 0.5, %v1308_v3  ;;  %v2286_v23 = vmul.f32 0.5, %v5009_v53  ;;  %v3715_v57 = vadd.f32 %v6621_v26, %v3331_v28 }
 0x26e   : > { %v5015_v12 = vpop.eup %5014  ;;  %v3813_v7 = vadd.f32 %v3780_v30, %v3325_v33  ;;  %v3035_v43 = vsub.f32 %v2441_v58, %v2738_v18  ;;  %v2449_v54 = vadd.f32 0.5, %v2152_v11  ;;  %v1570_v44 = vmul.f32 0.5, %v1421_v55  ;;  %v2749_v58 = vld [vmem:[%s5609_s20 + $0x1f0] sm:$0xff] }
 0x26f   : > { %v3333_v24 = vmul.f32 %v3036_v21, %v3036_v21  ;;  %v2155_v37 = vmul.f32 0.5, %v5015_v12  ;;  %v2163_v53 = vmul.f32 0.5, %v5013_v60  ;;  %v3334_v28 = vmul.f32 %v3037_v50, %v3037_v50  ;;  %v3847_v50 = vld [vmem:[#allocation2 + $0x68] sm:$0xff] }
 0x270   : > { %v3879_v42 = vadd.f32 %v3846_v29, %v3813_v7  ;;  %v3332_v62 = vmul.f32 %v3035_v43, %v3035_v43  ;;  %v3043_v32 = vsub.f32 %v2449_v54, %v2746_v52  ;;  %v1189_v40 = vpop.f32.mrf.mxu2  ;;  %5020 = vtanh.f32 %v1570_v44  ;;  %4525 = vmatmul.msk.f32.gmra.mxu0 %vm355_vm0, %v6867_v35  ;;  %4495 = vmatmul.msk.f32.gmra.mxu3 %vm355_vm0, %v6924_v22  ;;  %v2747_v52 = vld [vmem:[%s5609_s20 + $0x1e0] sm:$0xff] }
 0x271   : > { %v5017_v3 = vpop.eup %5016  ;;  %v2452_v33 = vadd.f32 0.5, %v2155_v37  ;;  %v1568_v18 = vmul.f32 0.5, %v1189_v40  ;;  %5022 = vtanh.f32 %v1578_v31  ;;  %v3045_v30 = vsub.f32 %v2451_v9, %v2748_v15  ;;  %v2755_v44 = vld [vmem:[%s5609_s20 + $0x220] sm:$0xff] }
 0x272   : > { %3912 = vst [vmem:[#allocation2 + $0x50] sm:$0xff] %v3879_v42  ;;  %v3748_v26 = vadd.f32 %v3715_v57, %v3332_v62  ;;  %v2153_v21 = vmul.f32 0.5, %v5017_v3  ;;  %v1076_v11 = vpop.f32.mrf.mxu1  ;;  %v3340_v29 = vmul.f32 %v3043_v32, %v3043_v32  ;;  %v1587_v60 = vmul.f32 0.5, %v1311_v48  ;;  %v2757_v62 = vld [vmem:[%s5609_s20 + $0x230] sm:$0xff] }
 0x273   : > { %v5019_v35 = vpop.eup %5018  ;;  %5024 = vtanh.f32 %v1568_v18  ;;  %v1576_v55 = vmul.f32 0.5, %v1076_v11  ;;  %v1314_v43 = vpop.f32.mrf.mxu3  ;;  %v2583_v54 = vadd.f32 0.5, %v2286_v23  ;;  %v3046_v9 = vsub.f32 %v2452_v33, %v2749_v58 }
 0x274   : > { %5026 = vtanh.f32 %v1701_v1  ;;  %v3781_v31 = vadd.f32 %v3748_v26, %v3333_v24  ;;  %v2450_v12 = vadd.f32 0.5, %v2153_v21  ;;  %v2161_v7 = vmul.f32 0.5, %v5019_v35  ;;  %v2880_v1 = vld [vmem:[%s5609_s20 + $0x608] sm:$0xff] }
 0x275   : > { %5028 = vtanh.f32 %v1576_v55  ;;  %v2460_v57 = vadd.f32 0.5, %v2163_v53  ;;  %4427 = vmatmul.msk.f32.gmra.mxu1 %vm355_vm0, %v6884_v2  ;;  %4460 = vmatmul.msk.f32.gmra.mxu2 %vm355_vm0, %v6884_v2  ;;  %v1424_v48 = vpop.f32.mrf.mxu0  ;;  %v3716_v40 = vadd.f32 %v6640_v45, %v3340_v29  ;;  %v3342_v3 = vmul.f32 %v3045_v30, %v3045_v30  ;;  %v6941_v55 = vld [vmem:[%s5619_s12 + $0xd8] sm:$0xff] }
 0x276   : > { %v5021_v15 = vpop.eup %5020  ;;  %v3814_v24 = vadd.f32 %v3781_v31, %v3334_v28  ;;  %v3044_v37 = vsub.f32 %v2450_v12, %v2747_v52  ;;  %v2458_v42 = vadd.f32 0.5, %v2161_v7  ;;  %v1579_v32 = vmul.f32 0.5, %v1424_v48  ;;  %v2758_v31 = vld [vmem:[%s5609_s20 + $0x238] sm:$0xff] }
 0x277   : > { %v5023_v23 = vpop.eup %5022  ;;  %v2164_v33 = vmul.f32 0.5, %v5021_v15  ;;  %5030 = vtanh.f32 %v1587_v60  ;;  %v3177_v58 = vsub.f32 %v2583_v54, %v2880_v1  ;;  %v3054_v11 = vsub.f32 %v2460_v57, %v2757_v62  ;;  %v7413_v48 = vld [vmem:[#allocation19_spill] sm:$0xff] }
 0x278   : > { %v3880_v18 = vadd.f32 %v3847_v50, %v3814_v24  ;;  %v3341_v53 = vmul.f32 %v3044_v37, %v3044_v37  ;;  %v3052_v26 = vsub.f32 %v2458_v42, %v2755_v44  ;;  %v1192_v21 = vpop.f32.mrf.mxu2  ;;  %5032 = vtanh.f32 %v1579_v32  ;;  %4526 = vmatmul.msk.f32.gmra.mxu0 %vm355_vm0, %v6884_v2  ;;  %4496 = vmatmul.msk.f32.gmra.mxu3 %vm355_vm0, %v6941_v55  ;;  %v2756_v50 = vld [vmem:[%s5609_s20 + $0x228] sm:$0xff]  ;;  %v3848_v32 = vld [vmem:[#allocation2 + $0x30] sm:$0xff] }
 0x279   : > { %v5025_v28 = vpop.eup %5024  ;;  %v2461_v35 = vadd.f32 0.5, %v2164_v33  ;;  %v1577_v52 = vmul.f32 0.5, %v1192_v21  ;;  %v3343_v29 = vmul.f32 %v3046_v9, %v3046_v9  ;;  %v2172_v2 = vmul.f32 0.5, %v5023_v23 }
 0x27a   : > { %v5027_v45 = vpop.eup %5026  ;;  %3913 = vst [vmem:[#allocation2 + $0x68] sm:$0xff] %v3880_v18  ;;  %v3749_v30 = vadd.f32 %v3716_v40, %v3341_v53  ;;  %v2162_v60 = vmul.f32 0.5, %v5025_v28  ;;  %v1079_v12 = vpop.f32.mrf.mxu1  ;;  %v3349_v54 = vmul.f32 %v3052_v26, %v3052_v26  ;;  %v1596_v57 = vmul.f32 0.5, %v1314_v43  ;;  %v2764_v40 = vld [vmem:[%s5609_s20 + $0x268] sm:$0xff] }
 0x27b   : > { %v5029_v7 = vpop.eup %5028  ;;  %5034 = vtanh.f32 %v1577_v52  ;;  %v1585_v44 = vmul.f32 0.5, %v1079_v12  ;;  %v6949_v15 = vadd.f32 %v7413_v48, %v6860_v63  ;;  %v1317_v42 = vpop.f32.mrf.mxu3  ;;  %v6951_v62 = vmul.f32 %v3177_v58, %v3177_v58 }
 0x27c   : > { %v3782_v1 = vadd.f32 %v3749_v30, %v3342_v3  ;;  %v2459_v24 = vadd.f32 0.5, %v2162_v60  ;;  %v2170_v37 = vmul.f32 0.5, %v5029_v7  ;;  %v3351_v23 = vmul.f32 %v3054_v11, %v3054_v11  ;;  %v2766_v30 = vld [vmem:[%s5609_s20 + $0x278] sm:$0xff]  ;;  %v6967_v7 = vld [vmem:[%s5619_s12 + $0xe0] sm:$0xff] }
 0x27d   : > { %v5031_v9 = vpop.eup %5030  ;;  %v3055_v33 = vsub.f32 %v2461_v35, %v2758_v31  ;;  %5036 = vtanh.f32 %v1585_v44  ;;  %4428 = vmatmul.msk.f32.gmra.mxu1 %vm355_vm0, %v6905_v38  ;;  %4461 = vmatmul.msk.f32.gmra.mxu2 %vm355_vm0, %v6905_v38  ;;  %v1427_v63 = vpop.f32.mrf.mxu0  ;;  %v3717_v21 = vadd.f32 %v6669_v19, %v3349_v54  ;;  %v2469_v28 = vadd.f32 0.5, %v2172_v2 }
 0x27e   : > { %v5033_v43 = vpop.eup %5032  ;;  %v3815_v3 = vadd.f32 %v3782_v1, %v3343_v29  ;;  %v3053_v18 = vsub.f32 %v2459_v24, %v2756_v50  ;;  %v2467_v53 = vadd.f32 0.5, %v2170_v37  ;;  %v1588_v26 = vmul.f32 0.5, %v1427_v63 }
 0x27f   : > { %v2173_v58 = vmul.f32 0.5, %v5033_v43  ;;  %5038 = vtanh.f32 %v1596_v57  ;;  %v6964_v31 = vadd.f32 %v6458_v59, %v6909_v6  ;;  %v2181_v2 = vmul.f32 0.5, %v5031_v9  ;;  %v2765_v59 = vld [vmem:[%s5609_s20 + $0x270] sm:$0xff] }
 0x280   : > { %v3881_v11 = vadd.f32 %v3848_v32, %v3815_v3  ;;  %v3350_v35 = vmul.f32 %v3053_v18, %v3053_v18  ;;  %v3061_v52 = vsub.f32 %v2467_v53, %v2764_v40  ;;  %v1195_v60 = vpop.f32.mrf.mxu2  ;;  %5040 = vtanh.f32 %v1588_v26  ;;  %4527 = vmatmul.msk.f32.gmra.mxu0 %vm355_vm0, %v6905_v38  ;;  %4497 = vmatmul.msk.f32.gmra.mxu3 %vm355_vm0, %v6967_v7  ;;  %v2767_v38 = vld [vmem:[%s5609_s20 + $0x280] sm:$0xff]  ;;  %v7414_v9 = vld [vmem:[#allocation34_spill] sm:$0xff] }
 0x281   : > { %v5035_v29 = vpop.eup %5034  ;;  %v2470_v19 = vadd.f32 0.5, %v2173_v58  ;;  %v1586_v12 = vmul.f32 0.5, %v1195_v60  ;;  %v2295_v54 = vmul.f32 0.5, %v5027_v45  ;;  %v3352_v44 = vmul.f32 %v3055_v33, %v3055_v33  ;;  %v3849_v18 = vld [vmem:[#allocation2 + $0x48] sm:$0xff] }
 0x282   : > { %3914 = vst [vmem:[#allocation2 + $0x30] sm:$0xff] %v3881_v11  ;;  %v3750_v50 = vadd.f32 %v3717_v21, %v3350_v35  ;;  %v2171_v57 = vmul.f32 0.5, %v5035_v29  ;;  %v1082_v48 = vpop.f32.mrf.mxu1  ;;  %v3358_v24 = vmul.f32 %v3061_v52, %v3061_v52  ;;  %v3063_v6 = vsub.f32 %v2469_v28, %v2766_v30  ;;  %v2773_v53 = vld [vmem:[%s5609_s20 + $0x2b0] sm:$0xff] }
 0x283   : > { %v5037_v1 = vpop.eup %5036  ;;  %5042 = vtanh.f32 %v1586_v12  ;;  %v1594_v37 = vmul.f32 0.5, %v1082_v48  ;;  %v1710_v32 = vmul.f32 0.5, %v7414_v9  ;;  %v1320_v3 = vpop.f32.mrf.mxu3  ;;  %v3064_v33 = vsub.f32 %v2470_v19, %v2767_v38  ;;  %v2775_v19 = vld [vmem:[%s5609_s20 + $0x2c0] sm:$0xff]  ;;  %v2776_v9 = vld [vmem:[%s5609_s20 + $0x2c8] sm:$0xff] }
 0x284   : > { %v3783_v40 = vadd.f32 %v3750_v50, %v3351_v23  ;;  %v2468_v63 = vadd.f32 0.5, %v2171_v57  ;;  %v2179_v43 = vmul.f32 0.5, %v5037_v1  ;;  %v2478_v26 = vadd.f32 0.5, %v2181_v2  ;;  %v2889_v1 = vld [vmem:[%s5609_s20 + $0x650] sm:$0xff] }
 0x285   : > { %v5039_v45 = vpop.eup %5038  ;;  %5044 = vtanh.f32 %v1594_v37  ;;  %4429 = vmatmul.msk.f32.gmra.mxu1 %vm355_vm0, %v6924_v22  ;;  %4462 = vmatmul.msk.f32.gmra.mxu2 %vm355_vm0, %v6924_v22  ;;  %v1430_v21 = vpop.f32.mrf.mxu0  ;;  %v1605_v28 = vmul.f32 0.5, %v1317_v42  ;;  %v2592_v30 = vadd.f32 0.5, %v2295_v54  ;;  %v3718_v60 = vadd.f32 %v6697_v20, %v3358_v24  ;;  %v6984_v20 = vld [vmem:[%s5619_s12 + $0xe8] sm:$0xff] }
 0x286   : > { %v5041_v58 = vpop.eup %5040  ;;  %v3816_v23 = vadd.f32 %v3783_v40, %v3352_v44  ;;  %v3062_v11 = vsub.f32 %v2468_v63, %v2765_v59  ;;  %v2476_v35 = vadd.f32 0.5, %v2179_v43  ;;  %v1597_v52 = vmul.f32 0.5, %v1430_v21  ;;  %v2774_v43 = vld [vmem:[%s5609_s20 + $0x2b8] sm:$0xff] }
 0x287   : > { %v3360_v29 = vmul.f32 %v3063_v6, %v3063_v6  ;;  %v2182_v12 = vmul.f32 0.5, %v5041_v58  ;;  %v2190_v48 = vmul.f32 0.5, %v5039_v45  ;;  %v3361_v59 = vmul.f32 %v3064_v33, %v3064_v33  ;;  %v2782_v33 = vld [vmem:[%s5609_s20 + $0x2f8] sm:$0xff] }
 0x288   : > { %v3882_v2 = vadd.f32 %v3849_v18, %v3816_v23  ;;  %v3359_v50 = vmul.f32 %v3062_v11, %v3062_v11  ;;  %v3070_v57 = vsub.f32 %v2476_v35, %v2773_v53  ;;  %v1198_v38 = vpop.f32.mrf.mxu2  ;;  %5046 = vtanh.f32 %v1597_v52  ;;  %4528 = vmatmul.msk.f32.gmra.mxu0 %vm355_vm0, %v6924_v22  ;;  %4498 = vmatmul.msk.f32.gmra.mxu3 %vm355_vm0, %v6984_v20  ;;  %v3850_v11 = vld [vmem:[#allocation2 + $0x80] sm:$0xff] }
 0x289   : > { %v5043_v42 = vpop.eup %5042  ;;  %v2479_v44 = vadd.f32 0.5, %v2182_v12  ;;  %v1595_v54 = vmul.f32 0.5, %v1198_v38  ;;  %5048 = vtanh.f32 %v1605_v28  ;;  %v3072_v37 = vsub.f32 %v2478_v26, %v2775_v19  ;;  %v2784_v19 = vld [vmem:[%s5609_s20 + $0x308] sm:$0xff] }
 0x28a   : > { %3915 = vst [vmem:[#allocation2 + $0x48] sm:$0xff] %v3882_v2  ;;  %v3751_v24 = vadd.f32 %v3718_v60, %v3359_v50  ;;  %v2180_v6 = vmul.f32 0.5, %v5043_v42  ;;  %v1085_v22 = vpop.f32.mrf.mxu1  ;;  %v3367_v63 = vmul.f32 %v3070_v57, %v3070_v57  ;;  %v1614_v18 = vmul.f32 0.5, %v1320_v3 }
 0x28b   : > { %v5045_v40 = vpop.eup %5044  ;;  %5050 = vtanh.f32 %v1595_v54  ;;  %v1603_v45 = vmul.f32 0.5, %v1085_v22  ;;  %v1323_v58 = vpop.f32.mrf.mxu3  ;;  %v3186_v23 = vsub.f32 %v2592_v30, %v2889_v1  ;;  %v3073_v35 = vsub.f32 %v2479_v44, %v2776_v9 }
 0x28c   : > { %5052 = vtanh.f32 %v1710_v32  ;;  %v3784_v53 = vadd.f32 %v3751_v24, %v3360_v29  ;;  %v2477_v21 = vadd.f32 0.5, %v2180_v6  ;;  %v2188_v28 = vmul.f32 0.5, %v5045_v40 }
 0x28d   : > { %5054 = vtanh.f32 %v1603_v45  ;;  %v2487_v26 = vadd.f32 0.5, %v2190_v48  ;;  %4430 = vmatmul.msk.f32.gmra.mxu1 %vm355_vm0, %v6941_v55  ;;  %4463 = vmatmul.msk.f32.gmra.mxu2 %vm355_vm0, %v6941_v55  ;;  %v1433_v52 = vpop.f32.mrf.mxu0  ;;  %v3719_v30 = vadd.f32 %v6707_v8, %v3367_v63  ;;  %v3369_v50 = vmul.f32 %v3072_v37, %v3072_v37  ;;  %v7003_v8 = vld [vmem:[%s5619_s12 + $0xf0] sm:$0xff] }
 0x28e   : > { %v5047_v3 = vpop.eup %5046  ;;  %v3817_v32 = vadd.f32 %v3784_v53, %v3361_v59  ;;  %v3071_v60 = vsub.f32 %v2477_v21, %v2774_v43  ;;  %v2485_v29 = vadd.f32 0.5, %v2188_v28  ;;  %v1606_v12 = vmul.f32 0.5, %v1433_v52  ;;  %v2785_v63 = vld [vmem:[%s5609_s20 + $0x310] sm:$0xff]  ;;  %v2783_v53 = vld [vmem:[%s5609_s20 + $0x300] sm:$0xff] }
 0x28f   : > { %v5049_v2 = vpop.eup %5048  ;;  %v2191_v57 = vmul.f32 0.5, %v5047_v3  ;;  %5056 = vtanh.f32 %v1614_v18  ;;  %v7000_v1 = vmul.f32 %v3186_v23, %v3186_v23  ;;  %v3081_v24 = vsub.f32 %v2487_v26, %v2784_v19  ;;  %v7415_v23 = vld [vmem:[#allocation36_spill] sm:$0xff] }
 0x290   : > { %v3883_v38 = vadd.f32 %v3850_v11, %v3817_v32  ;;  %v3368_v42 = vmul.f32 %v3071_v60, %v3071_v60  ;;  %v3079_v44 = vsub.f32 %v2485_v29, %v2782_v33  ;;  %v1201_v54 = vpop.f32.mrf.mxu2  ;;  %5058 = vtanh.f32 %v1606_v12  ;;  %4529 = vmatmul.msk.f32.gmra.mxu0 %vm355_vm0, %v6941_v55  ;;  %4499 = vmatmul.msk.f32.gmra.mxu3 %vm355_vm0, %v7003_v8  ;;  %v2791_v29 = vld [vmem:[%s5609_s20 + $0x340] sm:$0xff] }
 0x291   : > { %v5051_v48 = vpop.eup %5050  ;;  %v2488_v59 = vadd.f32 0.5, %v2191_v57  ;;  %v1604_v6 = vmul.f32 0.5, %v1201_v54  ;;  %v3370_v22 = vmul.f32 %v3073_v35, %v3073_v35  ;;  %v2199_v55 = vmul.f32 0.5, %v5049_v2  ;;  %v3851_v35 = vld [vmem:[#allocation2 + $0x88] sm:$0xff] }
 0x292   : > { %v5053_v37 = vpop.eup %5052  ;;  %3916 = vst [vmem:[#allocation2 + $0x80] sm:$0xff] %v3883_v38  ;;  %v3752_v9 = vadd.f32 %v3719_v30, %v3368_v42  ;;  %v2189_v40 = vmul.f32 0.5, %v5051_v48  ;;  %v1088_v43 = vpop.f32.mrf.mxu1  ;;  %v3376_v18 = vmul.f32 %v3079_v44, %v3079_v44  ;;  %v1623_v28 = vmul.f32 0.5, %v1323_v58 }
 0x293   : > { %v5055_v45 = vpop.eup %5054  ;;  %5060 = vtanh.f32 %v1604_v6  ;;  %v1612_v21 = vmul.f32 0.5, %v1088_v43  ;;  %v1719_v11 = vmul.f32 0.5, %v7415_v23  ;;  %v1326_v3 = vpop.f32.mrf.mxu3  ;;  %v2304_v60 = vmul.f32 0.5, %v5053_v37  ;;  %v2793_v6 = vld [vmem:[%s5609_s20 + $0x350] sm:$0xff] }
 0x294   : > { %v3785_v33 = vadd.f32 %v3752_v9, %v3369_v50  ;;  %v2486_v26 = vadd.f32 0.5, %v2189_v40  ;;  %v2197_v52 = vmul.f32 0.5, %v5055_v45  ;;  %v3378_v19 = vmul.f32 %v3081_v24, %v3081_v24 }
 0x295   : > { %v5057_v32 = vpop.eup %5056  ;;  %v3082_v12 = vsub.f32 %v2488_v59, %v2785_v63  ;;  %5062 = vtanh.f32 %v1612_v21  ;;  %4431 = vmatmul.msk.f32.gmra.mxu1 %vm355_vm0, %v6967_v7  ;;  %4464 = vmatmul.msk.f32.gmra.mxu2 %vm355_vm0, %v6967_v7  ;;  %v1436_v58 = vpop.f32.mrf.mxu0  ;;  %v3720_v42 = vadd.f32 %v6712_v5, %v3376_v18  ;;  %v2496_v44 = vadd.f32 0.5, %v2199_v55  ;;  %v7024_v55 = vld [vmem:[%s5619_s12 + $0xf8] sm:$0xff] }
 0x296   : > { %v5059_v2 = vpop.eup %5058  ;;  %v3818_v30 = vadd.f32 %v3785_v33, %v3370_v22  ;;  %v3080_v50 = vsub.f32 %v2486_v26, %v2783_v53  ;;  %v2494_v57 = vadd.f32 0.5, %v2197_v52  ;;  %v1615_v38 = vmul.f32 0.5, %v1436_v58  ;;  %v7416_v22 = vld [vmem:[#allocation35_spill] sm:$0xff]  ;;  %v2792_v33 = vld [vmem:[%s5609_s20 + $0x348] sm:$0xff] }
 0x297   : > { %v2200_v54 = vmul.f32 0.5, %v5059_v2  ;;  %5064 = vtanh.f32 %v1623_v28  ;;  %v7021_v40 = vadd.f32 %v7416_v22, %v6951_v62  ;;  %v2208_v43 = vmul.f32 0.5, %v5057_v32  ;;  %v2794_v21 = vld [vmem:[%s5609_s20 + $0x358] sm:$0xff] }
 0x298   : > { %v3884_v48 = vadd.f32 %v3851_v35, %v3818_v30  ;;  %v3377_v24 = vmul.f32 %v3080_v50, %v3080_v50  ;;  %v3088_v59 = vsub.f32 %v2494_v57, %v2791_v29  ;;  %v1204_v37 = vpop.f32.mrf.mxu2  ;;  %5066 = vtanh.f32 %v1615_v38  ;;  %4530 = vmatmul.msk.f32.gmra.mxu0 %vm355_vm0, %v6967_v7  ;;  %4500 = vmatmul.msk.f32.gmra.mxu3 %vm355_vm0, %v7024_v55  ;;  %v2898_v32 = vld [vmem:[%s5609_s20 + $0x698] sm:$0xff]  ;;  %v3852_v30 = vld [vmem:[#allocation2 + $0xe8] sm:$0xff] }
 0x299   : > { %v5061_v9 = vpop.eup %5060  ;;  %v2497_v5 = vadd.f32 0.5, %v2200_v54  ;;  %v1613_v63 = vmul.f32 0.5, %v1204_v37  ;;  %v2601_v45 = vadd.f32 0.5, %v2304_v60  ;;  %v3379_v53 = vmul.f32 %v3082_v12, %v3082_v12  ;;  %v2800_v50 = vld [vmem:[%s5609_s20 + $0x388] sm:$0xff]  ;;  %v2802_v37 = vld [vmem:[%s5609_s20 + $0x398] sm:$0xff] }
 0x29a   : > { %3917 = vst [vmem:[#allocation2 + $0x88] sm:$0xff] %v3884_v48  ;;  %v3753_v18 = vadd.f32 %v3720_v42, %v3377_v24  ;;  %v2198_v7 = vmul.f32 0.5, %v5061_v9  ;;  %v1091_v28 = vpop.f32.mrf.mxu1  ;;  %v3385_v62 = vmul.f32 %v3088_v59, %v3088_v59  ;;  %v3090_v26 = vsub.f32 %v2496_v44, %v2793_v6 }
 0x29b   : > { %v5063_v23 = vpop.eup %5062  ;;  %5068 = vtanh.f32 %v1613_v63  ;;  %v1621_v52 = vmul.f32 0.5, %v1091_v28  ;;  %v1329_v2 = vpop.f32.mrf.mxu3  ;;  %v3091_v12 = vsub.f32 %v2497_v5, %v2794_v21  ;;  %v2505_v57 = vadd.f32 0.5, %v2208_v43 }
 0x29c   : > { %5070 = vtanh.f32 %v1719_v11  ;;  %v3786_v35 = vadd.f32 %v3753_v18, %v3378_v19  ;;  %v2495_v29 = vadd.f32 0.5, %v2198_v7  ;;  %v2206_v58 = vmul.f32 0.5, %v5063_v23  ;;  %v7041_v7 = vld [vmem:[%s5619_s12 + $0x100] sm:$0xff] }
 0x29d   : > { %v5065_v60 = vpop.eup %5064  ;;  %5072 = vtanh.f32 %v1621_v52  ;;  %4432 = vmatmul.msk.f32.gmra.mxu1 %vm355_vm0, %v6984_v20  ;;  %4465 = vmatmul.msk.f32.gmra.mxu2 %vm355_vm0, %v6984_v20  ;;  %v1439_v38 = vpop.f32.mrf.mxu0  ;;  %v1632_v42 = vmul.f32 0.5, %v1326_v3  ;;  %v3195_v24 = vsub.f32 %v2601_v45, %v2898_v32  ;;  %v3721_v59 = vadd.f32 %v6741_v61, %v3385_v62  ;;  %v2801_v32 = vld [vmem:[%s5609_s20 + $0x390] sm:$0xff] }
 0x29e   : > { %v5067_v11 = vpop.eup %5066  ;;  %v3819_v19 = vadd.f32 %v3786_v35, %v3379_v53  ;;  %v3089_v44 = vsub.f32 %v2495_v29, %v2792_v33  ;;  %v2503_v54 = vadd.f32 0.5, %v2206_v58  ;;  %v1624_v48 = vmul.f32 0.5, %v1439_v38  ;;  %v2803_v33 = vld [vmem:[%s5609_s20 + $0x3a0] sm:$0xff] }
 0x29f   : > { %v3387_v6 = vmul.f32 %v3090_v26, %v3090_v26  ;;  %v2209_v9 = vmul.f32 0.5, %v5067_v11  ;;  %v2217_v45 = vmul.f32 0.5, %v5065_v60  ;;  %v3388_v28 = vmul.f32 %v3091_v12, %v3091_v12  ;;  %v3853_v12 = vld [vmem:[#allocation2 + $0x100] sm:$0xff]  ;;  %v2809_v11 = vld [vmem:[%s5609_s20 + $0x3d0] sm:$0xff] }
 0x2a0   : > { %v3885_v22 = vadd.f32 %v3852_v30, %v3819_v19  ;;  %v3386_v5 = vmul.f32 %v3089_v44, %v3089_v44  ;;  %v3097_v63 = vsub.f32 %v2503_v54, %v2800_v50  ;;  %v1207_v43 = vpop.f32.mrf.mxu2  ;;  %5074 = vtanh.f32 %v1624_v48  ;;  %4531 = vmatmul.msk.f32.gmra.mxu0 %vm355_vm0, %v6984_v20  ;;  %4501 = vmatmul.msk.f32.gmra.mxu3 %vm355_vm0, %v7041_v7 }
 0x2a1   : > { %v5069_v3 = vpop.eup %5068  ;;  %v2506_v18 = vadd.f32 0.5, %v2209_v9  ;;  %v1622_v53 = vmul.f32 0.5, %v1207_v43  ;;  %5076 = vtanh.f32 %v1632_v42  ;;  %v3099_v62 = vsub.f32 %v2505_v57, %v2802_v37 }
 0x2a2   : > { %v5071_v61 = vpop.eup %5070  ;;  %3918 = vst [vmem:[#allocation2 + $0xe8] sm:$0xff] %v3885_v22  ;;  %v3754_v21 = vadd.f32 %v3721_v59, %v3386_v5  ;;  %v2207_v23 = vmul.f32 0.5, %v5069_v3  ;;  %v1094_v20 = vpop.f32.mrf.mxu1  ;;  %v3394_v52 = vmul.f32 %v3097_v63, %v3097_v63  ;;  %v1641_v29 = vmul.f32 0.5, %v1329_v2  ;;  %v2811_v59 = vld [vmem:[%s5609_s20 + $0x3e0] sm:$0xff] }
 0x2a3   : > { %v5073_v26 = vpop.eup %5072  ;;  %5078 = vtanh.f32 %v1622_v53  ;;  %v1630_v35 = vmul.f32 0.5, %v1094_v20  ;;  %v7047_v58 = vmul.f32 %v3195_v24, %v3195_v24  ;;  %v1332_v38 = vpop.f32.mrf.mxu3  ;;  %v2313_v42 = vmul.f32 0.5, %v5071_v61  ;;  %v2812_v20 = vld [vmem:[%s5609_s20 + $0x3e8] sm:$0xff] }
 0x2a4   : > { %v3787_v60 = vadd.f32 %v3754_v21, %v3387_v6  ;;  %v2504_v30 = vadd.f32 0.5, %v2207_v23  ;;  %v2215_v50 = vmul.f32 0.5, %v5073_v26  ;;  %v3100_v57 = vsub.f32 %v2506_v18, %v2803_v33  ;;  %v2907_v23 = vld [vmem:[%s5609_s20 + $0x6e0] sm:$0xff] }
 0x2a5   : > { %5080 = vtanh.f32 %v1630_v35  ;;  %v2514_v19 = vadd.f32 0.5, %v2217_v45  ;;  %4433 = vmatmul.msk.f32.gmra.mxu1 %vm355_vm0, %v7003_v8  ;;  %4466 = vmatmul.msk.f32.gmra.mxu2 %vm355_vm0, %v7003_v8  ;;  %v1442_v2 = vpop.f32.mrf.mxu0  ;;  %v3722_v9 = vadd.f32 %v6758_v16, %v3394_v52  ;;  %v3396_v22 = vmul.f32 %v3099_v62, %v3099_v62 }
 0x2a6   : > { %v5075_v44 = vpop.eup %5074  ;;  %v3820_v54 = vadd.f32 %v3787_v60, %v3388_v28  ;;  %v3098_v48 = vsub.f32 %v2504_v30, %v2801_v32  ;;  %v2512_v24 = vadd.f32 0.5, %v2215_v50  ;;  %v1633_v6 = vmul.f32 0.5, %v1442_v2 }
 0x2a7   : > { %v5077_v37 = vpop.eup %5076  ;;  %v2218_v5 = vmul.f32 0.5, %v5075_v44  ;;  %5082 = vtanh.f32 %v1641_v29  ;;  %v2610_v45 = vadd.f32 0.5, %v2313_v42  ;;  %v3108_v61 = vsub.f32 %v2514_v19, %v2811_v59  ;;  %v2810_v29 = vld [vmem:[%s5609_s20 + $0x3d8] sm:$0xff] }
 0x2a8   : > { %v3886_v63 = vadd.f32 %v3853_v12, %v3820_v54  ;;  %v3395_v43 = vmul.f32 %v3098_v48, %v3098_v48  ;;  %v3106_v3 = vsub.f32 %v2512_v24, %v2809_v11  ;;  %v1210_v18 = vpop.f32.mrf.mxu2  ;;  %5084 = vtanh.f32 %v1633_v6  ;;  %4532 = vmatmul.msk.f32.gmra.mxu0 %vm355_vm0, %v7003_v8  ;;  %v2818_v44 = vld [vmem:[%s5609_s20 + $0x418] sm:$0xff] }
 0x2a9   : > { %v5079_v53 = vpop.eup %5078  ;;  %v2515_v21 = vadd.f32 0.5, %v2218_v5  ;;  %v1631_v28 = vmul.f32 0.5, %v1210_v18  ;;  %v3397_v62 = vmul.f32 %v3100_v57, %v3100_v57  ;;  %v2226_v52 = vmul.f32 0.5, %v5077_v37  ;;  %v3854_v57 = vld [vmem:[#allocation2 + $0xc0] sm:$0xff] }
 0x2aa   : > { %3919 = vst [vmem:[#allocation2 + $0x100] sm:$0xff] %v3886_v63  ;;  %v3755_v16 = vadd.f32 %v3722_v9, %v3395_v43  ;;  %v2216_v33 = vmul.f32 0.5, %v5079_v53  ;;  %v1097_v26 = vpop.f32.mrf.mxu1  ;;  %v3403_v35 = vmul.f32 %v3106_v3, %v3106_v3  ;;  %v1650_v60 = vmul.f32 0.5, %v1332_v38  ;;  %v2820_v18 = vld [vmem:[%s5609_s20 + $0x428] sm:$0xff] }
 0x2ab   : > { %v5081_v32 = vpop.eup %5080  ;;  %5086 = vtanh.f32 %v1631_v28  ;;  %v1639_v8 = vmul.f32 0.5, %v1097_v26  ;;  %v1728_v30 = vmul.f32 0.5, %v6531_v13  ;;  %v1335_v11 = vpop.f32.mrf.mxu3  ;;  %v3204_v2 = vsub.f32 %v2610_v45, %v2907_v23 }
 0x2ac   : > { %v3788_v50 = vadd.f32 %v3755_v16, %v3396_v22  ;;  %v2513_v42 = vadd.f32 0.5, %v2216_v33  ;;  %v2224_v12 = vmul.f32 0.5, %v5081_v32  ;;  %v3405_v54 = vmul.f32 %v3108_v61, %v3108_v61  ;;  %v7417_v61 = vld [vmem:[#allocation37_spill] sm:$0xff] }
 0x2ad   : > { %v5083_v19 = vpop.eup %5082  ;;  %v3109_v48 = vsub.f32 %v2515_v21, %v2812_v20  ;;  %5088 = vtanh.f32 %v1639_v8  ;;  %4434 = vmatmul.msk.f32.gmra.mxu1 %vm355_vm0, %v7024_v55  ;;  %4467 = vmatmul.msk.f32.gmra.mxu2 %vm355_vm0, %v7024_v55  ;;  %v1445_v38 = vpop.f32.mrf.mxu0  ;;  %v3723_v9 = vadd.f32 %v6766_v41, %v3403_v35  ;;  %v2523_v22 = vadd.f32 0.5, %v2226_v52  ;;  %v2821_v20 = vld [vmem:[%s5609_s20 + $0x430] sm:$0xff]  ;;  %v2819_v35 = vld [vmem:[%s5609_s20 + $0x420] sm:$0xff] }
 0x2ae   : > { %v5085_v13 = vpop.eup %5084  ;;  %v3821_v24 = vadd.f32 %v3788_v50, %v3397_v62  ;;  %v3107_v59 = vsub.f32 %v2513_v42, %v2810_v29  ;;  %v2521_v6 = vadd.f32 0.5, %v2224_v12  ;;  %v1642_v37 = vmul.f32 0.5, %v1445_v38  ;;  %v3855_v12 = vld [vmem:[#allocation2 + $0x28] sm:$0xff] }
 0x2af   : > { %v2227_v5 = vmul.f32 0.5, %v5085_v13  ;;  %5090 = vtanh.f32 %v1650_v60  ;;  %v7073_v21 = vadd.f32 %v7417_v61, %v7000_v1  ;;  %v2235_v23 = vmul.f32 0.5, %v5083_v19  ;;  %v2827_v19 = vld [vmem:[%s5609_s20 + $0x460] sm:$0xff] }
 0x2b0   : > { %v3887_v63 = vadd.f32 %v3854_v57, %v3821_v24  ;;  %v3404_v43 = vmul.f32 %v3107_v59, %v3107_v59  ;;  %v3115_v3 = vsub.f32 %v2521_v6, %v2818_v44  ;;  %v1213_v53 = vpop.f32.mrf.mxu2  ;;  %5092 = vtanh.f32 %v1642_v37  ;;  %4533 = vmatmul.msk.f32.gmra.mxu0 %vm355_vm0, %v7024_v55 }
 0x2b1   : > { %v5087_v45 = vpop.eup %5086  ;;  %v2524_v41 = vadd.f32 0.5, %v2227_v5  ;;  %v1640_v28 = vmul.f32 0.5, %v1213_v53  ;;  %5094 = vtanh.f32 %v1728_v30  ;;  %v3406_v62 = vmul.f32 %v3109_v48, %v3109_v48 }
 0x2b2   : > { %3920 = vst [vmem:[#allocation2 + $0xc0] sm:$0xff] %v3887_v63  ;;  %v3756_v16 = vadd.f32 %v3723_v9, %v3404_v43  ;;  %v2225_v33 = vmul.f32 0.5, %v5087_v45  ;;  %v1100_v26 = vpop.f32.mrf.mxu1  ;;  %v3412_v32 = vmul.f32 %v3115_v3, %v3115_v3  ;;  %v3117_v55 = vsub.f32 %v2523_v22, %v2820_v18  ;;  %v2829_v22 = vld [vmem:[%s5609_s20 + $0x470] sm:$0xff] }
 0x2b3   : > { %v5089_v52 = vpop.eup %5088  ;;  %5096 = vtanh.f32 %v1640_v28  ;;  %v1648_v29 = vmul.f32 0.5, %v1100_v26  ;;  %v7077_v8 = vmul.f32 %v3204_v2, %v3204_v2  ;;  %v1338_v42 = vpop.f32.mrf.mxu3  ;;  %v3118_v57 = vsub.f32 %v2524_v41, %v2821_v20  ;;  %v2828_v20 = vld [vmem:[%s5609_s20 + $0x468] sm:$0xff] }
 0x2b4   : > { %v3789_v1 = vadd.f32 %v3756_v16, %v3405_v54  ;;  %v2522_v60 = vadd.f32 0.5, %v2225_v33  ;;  %v2233_v50 = vmul.f32 0.5, %v5089_v52  ;;  %v2532_v44 = vadd.f32 0.5, %v2235_v23  ;;  %v2830_v23 = vld [vmem:[%s5609_s20 + $0x478] sm:$0xff] }
 0x2b5   : > { %v5091_v30 = vpop.eup %5090  ;;  %5098 = vtanh.f32 %v1648_v29  ;;  %4435 = vmatmul.msk.f32.gmra.mxu1 %vm355_vm0, %v7041_v7  ;;  %4468 = vmatmul.msk.f32.gmra.mxu2 %vm355_vm0, %v7041_v7  ;;  %v1448_v48 = vpop.f32.mrf.mxu0  ;;  %v1659_v2 = vmul.f32 0.5, %v1335_v11  ;;  %v7086_v6 = vadd.f32 %v6546_v10, %v7047_v58  ;;  %v3724_v37 = vadd.f32 %v6773_v46, %v3412_v32 }
 0x2b6   : > { %v5093_v38 = vpop.eup %5092  ;;  %v3822_v54 = vadd.f32 %v3789_v1, %v3406_v62  ;;  %v3116_v13 = vsub.f32 %v2522_v60, %v2819_v35  ;;  %v2530_v24 = vadd.f32 0.5, %v2233_v50  ;;  %v1651_v59 = vmul.f32 0.5, %v1448_v48  ;;  %v3856_v60 = vld [vmem:[#allocation2 + $0xf8] sm:$0xff]  ;;  %v2836_v50 = vld [vmem:[%s5609_s20 + $0x4a8] sm:$0xff] }
 0x2b7   : > { %v3414_v9 = vmul.f32 %v3117_v55, %v3117_v55  ;;  %v2236_v5 = vmul.f32 0.5, %v5093_v38  ;;  %v5095_v63 = vpop.eup %5094  ;;  %v2244_v58 = vmul.f32 0.5, %v5091_v30  ;;  %v3415_v61 = vmul.f32 %v3118_v57, %v3118_v57  ;;  %v2838_v38 = vld [vmem:[%s5609_s20 + $0x4b8] sm:$0xff] }
 0x2b8   : > { %v3888_v43 = vadd.f32 %v3855_v12, %v3822_v54  ;;  %v3413_v3 = vmul.f32 %v3116_v13, %v3116_v13  ;;  %v3124_v18 = vsub.f32 %v2530_v24, %v2827_v19  ;;  %v1216_v11 = vpop.f32.mrf.mxu2  ;;  %5100 = vtanh.f32 %v1651_v59  ;;  %4534 = vmatmul.msk.f32.gmra.mxu0 %vm355_vm0, %v7041_v7 }
 0x2b9   : > { %v5097_v53 = vpop.eup %5096  ;;  %v2533_v45 = vadd.f32 0.5, %v2236_v5  ;;  %v1649_v10 = vmul.f32 0.5, %v1216_v11  ;;  %5102 = vtanh.f32 %v1659_v2  ;;  %v3126_v28 = vsub.f32 %v2532_v44, %v2829_v22  ;;  %v2916_v11 = vld [vmem:[%s5609_s20 + $0x728] sm:$0xff] }
 0x2ba   : > { %3921 = vst [vmem:[#allocation2 + $0x28] sm:$0xff] %v3888_v43  ;;  %v3757_v46 = vadd.f32 %v3724_v37, %v3413_v3  ;;  %v2234_v41 = vmul.f32 0.5, %v5097_v53  ;;  %v1103_v16 = vpop.f32.mrf.mxu1  ;;  %v3421_v33 = vmul.f32 %v3124_v18, %v3124_v18  ;;  %v1668_v52 = vmul.f32 0.5, %v1338_v42 }
 0x2bb   : > { %v5099_v62 = vpop.eup %5098  ;;  %5104 = vtanh.f32 %v1649_v10  ;;  %v1657_v26 = vmul.f32 0.5, %v1103_v16  ;;  %v1737_v7 = vmul.f32 0.5, %v6556_v47  ;;  %v1341_v29 = vpop.f32.mrf.mxu3  ;;  %v2322_v1 = vmul.f32 0.5, %v5095_v63  ;;  %v2839_v10 = vld [vmem:[%s5609_s20 + $0x4c0] sm:$0xff] }
 0x2bc   : > { %v3790_v32 = vadd.f32 %v3757_v46, %v3414_v9  ;;  %v2531_v35 = vadd.f32 0.5, %v2234_v41  ;;  %v2242_v55 = vmul.f32 0.5, %v5099_v62  ;;  %v3127_v30 = vsub.f32 %v2533_v45, %v2830_v23 }
 0x2bd   : > { %5106 = vtanh.f32 %v1657_v26  ;;  %v2541_v12 = vadd.f32 0.5, %v2244_v58  ;;  %v1451_v19 = vpop.f32.mrf.mxu0  ;;  %v3725_v54 = vadd.f32 %v6787_v34, %v3421_v33  ;;  %v3423_v13 = vmul.f32 %v3126_v28, %v3126_v28  ;;  %v2837_v28 = vld [vmem:[%s5609_s20 + $0x4b0] sm:$0xff] }
 0x2be   : > { %v5101_v57 = vpop.eup %5100  ;;  %v3823_v44 = vadd.f32 %v3790_v32, %v3415_v61  ;;  %v3125_v48 = vsub.f32 %v2531_v35, %v2828_v20  ;;  %v2539_v2 = vadd.f32 0.5, %v2242_v55  ;;  %v1660_v42 = vmul.f32 0.5, %v1451_v19  ;;  %v3857_v35 = vld [vmem:[#allocation2 + $0xb8] sm:$0xff]  ;;  %v2845_v55 = vld [vmem:[%s5609_s20 + $0x4f0] sm:$0xff] }
 0x2bf   : > { %v5103_v47 = vpop.eup %5102  ;;  %v2245_v24 = vmul.f32 0.5, %v5101_v57  ;;  %5108 = vtanh.f32 %v1668_v52  ;;  %v2619_v63 = vadd.f32 0.5, %v2322_v1  ;;  %v3135_v43 = vsub.f32 %v2541_v12, %v2838_v38 }
 0x2c0   : > { %v3889_v59 = vadd.f32 %v3856_v60, %v3823_v44  ;;  %v3422_v37 = vmul.f32 %v3125_v48, %v3125_v48  ;;  %v3133_v9 = vsub.f32 %v2539_v2, %v2836_v50  ;;  %v1219_v22 = vpop.f32.mrf.mxu2  ;;  %5110 = vtanh.f32 %v1660_v42 }
 0x2c1   : > { %v5105_v5 = vpop.eup %5104  ;;  %v2542_v3 = vadd.f32 0.5, %v2245_v24  ;;  %v1658_v18 = vmul.f32 0.5, %v1219_v22  ;;  %v3424_v45 = vmul.f32 %v3127_v30, %v3127_v30  ;;  %v2253_v46 = vmul.f32 0.5, %v5103_v47  ;;  %v2847_v47 = vld [vmem:[%s5609_s20 + $0x500] sm:$0xff] }
 0x2c2   : > { %3922 = vst [vmem:[#allocation2 + $0xf8] sm:$0xff] %v3889_v59  ;;  %v3758_v53 = vadd.f32 %v3725_v54, %v3422_v37  ;;  %v2243_v34 = vmul.f32 0.5, %v5105_v5  ;;  %v1106_v58 = vpop.f32.mrf.mxu1  ;;  %v3430_v41 = vmul.f32 %v3133_v9, %v3133_v9  ;;  %v1677_v16 = vmul.f32 0.5, %v1341_v29 }
 0x2c3   : > { %v5107_v61 = vpop.eup %5106  ;;  %5112 = vtanh.f32 %v1658_v18  ;;  %v1666_v23 = vmul.f32 0.5, %v1106_v58  ;;  %v1344_v26 = vpop.f32.mrf.mxu3  ;;  %v3213_v32 = vsub.f32 %v2619_v63, %v2916_v11  ;;  %v3432_v1 = vmul.f32 %v3135_v43, %v3135_v43 }
 0x2c4   : > { %5114 = vtanh.f32 %v1737_v7  ;;  %v3791_v62 = vadd.f32 %v3758_v53, %v3423_v13  ;;  %v2540_v33 = vadd.f32 0.5, %v2243_v34  ;;  %v2251_v20 = vmul.f32 0.5, %v5107_v61 }
 0x2c5   : > { %v5109_v52 = vpop.eup %5108  ;;  %v3136_v60 = vsub.f32 %v2542_v3, %v2839_v10  ;;  %5116 = vtanh.f32 %v1666_v23  ;;  %v1454_v50 = vpop.f32.mrf.mxu0  ;;  %v3726_v7 = vadd.f32 %v6811_v25, %v3430_v41  ;;  %v2550_v29 = vadd.f32 0.5, %v2253_v46  ;;  %v2848_v3 = vld [vmem:[%s5609_s20 + $0x508] sm:$0xff]  ;;  %v2854_v23 = vld [vmem:[%s5609_s20 + $0x538] sm:$0xff] }
 0x2c6   : > { %v5111_v30 = vpop.eup %5110  ;;  %v3824_v12 = vadd.f32 %v3791_v62, %v3424_v45  ;;  %v3134_v19 = vsub.f32 %v2540_v33, %v2837_v28  ;;  %v2548_v57 = vadd.f32 0.5, %v2251_v20  ;;  %v1669_v44 = vmul.f32 0.5, %v1454_v50  ;;  %v2846_v45 = vld [vmem:[%s5609_s20 + $0x4f8] sm:$0xff]  ;;  %v3858_v28 = vld [vmem:[#allocation2 + $0x40] sm:$0xff] }
 0x2c7   : > { %v2254_v48 = vmul.f32 0.5, %v5111_v30  ;;  %5118 = vtanh.f32 %v1677_v16  ;;  %v7104_v24 = vmul.f32 %v3213_v32, %v3213_v32  ;;  %v2262_v9 = vmul.f32 0.5, %v5109_v52  ;;  %v2856_v30 = vld [vmem:[%s5609_s20 + $0x548] sm:$0xff] }
 0x2c8   : > { %v3890_v2 = vadd.f32 %v3857_v35, %v3824_v12  ;;  %v3431_v38 = vmul.f32 %v3134_v19, %v3134_v19  ;;  %v3142_v42 = vsub.f32 %v2548_v57, %v2845_v55  ;;  %v1222_v54 = vpop.f32.mrf.mxu2  ;;  %5120 = vtanh.f32 %v1669_v44 }
 0x2c9   : > { %v5113_v13 = vpop.eup %5112  ;;  %v2551_v59 = vadd.f32 0.5, %v2254_v48  ;;  %v1667_v37 = vmul.f32 0.5, %v1222_v54  ;;  %v7108_v25 = vadd.f32 %v6570_v14, %v7077_v8  ;;  %v3433_v63 = vmul.f32 %v3136_v60, %v3136_v60  ;;  %v2857_v54 = vld [vmem:[%s5609_s20 + $0x550] sm:$0xff] }
 0x2ca   : > { %v5115_v22 = vpop.eup %5114  ;;  %3923 = vst [vmem:[#allocation2 + $0xb8] sm:$0xff] %v3890_v2  ;;  %v3759_v5 = vadd.f32 %v3726_v7, %v3431_v38  ;;  %v2252_v43 = vmul.f32 0.5, %v5113_v13  ;;  %v1109_v18 = vpop.f32.mrf.mxu1  ;;  %v3439_v53 = vmul.f32 %v3142_v42, %v3142_v42  ;;  %v3144_v34 = vsub.f32 %v2550_v29, %v2847_v47 }
 0x2cb   : > { %v5117_v11 = vpop.eup %5116  ;;  %5122 = vtanh.f32 %v1667_v37  ;;  %v1675_v10 = vmul.f32 0.5, %v1109_v18  ;;  %v1746_v58 = vmul.f32 0.5, %v6584_v17  ;;  %v1347_v14 = vpop.f32.mrf.mxu3  ;;  %v3145_v16 = vsub.f32 %v2551_v59, %v2848_v3 }
 0x2cc   : > { %v3792_v46 = vadd.f32 %v3759_v5, %v3432_v1  ;;  %v2549_v61 = vadd.f32 0.5, %v2252_v43  ;;  %v2260_v41 = vmul.f32 0.5, %v5117_v11  ;;  %v2559_v62 = vadd.f32 0.5, %v2262_v9  ;;  %v2855_v9 = vld [vmem:[%s5609_s20 + $0x540] sm:$0xff] }
 0x2cd   : > { %v5119_v8 = vpop.eup %5118  ;;  %5124 = vtanh.f32 %v1675_v10  ;;  %v1457_v33 = vpop.f32.mrf.mxu0  ;;  %v1686_v20 = vmul.f32 0.5, %v1344_v26  ;;  %v2331_v50 = vmul.f32 0.5, %v5115_v22  ;;  %v3727_v17 = vadd.f32 %v6846_v39, %v3439_v53  ;;  %v3859_v53 = vld [vmem:[#allocation2 + $0x90] sm:$0xff] }
 0x2ce   : > { %v5121_v52 = vpop.eup %5120  ;;  %v3825_v32 = vadd.f32 %v3792_v46, %v3433_v63  ;;  %v3143_v35 = vsub.f32 %v2549_v61, %v2846_v45  ;;  %v2557_v55 = vadd.f32 0.5, %v2260_v41  ;;  %v1678_v60 = vmul.f32 0.5, %v1457_v33  ;;  %v2863_v45 = vld [vmem:[%s5609_s20 + $0x580] sm:$0xff]  ;;  %v2925_v41 = vld [vmem:[%s5609_s20 + $0x770] sm:$0xff] }
 0x2cf   : > { %v3441_v1 = vmul.f32 %v3144_v34, %v3144_v34  ;;  %v2263_v12 = vmul.f32 0.5, %v5121_v52  ;;  %v2271_v2 = vmul.f32 0.5, %v5119_v8  ;;  %v3442_v42 = vmul.f32 %v3145_v16, %v3145_v16  ;;  %v2865_v16 = vld [vmem:[%s5609_s20 + $0x590] sm:$0xff] }
 0x2d0   : > { %v3891_v19 = vadd.f32 %v3858_v28, %v3825_v32  ;;  %v3440_v57 = vmul.f32 %v3143_v35, %v3143_v35  ;;  %v3151_v44 = vsub.f32 %v2557_v55, %v2854_v23  ;;  %v1225_v7 = vpop.f32.mrf.mxu2  ;;  %5126 = vtanh.f32 %v1678_v60 }
 0x2d1   : > { %v5123_v29 = vpop.eup %5122  ;;  %v2560_v26 = vadd.f32 0.5, %v2263_v12  ;;  %v1676_v48 = vmul.f32 0.5, %v1225_v7  ;;  %5128 = vtanh.f32 %v1686_v20  ;;  %v3153_v39 = vsub.f32 %v2559_v62, %v2856_v30 }
 0x2d2   : > { %3924 = vst [vmem:[#allocation2 + $0x40] sm:$0xff] %v3891_v19  ;;  %v3760_v38 = vadd.f32 %v3727_v17, %v3440_v57  ;;  %v2261_v47 = vmul.f32 0.5, %v5123_v29  ;;  %v1112_v13 = vpop.f32.mrf.mxu1  ;;  %v3448_v37 = vmul.f32 %v3151_v44, %v3151_v44  ;;  %v1695_v5 = vmul.f32 0.5, %v1347_v14  ;;  %v2866_v44 = vld [vmem:[%s5609_s20 + $0x598] sm:$0xff] }
 0x2d3   : > { %v5125_v59 = vpop.eup %5124  ;;  %5130 = vtanh.f32 %v1676_v48  ;;  %v1684_v22 = vmul.f32 0.5, %v1112_v13  ;;  %v1350_v18 = vpop.f32.mrf.mxu3  ;;  %v2628_v11 = vadd.f32 0.5, %v2331_v50  ;;  %v3154_v34 = vsub.f32 %v2560_v26, %v2857_v54 }
 0x2d4   : > { %5132 = vtanh.f32 %v1746_v58  ;;  %v3793_v63 = vadd.f32 %v3760_v38, %v3441_v1  ;;  %v2558_v43 = vadd.f32 0.5, %v2261_v47  ;;  %v2269_v3 = vmul.f32 0.5, %v5125_v59 }
 0x2d5   : > { %5134 = vtanh.f32 %v1684_v22  ;;  %v2568_v10 = vadd.f32 0.5, %v2271_v2  ;;  %v1460_v46 = vpop.f32.mrf.mxu0  ;;  %v3728_v62 = vadd.f32 %v6902_v56, %v3448_v37  ;;  %v3450_v33 = vmul.f32 %v3153_v39, %v3153_v39  ;;  %v2864_v2 = vld [vmem:[%s5609_s20 + $0x588] sm:$0xff] }
 0x2d6   : > { %v5127_v61 = vpop.eup %5126  ;;  %v3826_v8 = vadd.f32 %v3793_v63, %v3442_v42  ;;  %v3152_v28 = vsub.f32 %v2558_v43, %v2855_v9  ;;  %v2566_v23 = vadd.f32 0.5, %v2269_v3  ;;  %v1687_v14 = vmul.f32 0.5, %v1460_v46  ;;  %v3860_v22 = vld [vmem:[#allocation2 + $0x60] sm:$0xff] }
 0x2d7   : > { %v5129_v58 = vpop.eup %5128  ;;  %v2272_v20 = vmul.f32 0.5, %v5127_v61  ;;  %5136 = vtanh.f32 %v1695_v5  ;;  %v3222_v50 = vsub.f32 %v2628_v11, %v2925_v41  ;;  %v3162_v17 = vsub.f32 %v2568_v10, %v2865_v16  ;;  %v2872_v5 = vld [vmem:[%s5609_s20 + $0x5c8] sm:$0xff] }
 0x2d8   : > { %v3892_v52 = vadd.f32 %v3859_v53, %v3826_v8  ;;  %v3449_v32 = vmul.f32 %v3152_v28, %v3152_v28  ;;  %v3160_v35 = vsub.f32 %v2566_v23, %v2863_v45  ;;  %v1228_v55 = vpop.f32.mrf.mxu2  ;;  %5138 = vtanh.f32 %v1687_v14  ;;  %v2874_v28 = vld [vmem:[%s5609_s20 + $0x5d8] sm:$0xff] }
 0x2d9   : > { %v5131_v60 = vpop.eup %5130  ;;  %v2569_v1 = vadd.f32 0.5, %v2272_v20  ;;  %v1685_v30 = vmul.f32 0.5, %v1228_v55  ;;  %v3451_v57 = vmul.f32 %v3154_v34, %v3154_v34  ;;  %v2280_v29 = vmul.f32 0.5, %v5129_v58 }
 0x2da   : > { %v5133_v12 = vpop.eup %5132  ;;  %3925 = vst [vmem:[#allocation2 + $0x90] sm:$0xff] %v3892_v52  ;;  %v3761_v19 = vadd.f32 %v3728_v62, %v3449_v32  ;;  %v2270_v56 = vmul.f32 0.5, %v5131_v60  ;;  %v1115_v7 = vpop.f32.mrf.mxu1  ;;  %v3457_v48 = vmul.f32 %v3160_v35, %v3160_v35  ;;  %v1704_v42 = vmul.f32 0.5, %v1350_v18  ;;  %v2875_v35 = vld [vmem:[%s5609_s20 + $0x5e0] sm:$0xff] }
 0x2db   : > { %v5135_v26 = vpop.eup %5134  ;;  %5140 = vtanh.f32 %v1685_v30  ;;  %v1693_v38 = vmul.f32 0.5, %v1115_v7  ;;  %v1755_v47 = vmul.f32 0.5, %v6617_v0  ;;  %v1353_v59 = vpop.f32.mrf.mxu3  ;;  %v2340_v9 = vmul.f32 0.5, %v5133_v12 }
 0x2dc   : > { %v3794_v39 = vadd.f32 %v3761_v19, %v3450_v33  ;;  %v2567_v54 = vadd.f32 0.5, %v2270_v56  ;;  %v2278_v13 = vmul.f32 0.5, %v5135_v26  ;;  %v3459_v63 = vmul.f32 %v3162_v17, %v3162_v17  ;;  %v2881_v26 = vld [vmem:[%s5609_s20 + $0x610] sm:$0xff] }
 0x2dd   : > { %v5137_v37 = vpop.eup %5136  ;;  %v3163_v43 = vsub.f32 %v2569_v1, %v2866_v44  ;;  %5142 = vtanh.f32 %v1693_v38  ;;  %v1463_v3 = vpop.f32.mrf.mxu0  ;;  %v3729_v0 = vadd.f32 %v6949_v15, %v3457_v48  ;;  %v2577_v10 = vadd.f32 0.5, %v2280_v29  ;;  %v2873_v1 = vld [vmem:[%s5609_s20 + $0x5d0] sm:$0xff]  ;;  %v3861_v29 = vld [vmem:[#allocation2 + $0x38] sm:$0xff] }
 0x2de   : > { %v5139_v11 = vpop.eup %5138  ;;  %v3827_v53 = vadd.f32 %v3794_v39, %v3451_v57  ;;  %v3161_v45 = vsub.f32 %v2567_v54, %v2864_v2  ;;  %v2575_v34 = vadd.f32 0.5, %v2278_v13  ;;  %v1696_v18 = vmul.f32 0.5, %v1463_v3 }
 0x2df   : > { %v2281_v46 = vmul.f32 0.5, %v5139_v11  ;;  %5144 = vtanh.f32 %v1704_v42  ;;  %v7128_v14 = vmul.f32 %v3222_v50, %v3222_v50  ;;  %v2289_v33 = vmul.f32 0.5, %v5137_v37  ;;  %v2934_v50 = vld [vmem:[%s5609_s20 + $0x7b8] sm:$0xff] }
 0x2e0   : > { %v3893_v61 = vadd.f32 %v3860_v22, %v3827_v53  ;;  %v3458_v41 = vmul.f32 %v3161_v45, %v3161_v45  ;;  %v3169_v8 = vsub.f32 %v2575_v34, %v2872_v5  ;;  %v1231_v23 = vpop.f32.mrf.mxu2  ;;  %5146 = vtanh.f32 %v1696_v18 }
 0x2e1   : > { %v5141_v16 = vpop.eup %5140  ;;  %v2578_v58 = vadd.f32 0.5, %v2281_v46  ;;  %v1694_v62 = vmul.f32 0.5, %v1231_v23  ;;  %v2637_v20 = vadd.f32 0.5, %v2340_v9  ;;  %v3460_v52 = vmul.f32 %v3163_v43, %v3163_v43 }
 0x2e2   : > { %3926 = vst [vmem:[#allocation2 + $0x60] sm:$0xff] %v3893_v61  ;;  %v3762_v15 = vadd.f32 %v3729_v0, %v3458_v41  ;;  %v2279_v32 = vmul.f32 0.5, %v5141_v16  ;;  %v1118_v55 = vpop.f32.mrf.mxu1  ;;  %v3466_v17 = vmul.f32 %v3169_v8, %v3169_v8  ;;  %v3171_v30 = vsub.f32 %v2577_v10, %v2874_v28  ;;  %v2884_v8 = vld [vmem:[%s5609_s20 + $0x628] sm:$0xff] }
 0x2e3   : > { %v5143_v60 = vpop.eup %5142  ;;  %5148 = vtanh.f32 %v1694_v62  ;;  %v1702_v12 = vmul.f32 0.5, %v1118_v55  ;;  %v1356_v44 = vpop.f32.mrf.mxu3  ;;  %v3172_v48 = vsub.f32 %v2578_v58, %v2875_v35  ;;  %v2586_v2 = vadd.f32 0.5, %v2289_v33  ;;  %v2882_v58 = vld [vmem:[%s5609_s20 + $0x618] sm:$0xff] }
 0x2e4   : > { %5150 = vtanh.f32 %v1755_v47  ;;  %v3795_v19 = vadd.f32 %v3762_v15, %v3459_v63  ;;  %v2576_v57 = vadd.f32 0.5, %v2279_v32  ;;  %v2287_v56 = vmul.f32 0.5, %v5143_v60  ;;  %v2883_v63 = vld [vmem:[%s5609_s20 + $0x620] sm:$0xff]  ;;  %v3862_v60 = vld [vmem:[#allocation2 + $0xd0] sm:$0xff] }
 0x2e5   : > { %v5145_v7 = vpop.eup %5144  ;;  %5152 = vtanh.f32 %v1702_v12  ;;  %v1466_v38 = vpop.f32.mrf.mxu0  ;;  %v1713_v42 = vmul.f32 0.5, %v1353_v59  ;;  %v3231_v22 = vsub.f32 %v2637_v20, %v2934_v50  ;;  %v3730_v47 = vadd.f32 %v6964_v31, %v3466_v17  ;;  %v2890_v17 = vld [vmem:[%s5609_s20 + $0x658] sm:$0xff] }
 0x2e6   : > { %v5147_v39 = vpop.eup %5146  ;;  %v3828_v54 = vadd.f32 %v3795_v19, %v3460_v52  ;;  %v3170_v13 = vsub.f32 %v2576_v57, %v2873_v1  ;;  %v2584_v37 = vadd.f32 0.5, %v2287_v56  ;;  %v1705_v9 = vmul.f32 0.5, %v1466_v38 }
 0x2e7   : > { %v3468_v5 = vmul.f32 %v3171_v30, %v3171_v30  ;;  %v2290_v43 = vmul.f32 0.5, %v5147_v39  ;;  %v2298_v0 = vmul.f32 0.5, %v5145_v7  ;;  %v3469_v61 = vmul.f32 %v3172_v48, %v3172_v48 }
 0x2e8   : > { %v3894_v3 = vadd.f32 %v3861_v29, %v3828_v54  ;;  %v3467_v11 = vmul.f32 %v3170_v13, %v3170_v13  ;;  %v3178_v53 = vsub.f32 %v2584_v37, %v2881_v26  ;;  %v1234_v45 = vpop.f32.mrf.mxu2  ;;  %5154 = vtanh.f32 %v1705_v9 }
 0x2e9   : > { %v5149_v34 = vpop.eup %5148  ;;  %v2587_v59 = vadd.f32 0.5, %v2290_v43  ;;  %v1703_v18 = vmul.f32 0.5, %v1234_v45  ;;  %5156 = vtanh.f32 %v1713_v42  ;;  %v3180_v41 = vsub.f32 %v2586_v2, %v2883_v63 }
 0x2ea   : > { %v5151_v10 = vpop.eup %5150  ;;  %3927 = vst [vmem:[#allocation2 + $0x38] sm:$0xff] %v3894_v3  ;;  %v3763_v46 = vadd.f32 %v3730_v47, %v3467_v11  ;;  %v2288_v31 = vmul.f32 0.5, %v5149_v34  ;;  %v1121_v28 = vpop.f32.mrf.mxu1  ;;  %v3475_v16 = vmul.f32 %v3178_v53, %v3178_v53  ;;  %v1722_v33 = vmul.f32 0.5, %v1356_v44  ;;  %v2892_v44 = vld [vmem:[%s5609_s20 + $0x668] sm:$0xff]  ;;  %v2891_v53 = vld [vmem:[%s5609_s20 + $0x660] sm:$0xff] }
 0x2eb   : > { %v5153_v23 = vpop.eup %5152  ;;  %5158 = vtanh.f32 %v1703_v18  ;;  %v1711_v62 = vmul.f32 0.5, %v1121_v28  ;;  %v7140_v20 = vadd.f32 %v6608_v27, %v7104_v24  ;;  %v1359_v35 = vpop.f32.mrf.mxu3  ;;  %v7142_v55 = vmul.f32 %v3231_v22, %v3231_v22 }
 0x2ec   : > { %v3796_v15 = vadd.f32 %v3763_v46, %v3468_v5  ;;  %v2585_v52 = vadd.f32 0.5, %v2288_v31  ;;  %v2296_v32 = vmul.f32 0.5, %v5153_v23  ;;  %v3181_v1 = vsub.f32 %v2587_v59, %v2884_v8  ;;  %v2899_v8 = vld [vmem:[%s5609_s20 + $0x6a0] sm:$0xff] }
 0x2ed   : > { %5160 = vtanh.f32 %v1711_v62  ;;  %v2595_v30 = vadd.f32 0.5, %v2298_v0  ;;  %v1469_v12 = vpop.f32.mrf.mxu0  ;;  %v3731_v7 = vadd.f32 %v7021_v40, %v3475_v16  ;;  %v3477_v29 = vmul.f32 %v3180_v41, %v3180_v41  ;;  %v2893_v40 = vld [vmem:[%s5609_s20 + $0x670] sm:$0xff]  ;;  %v3863_v41 = vld [vmem:[#allocation2 + $0x20] sm:$0xff] }
 0x2ee   : > { %v5155_v50 = vpop.eup %5154  ;;  %v3829_v19 = vadd.f32 %v3796_v15, %v3469_v61  ;;  %v3179_v57 = vsub.f32 %v2585_v52, %v2882_v58  ;;  %v2593_v56 = vadd.f32 0.5, %v2296_v32  ;;  %v1714_v27 = vmul.f32 0.5, %v1469_v12  ;;  %v2901_v12 = vld [vmem:[%s5609_s20 + $0x6b0] sm:$0xff] }
 0x2ef   : > { %v5157_v24 = vpop.eup %5156  ;;  %v2299_v26 = vmul.f32 0.5, %v5155_v50  ;;  %5162 = vtanh.f32 %v1722_v33  ;;  %v2349_v54 = vmul.f32 0.5, %v5151_v10  ;;  %v3189_v13 = vsub.f32 %v2595_v30, %v2892_v44 }
 0x2f0   : > { %v3895_v48 = vadd.f32 %v3862_v60, %v3829_v19  ;;  %v3476_v2 = vmul.f32 %v3179_v57, %v3179_v57  ;;  %v3187_v38 = vsub.f32 %v2593_v56, %v2890_v17  ;;  %v1237_v42 = vpop.f32.mrf.mxu2  ;;  %5164 = vtanh.f32 %v1714_v27 }
 0x2f1   : > { %v5159_v39 = vpop.eup %5158  ;;  %v2596_v37 = vadd.f32 0.5, %v2299_v26  ;;  %v1712_v9 = vmul.f32 0.5, %v1237_v42  ;;  %v3478_v47 = vmul.f32 %v3181_v1, %v3181_v1  ;;  %v2307_v43 = vmul.f32 0.5, %v5157_v24  ;;  %v2902_v26 = vld [vmem:[%s5609_s20 + $0x6b8] sm:$0xff]  ;;  %v2900_v42 = vld [vmem:[%s5609_s20 + $0x6a8] sm:$0xff] }
 0x2f2   : > { %3928 = vst [vmem:[#allocation2 + $0xd0] sm:$0xff] %v3895_v48  ;;  %v3764_v22 = vadd.f32 %v3731_v7, %v3476_v2  ;;  %v2297_v5 = vmul.f32 0.5, %v5159_v39  ;;  %v1124_v63 = vpop.f32.mrf.mxu1  ;;  %v3484_v11 = vmul.f32 %v3187_v38, %v3187_v38  ;;  %v1731_v34 = vmul.f32 0.5, %v1359_v35 }
 0x2f3   : > { %v5161_v3 = vpop.eup %5160  ;;  %5166 = vtanh.f32 %v1712_v9  ;;  %v1720_v45 = vmul.f32 0.5, %v1124_v63  ;;  %v1764_v59 = vmul.f32 0.5, %v6648_v36  ;;  %v1362_v46 = vpop.f32.mrf.mxu3  ;;  %v2646_v31 = vadd.f32 0.5, %v2349_v54  ;;  %v2943_v36 = vld [vmem:[%s5609_s20 + $0x800] sm:$0xff] }
 0x2f4   : > { %v3797_v18 = vadd.f32 %v3764_v22, %v3477_v29  ;;  %v2594_v0 = vadd.f32 0.5, %v2297_v5  ;;  %v2305_v10 = vmul.f32 0.5, %v5161_v3  ;;  %v3486_v28 = vmul.f32 %v3189_v13, %v3189_v13  ;;  %v3864_v22 = vld [vmem:[#allocation2 + $0x98] sm:$0xff] }
 0x2f5   : > { %v5163_v61 = vpop.eup %5162  ;;  %v3190_v23 = vsub.f32 %v2596_v37, %v2893_v40  ;;  %5168 = vtanh.f32 %v1720_v45  ;;  %v1472_v16 = vpop.f32.mrf.mxu0  ;;  %v3732_v32 = vadd.f32 %v7073_v21, %v3484_v11  ;;  %v2604_v35 = vadd.f32 0.5, %v2307_v43 }
 0x2f6   : > { %v5165_v58 = vpop.eup %5164  ;;  %v3830_v62 = vadd.f32 %v3797_v18, %v3478_v47  ;;  %v3188_v33 = vsub.f32 %v2594_v0, %v2891_v53  ;;  %v2602_v15 = vadd.f32 0.5, %v2305_v10  ;;  %v1723_v52 = vmul.f32 0.5, %v1472_v16  ;;  %v2908_v47 = vld [vmem:[%s5609_s20 + $0x6e8] sm:$0xff]  ;;  %v2910_v10 = vld [vmem:[%s5609_s20 + $0x6f8] sm:$0xff] }
 0x2f7   : > { %v2308_v60 = vmul.f32 0.5, %v5165_v58  ;;  %5170 = vtanh.f32 %v1731_v34  ;;  %v7156_v57 = vadd.f32 %v6636_v51, %v7128_v14  ;;  %v2316_v27 = vmul.f32 0.5, %v5163_v61 }
 0x2f8   : > { %v3896_v17 = vadd.f32 %v3863_v41, %v3830_v62  ;;  %v3485_v1 = vmul.f32 %v3188_v33, %v3188_v33  ;;  %v3196_v30 = vsub.f32 %v2602_v15, %v2899_v8  ;;  %v1240_v50 = vpop.f32.mrf.mxu2  ;;  %5172 = vtanh.f32 %v1723_v52 }
 0x2f9   : > { %v5167_v19 = vpop.eup %5166  ;;  %v2605_v56 = vadd.f32 0.5, %v2308_v60  ;;  %v1721_v44 = vmul.f32 0.5, %v1240_v50  ;;  %v3240_v21 = vsub.f32 %v2646_v31, %v2943_v36  ;;  %v3487_v7 = vmul.f32 %v3190_v23, %v3190_v23  ;;  %v2911_v36 = vld [vmem:[%s5609_s20 + $0x700] sm:$0xff] }
 0x2fa   : > { %3929 = vst [vmem:[#allocation2 + $0x20] sm:$0xff] %v3896_v17  ;;  %v3765_v24 = vadd.f32 %v3732_v32, %v3485_v1  ;;  %v2306_v29 = vmul.f32 0.5, %v5167_v19  ;;  %v1127_v48 = vpop.f32.mrf.mxu1  ;;  %v3493_v38 = vmul.f32 %v3196_v30, %v3196_v30  ;;  %v3198_v39 = vsub.f32 %v2604_v35, %v2901_v12  ;;  %v2909_v17 = vld [vmem:[%s5609_s20 + $0x6f0] sm:$0xff] }
 0x2fb   : > { %v5169_v2 = vpop.eup %5168  ;;  %5174 = vtanh.f32 %v1721_v44  ;;  %v1729_v54 = vmul.f32 0.5, %v1127_v48  ;;  %v1365_v37 = vpop.f32.mrf.mxu3  ;;  %v3199_v5 = vsub.f32 %v2605_v56, %v2902_v26  ;;  %v2613_v40 = vadd.f32 0.5, %v2316_v27 }
 0x2fc   : > { %5176 = vtanh.f32 %v1764_v59  ;;  %v3798_v51 = vadd.f32 %v3765_v24, %v3486_v28  ;;  %v2603_v14 = vadd.f32 0.5, %v2306_v29  ;;  %v2314_v13 = vmul.f32 0.5, %v5169_v2  ;;  %v2917_v24 = vld [vmem:[%s5609_s20 + $0x730] sm:$0xff] }
 0x2fd   : > { %v5171_v9 = vpop.eup %5170  ;;  %5178 = vtanh.f32 %v1729_v54  ;;  %v1475_v63 = vpop.f32.mrf.mxu0  ;;  %v1740_v43 = vmul.f32 0.5, %v1362_v46  ;;  %v7161_v18 = vmul.f32 %v3240_v21, %v3240_v21  ;;  %v3733_v59 = vadd.f32 %v7086_v6, %v3493_v38  ;;  %v3865_v21 = vld [vmem:[#allocation2 + $0x78] sm:$0xff] }
 0x2fe   : > { %v5173_v3 = vpop.eup %5172  ;;  %v3831_v11 = vadd.f32 %v3798_v51, %v3487_v7  ;;  %v3197_v53 = vsub.f32 %v2603_v14, %v2900_v42  ;;  %v2611_v45 = vadd.f32 0.5, %v2314_v13  ;;  %v1732_v34 = vmul.f32 0.5, %v1475_v63 }
 0x2ff   : > { %v3495_v0 = vmul.f32 %v3198_v39, %v3198_v39  ;;  %v2317_v61 = vmul.f32 0.5, %v5173_v3  ;;  %v2325_v58 = vmul.f32 0.5, %v5171_v9  ;;  %v3496_v15 = vmul.f32 %v3199_v5, %v3199_v5  ;;  %v2919_v39 = vld [vmem:[%s5609_s20 + $0x740] sm:$0xff] }
 0x300   : > { %v3897_v31 = vadd.f32 %v3864_v22, %v3831_v11  ;;  %v3494_v41 = vmul.f32 %v3197_v53, %v3197_v53  ;;  %v3205_v8 = vsub.f32 %v2611_v45, %v2908_v47  ;;  %v1243_v28 = vpop.f32.mrf.mxu2  ;;  %5180 = vtanh.f32 %v1732_v34  ;;  %v2952_v11 = vld [vmem:[%s5609_s20 + $0x848] sm:$0xff] }
 0x301   : > { %v5175_v46 = vpop.eup %5174  ;;  %v2614_v23 = vadd.f32 0.5, %v2317_v61  ;;  %v1730_v16 = vmul.f32 0.5, %v1243_v28  ;;  %5182 = vtanh.f32 %v1740_v43  ;;  %v3207_v52 = vsub.f32 %v2613_v40, %v2910_v10  ;;  %v2920_v34 = vld [vmem:[%s5609_s20 + $0x748] sm:$0xff] }
 0x302   : > { %v5177_v62 = vpop.eup %5176  ;;  %3930 = vst [vmem:[#allocation2 + $0x98] sm:$0xff] %v3897_v31  ;;  %v3766_v33 = vadd.f32 %v3733_v59, %v3494_v41  ;;  %v2315_v6 = vmul.f32 0.5, %v5175_v46  ;;  %v1130_v32 = vpop.f32.mrf.mxu1  ;;  %v3502_v60 = vmul.f32 %v3205_v8, %v3205_v8  ;;  %v1749_v30 = vmul.f32 0.5, %v1365_v37  ;;  %v2918_v31 = vld [vmem:[%s5609_s20 + $0x738] sm:$0xff] }
 0x303   : > { %v5179_v35 = vpop.eup %5178  ;;  %5184 = vtanh.f32 %v1730_v16  ;;  %v1738_v1 = vmul.f32 0.5, %v1130_v32  ;;  %v1773_v12 = vmul.f32 0.5, %v6676_v4  ;;  %v1368_v44 = vpop.f32.mrf.mxu3  ;;  %v2358_v27 = vmul.f32 0.5, %v5177_v62 }
 0x304   : > { %v3799_v50 = vadd.f32 %v3766_v33, %v3495_v0  ;;  %v2612_v19 = vadd.f32 0.5, %v2315_v6  ;;  %v2323_v56 = vmul.f32 0.5, %v5179_v35  ;;  %v3208_v7 = vsub.f32 %v2614_v23, %v2911_v36  ;;  %v3866_v33 = vld [vmem:[#allocation2 + $0xc8] sm:$0xff] }
 0x305   : > { %5186 = vtanh.f32 %v1738_v1  ;;  %v2622_v29 = vadd.f32 0.5, %v2325_v58  ;;  %v1478_v26 = vpop.f32.mrf.mxu0  ;;  %v3734_v51 = vadd.f32 %v7108_v25, %v3502_v60  ;;  %v3504_v14 = vmul.f32 %v3207_v52, %v3207_v52 }
 0x306   : > { %v5181_v48 = vpop.eup %5180  ;;  %v3832_v2 = vadd.f32 %v3799_v50, %v3496_v15  ;;  %v3206_v38 = vsub.f32 %v2612_v19, %v2909_v17  ;;  %v2620_v42 = vadd.f32 0.5, %v2323_v56  ;;  %v1741_v54 = vmul.f32 0.5, %v1478_v26  ;;  %v2926_v15 = vld [vmem:[%s5609_s20 + $0x778] sm:$0xff] }
 0x307   : > { %v5183_v4 = vpop.eup %5182  ;;  %v2326_v13 = vmul.f32 0.5, %v5181_v48  ;;  %5188 = vtanh.f32 %v1749_v30  ;;  %v2655_v40 = vadd.f32 0.5, %v2358_v27  ;;  %v3216_v63 = vsub.f32 %v2622_v29, %v2919_v39  ;;  %v2928_v27 = vld [vmem:[%s5609_s20 + $0x788] sm:$0xff] }
 0x308   : > { %v3898_v37 = vadd.f32 %v3865_v21, %v3832_v2  ;;  %v3503_v9 = vmul.f32 %v3206_v38, %v3206_v38  ;;  %v3214_v22 = vsub.f32 %v2620_v42, %v2917_v24  ;;  %v1246_v47 = vpop.f32.mrf.mxu2  ;;  %5190 = vtanh.f32 %v1741_v54  ;;  %v2929_v54 = vld [vmem:[%s5609_s20 + $0x790] sm:$0xff] }
 0x309   : > { %v5185_v5 = vpop.eup %5184  ;;  %v2623_v43 = vadd.f32 0.5, %v2326_v13  ;;  %v1739_v3 = vmul.f32 0.5, %v1246_v47  ;;  %v3505_v45 = vmul.f32 %v3208_v7, %v3208_v7  ;;  %v2334_v0 = vmul.f32 0.5, %v5183_v4  ;;  %v2927_v13 = vld [vmem:[%s5609_s20 + $0x780] sm:$0xff] }
 0x30a   : > { %3931 = vst [vmem:[#allocation2 + $0x78] sm:$0xff] %v3898_v37  ;;  %v3767_v53 = vadd.f32 %v3734_v51, %v3503_v9  ;;  %v2324_v25 = vmul.f32 0.5, %v5185_v5  ;;  %v1133_v59 = vpop.f32.mrf.mxu1  ;;  %v3511_v61 = vmul.f32 %v3214_v22, %v3214_v22  ;;  %v1758_v8 = vmul.f32 0.5, %v1368_v44 }
 0x30b   : > { %v5187_v10 = vpop.eup %5186  ;;  %5192 = vtanh.f32 %v1739_v3  ;;  %v1747_v41 = vmul.f32 0.5, %v1133_v59  ;;  %v1371_v16 = vpop.f32.mrf.mxu3  ;;  %v3249_v62 = vsub.f32 %v2655_v40, %v2952_v11  ;;  %v3513_v6 = vmul.f32 %v3216_v63, %v3216_v63  ;;  %v3867_v63 = vld [vmem:[#allocation2 + $0x8] sm:$0xff] }
 0x30c   : > { %5194 = vtanh.f32 %v1773_v12  ;;  %v3800_v28 = vadd.f32 %v3767_v53, %v3504_v14  ;;  %v2621_v46 = vadd.f32 0.5, %v2324_v25  ;;  %v2332_v23 = vmul.f32 0.5, %v5187_v10  ;;  %v2937_v10 = vld [vmem:[%s5609_s20 + $0x7d0] sm:$0xff] }
 0x30d   : > { %v5189_v58 = vpop.eup %5188  ;;  %v3217_v52 = vsub.f32 %v2623_v43, %v2920_v34  ;;  %5196 = vtanh.f32 %v1747_v41  ;;  %v1481_v36 = vpop.f32.mrf.mxu0  ;;  %v3735_v30 = vadd.f32 %v7140_v20, %v3511_v61  ;;  %v2631_v12 = vadd.f32 0.5, %v2334_v0  ;;  %v2935_v43 = vld [vmem:[%s5609_s20 + $0x7c0] sm:$0xff] }
 0x30e   : > { %v5191_v32 = vpop.eup %5190  ;;  %v3833_v35 = vadd.f32 %v3800_v28, %v3505_v45  ;;  %v3215_v60 = vsub.f32 %v2621_v46, %v2918_v31  ;;  %v2629_v17 = vadd.f32 0.5, %v2332_v23  ;;  %v1750_v1 = vmul.f32 0.5, %v1481_v36 }
 0x30f   : > { %v2335_v50 = vmul.f32 0.5, %v5191_v32  ;;  %5198 = vtanh.f32 %v1758_v8  ;;  %v7179_v7 = vadd.f32 %v6664_v49, %v7142_v55  ;;  %v2343_v48 = vmul.f32 0.5, %v5189_v58  ;;  %v7418_v55 = vld [vmem:[#allocation27_spill] sm:$0xff] }
 0x310   : > { %v3899_v19 = vadd.f32 %v3866_v33, %v3833_v35  ;;  %v3512_v56 = vmul.f32 %v3215_v60, %v3215_v60  ;;  %v3223_v44 = vsub.f32 %v2629_v17, %v2926_v15  ;;  %v1249_v21 = vpop.f32.mrf.mxu2  ;;  %5200 = vtanh.f32 %v1750_v1 }
 0x311   : > { %v5193_v24 = vpop.eup %5192  ;;  %v2632_v29 = vadd.f32 0.5, %v2335_v50  ;;  %v1748_v26 = vmul.f32 0.5, %v1249_v21  ;;  %v7181_v2 = vmul.f32 %v3249_v62, %v3249_v62  ;;  %v3514_v42 = vmul.f32 %v3217_v52, %v3217_v52 }
 0x312   : > { %v5195_v20 = vpop.eup %5194  ;;  %3932 = vst [vmem:[#allocation2 + $0xc8] sm:$0xff] %v3899_v19  ;;  %v3768_v38 = vadd.f32 %v3735_v30, %v3512_v56  ;;  %v2333_v39 = vmul.f32 0.5, %v5193_v24  ;;  %v1136_v4 = vpop.f32.mrf.mxu1  ;;  %v3520_v14 = vmul.f32 %v3223_v44, %v3223_v44  ;;  %v3225_v37 = vsub.f32 %v2631_v12, %v2928_v27  ;;  %v2936_v12 = vld [vmem:[%s5609_s20 + $0x7c8] sm:$0xff]  ;;  %v3868_v24 = vld [vmem:[#allocation2 + $0x10] sm:$0xff] }
 0x313   : > { %v5197_v51 = vpop.eup %5196  ;;  %5202 = vtanh.f32 %v1748_v26  ;;  %v1756_v49 = vmul.f32 0.5, %v1136_v4  ;;  %v1782_v9 = vmul.f32 0.5, %v7418_v55  ;;  %v3226_v3 = vsub.f32 %v2632_v29, %v2929_v54  ;;  %v1374_v31 = vpop.f32.mrf.mxu3  ;;  %v2944_v29 = vld [vmem:[%s5609_s20 + $0x808] sm:$0xff] }
 0x314   : > { %v3801_v22 = vadd.f32 %v3768_v38, %v3513_v6  ;;  %v2630_v47 = vadd.f32 0.5, %v2333_v39  ;;  %v2341_v5 = vmul.f32 0.5, %v5197_v51  ;;  %v2640_v11 = vadd.f32 0.5, %v2343_v48 }
 0x315   : > { %v5199_v40 = vpop.eup %5198  ;;  %5204 = vtanh.f32 %v1756_v49  ;;  %v1484_v53 = vpop.f32.mrf.mxu0  ;;  %v1767_v45 = vmul.f32 0.5, %v1371_v16  ;;  %v2367_v41 = vmul.f32 0.5, %v5195_v20  ;;  %v3736_v8 = vadd.f32 %v7156_v57, %v3520_v14  ;;  %v2938_v57 = vld [vmem:[%s5609_s20 + $0x7d8] sm:$0xff] }
 0x316   : > { %v5201_v25 = vpop.eup %5200  ;;  %v3834_v34 = vadd.f32 %v3801_v22, %v3514_v42  ;;  %v3224_v59 = vsub.f32 %v2630_v47, %v2927_v13  ;;  %v2638_v0 = vadd.f32 0.5, %v2341_v5  ;;  %v1759_v61 = vmul.f32 0.5, %v1484_v53  ;;  %v2961_v42 = vld [vmem:[%s5609_s20 + $0x890] sm:$0xff] }
 0x317   : > { %v3522_v28 = vmul.f32 %v3225_v37, %v3225_v37  ;;  %v2344_v46 = vmul.f32 0.5, %v5201_v25  ;;  %v3234_v15 = vsub.f32 %v2640_v11, %v2937_v10  ;;  %v2352_v36 = vmul.f32 0.5, %v5199_v40  ;;  %v2946_v37 = vld [vmem:[%s5609_s20 + $0x818] sm:$0xff]  ;;  %v2947_v10 = vld [vmem:[%s5609_s20 + $0x820] sm:$0xff] }
 0x318   : > { %v3900_v23 = vadd.f32 %v3867_v63, %v3834_v34  ;;  %v3521_v58 = vmul.f32 %v3224_v59, %v3224_v59  ;;  %v3232_v62 = vsub.f32 %v2638_v0, %v2935_v43  ;;  %v1252_v33 = vpop.f32.mrf.mxu2  ;;  %5206 = vtanh.f32 %v1759_v61  ;;  %v7419_v43 = vld [vmem:[#allocation20_spill] sm:$0xff] }
 0x319   : > { %v5203_v16 = vpop.eup %5202  ;;  %v2641_v6 = vadd.f32 0.5, %v2344_v46  ;;  %v1757_v52 = vmul.f32 0.5, %v1252_v33  ;;  %v3523_v35 = vmul.f32 %v3226_v3, %v3226_v3  ;;  %5208 = vtanh.f32 %v1767_v45 }
 0x31a   : > { %3933 = vst [vmem:[#allocation2 + $0x8] sm:$0xff] %v3900_v23  ;;  %v3769_v32 = vadd.f32 %v3736_v8, %v3521_v58  ;;  %v2342_v60 = vmul.f32 0.5, %v5203_v16  ;;  %v1139_v17 = vpop.f32.mrf.mxu1  ;;  %v3529_v30 = vmul.f32 %v3232_v62, %v3232_v62  ;;  %v1776_v19 = vmul.f32 0.5, %v1374_v31  ;;  %v2945_v8 = vld [vmem:[%s5609_s20 + $0x810] sm:$0xff] }
 0x31b   : > { %v5205_v1 = vpop.eup %5204  ;;  %5210 = vtanh.f32 %v1757_v52  ;;  %v1765_v50 = vmul.f32 0.5, %v1139_v17  ;;  %v2664_v21 = vadd.f32 0.5, %v2367_v41  ;;  %v3235_v26 = vsub.f32 %v2641_v6, %v2938_v57  ;;  %v1377_v40 = vpop.f32.mrf.mxu3  ;;  %v3869_v52 = vld [vmem:[#allocation2 + $0xe0] sm:$0xff] }
 0x31c   : > { %5212 = vtanh.f32 %v1782_v9  ;;  %v3802_v56 = vadd.f32 %v3769_v32, %v3522_v28  ;;  %v2639_v44 = vadd.f32 0.5, %v2342_v60  ;;  %v2350_v27 = vmul.f32 0.5, %v5205_v1 }
 0x31d   : > { %5214 = vtanh.f32 %v1765_v50  ;;  %v2649_v48 = vadd.f32 0.5, %v2352_v36  ;;  %v1487_v20 = vpop.f32.mrf.mxu0  ;;  %v3737_v14 = vadd.f32 %v7179_v7, %v3529_v30  ;;  %v3531_v13 = vmul.f32 %v3234_v15, %v3234_v15  ;;  %v7421_v15 = vld [vmem:[#allocation22_spill] sm:$0xff] }
 0x31e   : > { %v5207_v38 = vpop.eup %5206  ;;  %v3835_v39 = vadd.f32 %v3802_v56, %v3523_v35  ;;  %v3233_v54 = vsub.f32 %v2639_v44, %v2936_v12  ;;  %v2647_v4 = vadd.f32 0.5, %v2350_v27  ;;  %v1768_v51 = vmul.f32 0.5, %v1487_v20  ;;  %v2953_v36 = vld [vmem:[%s5609_s20 + $0x850] sm:$0xff] }
 0x31f   : > { %v2353_v49 = vmul.f32 0.5, %v5207_v38  ;;  %5216 = vtanh.f32 %v1776_v19  ;;  %v5209_v55 = vpop.eup %5208  ;;  %v3705_v3 = vadd.f32 %v7419_v43, %v7161_v18  ;;  %v7197_v11 = vsub.f32 %v2664_v21, %v2961_v42  ;;  %v7420_v18 = vld [vmem:[#allocation21_spill] sm:$0xff]  ;;  %v2962_v43 = vld [vmem:[%s5609_s20 + $0x898] sm:$0xff] }
 0x320   : > { %v3901_v9 = vadd.f32 %v3868_v24, %v3835_v39  ;;  %v3530_v22 = vmul.f32 %v3233_v54, %v3233_v54  ;;  %v3241_v47 = vsub.f32 %v2647_v4, %v2944_v29  ;;  %v1255_v5 = vpop.f32.mrf.mxu2  ;;  %5218 = vtanh.f32 %v1768_v51  ;;  %v2955_v24 = vld [vmem:[%s5609_s20 + $0x860] sm:$0xff]  ;;  %v2956_v51 = vld [vmem:[%s5609_s20 + $0x868] sm:$0xff] }
 0x321   : > { %v5211_v63 = vpop.eup %5210  ;;  %v2650_v7 = vadd.f32 0.5, %v2353_v49  ;;  %v1766_v53 = vmul.f32 0.5, %v1255_v5  ;;  %v3532_v34 = vmul.f32 %v3235_v26, %v3235_v26  ;;  %v3243_v0 = vsub.f32 %v2649_v48, %v2946_v37 }
 0x322   : > { %v5213_v45 = vpop.eup %5212  ;;  %3934 = vst [vmem:[#allocation2 + $0x10] sm:$0xff] %v3901_v9  ;;  %v3770_v25 = vadd.f32 %v3737_v14, %v3530_v22  ;;  %v2351_v59 = vmul.f32 0.5, %v5211_v63  ;;  %v1142_v61 = vpop.f32.mrf.mxu1  ;;  %v3538_v41 = vmul.f32 %v3241_v47, %v3241_v47  ;;  %v2361_v46 = vmul.f32 0.5, %v5209_v55  ;;  %v2954_v55 = vld [vmem:[%s5609_s20 + $0x858] sm:$0xff] }
 0x323   : > { %v5215_v31 = vpop.eup %5214  ;;  %5220 = vtanh.f32 %v1766_v53  ;;  %v1774_v28 = vmul.f32 0.5, %v1142_v61  ;;  %v7203_v23 = vadd.f32 %v7420_v18, %v7181_v2  ;;  %v1791_v6 = vmul.f32 0.5, %v7421_v15  ;;  %v3870_v63 = vld [vmem:[#allocation2 + $0x70] sm:$0xff] }
 0x324   : > { %v3803_v58 = vadd.f32 %v3770_v25, %v3531_v13  ;;  %v2648_v62 = vadd.f32 0.5, %v2351_v59  ;;  %v2359_v33 = vmul.f32 0.5, %v5215_v31  ;;  %v3244_v32 = vsub.f32 %v2650_v7, %v2947_v10  ;;  %v1380_v13 = vpop.f32.mrf.mxu3  ;;  %v2964_v10 = vld [vmem:[%s5609_s20 + $0x8a8] sm:$0xff] }
 0x325   : > { %v5217_v16 = vpop.eup %5216  ;;  %5222 = vtanh.f32 %v1774_v28  ;;  %v1490_v35 = vpop.f32.mrf.mxu0  ;;  %v1785_v60 = vmul.f32 0.5, %v1377_v40  ;;  %v3738_v2 = vadd.f32 %v3705_v3, %v3538_v41  ;;  %v3540_v50 = vmul.f32 %v3243_v0, %v3243_v0 }
 0x326   : > { %v5219_v57 = vpop.eup %5218  ;;  %v3836_v17 = vadd.f32 %v3803_v58, %v3532_v34  ;;  %v3242_v1 = vsub.f32 %v2648_v62, %v2945_v8  ;;  %v2656_v30 = vadd.f32 0.5, %v2359_v33  ;;  %v1777_v12 = vmul.f32 0.5, %v1490_v35 }
 0x327   : > { %v2658_v19 = vadd.f32 0.5, %v2361_v46  ;;  %v2362_v56 = vmul.f32 0.5, %v5219_v57  ;;  %v2376_v48 = vmul.f32 0.5, %v5213_v45  ;;  %v2370_v42 = vmul.f32 0.5, %v5217_v16 }
 0x328   : > { %v3902_v44 = vadd.f32 %v3869_v52, %v3836_v17  ;;  %v3539_v27 = vmul.f32 %v3242_v1, %v3242_v1  ;;  %v3250_v21 = vsub.f32 %v2656_v30, %v2953_v36  ;;  %v1258_v29 = vpop.f32.mrf.mxu2  ;;  %5224 = vtanh.f32 %v1777_v12  ;;  %v2965_v17 = vld [vmem:[%s5609_s20 + $0x8b0] sm:$0xff] }
 0x329   : > { %v5221_v26 = vpop.eup %5220  ;;  %v2659_v20 = vadd.f32 0.5, %v2362_v56  ;;  %v1775_v38 = vmul.f32 0.5, %v1258_v29  ;;  %v3541_v54 = vmul.f32 %v3244_v32, %v3244_v32  ;;  %5226 = vtanh.f32 %v1785_v60 }
 0x32a   : > { %3935 = vst [vmem:[#allocation2 + $0xe0] sm:$0xff] %v3902_v44  ;;  %v3771_v39 = vadd.f32 %v3738_v2, %v3539_v27  ;;  %v2360_v4 = vmul.f32 0.5, %v5221_v26  ;;  %v1145_v14 = vpop.f32.mrf.mxu1  ;;  %v3547_v49 = vmul.f32 %v3250_v21, %v3250_v21  ;;  %v3252_v9 = vsub.f32 %v2658_v19, %v2955_v24  ;;  %v2963_v2 = vld [vmem:[%s5609_s20 + $0x8a0] sm:$0xff]  ;;  %v7422_v21 = vld [vmem:[#allocation23_spill] sm:$0xff]  ;;  %v3871_v26 = vld [vmem:[#allocation2 + $0xa8] sm:$0xff] }
 0x32b   : > { %v5223_v37 = vpop.eup %5222  ;;  %5228 = vtanh.f32 %v1775_v38  ;;  %v1783_v22 = vmul.f32 0.5, %v1145_v14  ;;  %v3253_v3 = vsub.f32 %v2659_v20, %v2956_v51  ;;  %v2667_v7 = vadd.f32 0.5, %v2370_v42 }
 0x32c   : > { %5230 = vtanh.f32 %v1791_v6  ;;  %v3804_v47 = vadd.f32 %v3771_v39, %v3540_v50  ;;  %v2657_v5 = vadd.f32 0.5, %v2360_v4  ;;  %v2368_v40 = vmul.f32 0.5, %v5223_v37  ;;  %v2970_v6 = vld [vmem:[%s5609_s20 + $0x8d8] sm:$0xff] }
 0x32d   : > { %5232 = vtanh.f32 %v1783_v22  ;;  %v1493_v53 = vpop.f32.mrf.mxu0  ;;  %v1794_v45 = vmul.f32 0.5, %v1380_v13  ;;  %v2673_v31 = vadd.f32 0.5, %v2376_v48  ;;  %v3739_v41 = vadd.f32 %v7203_v23, %v3547_v49  ;;  %v2971_v48 = vld [vmem:[%s5609_s20 + $0x8e0] sm:$0xff] }
 0x32e   : > { %v5225_v25 = vpop.eup %5224  ;;  %v3837_v34 = vadd.f32 %v3804_v47, %v3541_v54  ;;  %v3251_v59 = vsub.f32 %v2657_v5, %v2954_v55  ;;  %v2665_v0 = vadd.f32 0.5, %v2368_v40  ;;  %v1786_v61 = vmul.f32 0.5, %v1493_v53  ;;  %v2973_v5 = vld [vmem:[%s5609_s20 + $0x8f0] sm:$0xff]  ;;  %v2979_v53 = vld [vmem:[%s5609_s20 + $0x920] sm:$0xff] }
 0x32f   : > { %v3549_v8 = vmul.f32 %v3252_v9, %v3252_v9  ;;  %v2371_v28 = vmul.f32 0.5, %v5225_v25  ;;  %v5227_v46 = vpop.eup %5226  ;;  %v3555_v15 = vmul.f32 %v7197_v11, %v7197_v11  ;;  %v3261_v52 = vsub.f32 %v2667_v7, %v2964_v10  ;;  %v2972_v10 = vld [vmem:[%s5609_s20 + $0x8e8] sm:$0xff] }
 0x330   : > { %v3903_v18 = vadd.f32 %v3870_v63, %v3837_v34  ;;  %v3548_v58 = vmul.f32 %v3251_v59, %v3251_v59  ;;  %v3259_v62 = vsub.f32 %v2665_v0, %v2962_v43  ;;  %v1261_v33 = vpop.f32.mrf.mxu2  ;;  %5234 = vtanh.f32 %v1786_v61 }
 0x331   : > { %v5229_v16 = vpop.eup %5228  ;;  %v2668_v36 = vadd.f32 0.5, %v2371_v28  ;;  %v1784_v32 = vmul.f32 0.5, %v1261_v33  ;;  %v3550_v60 = vmul.f32 %v3253_v3, %v3253_v3  ;;  %5236 = vtanh.f32 %v1794_v45 }
 0x332   : > { %v5231_v35 = vpop.eup %5230  ;;  %3936 = vst [vmem:[#allocation2 + $0x70] sm:$0xff] %v3903_v18  ;;  %v3772_v23 = vadd.f32 %v3739_v41, %v3548_v58  ;;  %v2369_v57 = vmul.f32 0.5, %v5229_v16  ;;  %v1148_v1 = vpop.f32.mrf.mxu1  ;;  %v3556_v12 = vmul.f32 %v3259_v62, %v3259_v62  ;;  %v2379_v19 = vmul.f32 0.5, %v5227_v46  ;;  %v7423_v58 = vld [vmem:[#allocation29_spill] sm:$0xff]  ;;  %v3872_v16 = vld [vmem:[#allocation2 + $0x58] sm:$0xff] }
 0x333   : > { %v5233_v30 = vpop.eup %5232  ;;  %5238 = vtanh.f32 %v1784_v32  ;;  %v1792_v50 = vmul.f32 0.5, %v1148_v1  ;;  %v3267_v11 = vsub.f32 %v2673_v31, %v2970_v6  ;;  %v3707_v24 = vadd.f32 %v7422_v21, %v3555_v15  ;;  %v2974_v31 = vld [vmem:[%s5609_s20 + $0x8f8] sm:$0xff]  ;;  %v2980_v15 = vld [vmem:[%s5609_s20 + $0x928] sm:$0xff]  ;;  %v2981_v21 = vld [vmem:[%s5609_s20 + $0x930] sm:$0xff] }
 0x334   : > { %v3805_v56 = vadd.f32 %v3772_v23, %v3549_v8  ;;  %v2666_v44 = vadd.f32 0.5, %v2369_v57  ;;  %v2377_v27 = vmul.f32 0.5, %v5233_v30  ;;  %v2385_v29 = vmul.f32 0.5, %v5231_v35 }
 0x335   : > { %v3262_v20 = vsub.f32 %v2668_v36, %v2965_v17  ;;  %5240 = vtanh.f32 %v1792_v50  ;;  %v1496_v38 = vpop.f32.mrf.mxu0  ;;  %v3740_v14 = vadd.f32 %v3707_v24, %v3556_v12  ;;  %v3558_v13 = vmul.f32 %v3261_v52, %v3261_v52  ;;  %v2983_v24 = vld [vmem:[%s5609_s20 + $0x940] sm:$0xff] }
 0x336   : > { %v5235_v42 = vpop.eup %5234  ;;  %v3838_v39 = vadd.f32 %v3805_v56, %v3550_v60  ;;  %v3260_v54 = vsub.f32 %v2666_v44, %v2963_v2  ;;  %v2674_v4 = vadd.f32 0.5, %v2377_v27  ;;  %v1795_v51 = vmul.f32 0.5, %v1496_v38  ;;  %v3873_v38 = vld [vmem:[#allocation2 + $0xf0] sm:$0xff] }
 0x337   : > { %v2676_v37 = vadd.f32 0.5, %v2379_v19  ;;  %v2380_v49 = vmul.f32 0.5, %v5235_v42  ;;  %v5237_v55 = vpop.eup %5236  ;;  %v3564_v43 = vmul.f32 %v3267_v11, %v3267_v11  ;;  %v2682_v3 = vadd.f32 0.5, %v2385_v29  ;;  %v2982_v19 = vld [vmem:[%s5609_s20 + $0x938] sm:$0xff] }
 0x338   : > { %v3904_v9 = vadd.f32 %v3871_v26, %v3838_v39  ;;  %v3557_v22 = vmul.f32 %v3260_v54, %v3260_v54  ;;  %v3268_v47 = vsub.f32 %v2674_v4, %v2971_v48  ;;  %v1264_v40 = vpop.f32.mrf.mxu2  ;;  %5242 = vtanh.f32 %v1795_v51  ;;  %v7424_v42 = vld [vmem:[#allocation31_spill] sm:$0xff] }
 0x339   : > { %v5239_v63 = vpop.eup %5238  ;;  %v1793_v7 = vmul.f32 0.5, %v1264_v40  ;;  %v3559_v25 = vmul.f32 %v3262_v20, %v3262_v20  ;;  %v2677_v59 = vadd.f32 0.5, %v2380_v49  ;;  %v3270_v61 = vsub.f32 %v2676_v37, %v2973_v5 }
 0x33a   : > { %3937 = vst [vmem:[#allocation2 + $0xa8] sm:$0xff] %v3904_v9  ;;  %v3773_v45 = vadd.f32 %v3740_v14, %v3557_v22  ;;  %v2378_v34 = vmul.f32 0.5, %v5239_v63  ;;  %v2388_v41 = vmul.f32 0.5, %v5237_v55  ;;  %v3565_v8 = vmul.f32 %v3268_v47, %v3268_v47  ;;  %v3874_v47 = vld [vmem:[#allocation2 + $0xa0] sm:$0xff] }
 0x33b   : > { %v5241_v0 = vpop.eup %5240  ;;  %5244 = vtanh.f32 %v1793_v7  ;;  %v3708_v62 = vadd.f32 %v7423_v58, %v3564_v43  ;;  %v3276_v33 = vsub.f32 %v2682_v3, %v2979_v53  ;;  %v3271_v35 = vsub.f32 %v2677_v59, %v2974_v31 }
 0x33c   : > { %v3806_v28 = vadd.f32 %v3773_v45, %v3558_v13  ;;  %v2675_v46 = vadd.f32 0.5, %v2378_v34  ;;  %v2386_v18 = vmul.f32 0.5, %v5241_v0  ;;  %v3567_v23 = vmul.f32 %v3270_v61, %v3270_v61 }
 0x33d   : > { %v2685_v60 = vadd.f32 0.5, %v2388_v41  ;;  %v3741_v17 = vadd.f32 %v3708_v62, %v3565_v8  ;;  %v3573_v50 = vmul.f32 %v3276_v33, %v3276_v33  ;;  %v3568_v56 = vmul.f32 %v3271_v35, %v3271_v35 }
 0x33e   : > { %v5243_v6 = vpop.eup %5242  ;;  %v3839_v52 = vadd.f32 %v3806_v28, %v3559_v25  ;;  %v3269_v36 = vsub.f32 %v2675_v46, %v2972_v10  ;;  %v2683_v32 = vadd.f32 0.5, %v2386_v18 }
 0x33f   : > { %v2389_v57 = vmul.f32 0.5, %v5243_v6  ;;  %v3279_v20 = vsub.f32 %v2685_v60, %v2982_v19  ;;  %v3709_v39 = vadd.f32 %v7424_v42, %v3573_v50 }
 0x340   : > { %v3905_v1 = vadd.f32 %v3872_v16, %v3839_v52  ;;  %v3566_v30 = vmul.f32 %v3269_v36, %v3269_v36  ;;  %v3277_v12 = vsub.f32 %v2683_v32, %v2980_v15 }
 0x341   : > { %v5245_v2 = vpop.eup %5244  ;;  %v2686_v27 = vadd.f32 0.5, %v2389_v57  ;;  %v3576_v49 = vmul.f32 %v3279_v20, %v3279_v20 }
 0x342   : > { %3938 = vst [vmem:[#allocation2 + $0x58] sm:$0xff] %v3905_v1  ;;  %v3774_v11 = vadd.f32 %v3741_v17, %v3566_v30  ;;  %v2387_v44 = vmul.f32 0.5, %v5245_v2  ;;  %v3574_v29 = vmul.f32 %v3277_v12, %v3277_v12 }
 0x343   : > { %v3280_v51 = vsub.f32 %v2686_v27, %v2983_v24 }
 0x344   : > { %v3807_v26 = vadd.f32 %v3774_v11, %v3567_v23  ;;  %v2684_v48 = vadd.f32 0.5, %v2387_v44  ;;  %v3742_v14 = vadd.f32 %v3709_v39, %v3574_v29 }
 0x345   : > { %v3577_v9 = vmul.f32 %v3280_v51, %v3280_v51 }
 0x346   : > { %v3840_v54 = vadd.f32 %v3807_v26, %v3568_v56  ;;  %v3278_v4 = vsub.f32 %v2684_v48, %v2981_v21 }
 0x348   : > { %v3906_v13 = vadd.f32 %v3873_v38, %v3840_v54  ;;  %v3575_v37 = vmul.f32 %v3278_v4, %v3278_v4 }
 0x34a   : > { %3939 = vst [vmem:[#allocation2 + $0xf0] sm:$0xff] %v3906_v13  ;;  %v3775_v55 = vadd.f32 %v3742_v14, %v3575_v37 }
 0x34c   : > { %v3808_v22 = vadd.f32 %v3775_v55, %v3576_v49 }
 0x34e   : > { %v3841_v5 = vadd.f32 %v3808_v22, %v3577_v9  ;;  %3944 = sbr.rel (%p4535_p8) target bundleno = 1053 (0x41d), region = 48 }
 0x350   : > { %v3907_v40 = vadd.f32 %v3874_v47, %v3841_v5 }
 0x352   : > { %3940 = vst [vmem:[#allocation2 + $0xa0] sm:$0xff] %v3907_v40 }
 0x353   : > { %v3949_v63 = vld [vmem:[#allocation2 + $0x50] sm:$0xff]  ;;  %v3947_v43 = vld [vmem:[#allocation2 + $0xd8] sm:$0xff]  ;;  %v3950_v7 = vld [vmem:[#allocation2 + $0x68] sm:$0xff]  ;;  %vm4077_vm1 = vcmask 7168  }
 0x354   : > { %v3945_v3 = vld [vmem:[#allocation2 + $0xb0] sm:$0xff]  ;;  %3986 = vadd.xlane.f32.xlu2 %v3949_v63  ;;  %3982 = vadd.xlane.f32.xlu1 %v3947_v43  ;;  %v3948_v53 = vld [vmem:[#allocation2 + $0x18] sm:$0xff]  ;;  %v3946_v45 = vld [vmem:[#allocation2] sm:$0xff] }
 0x355   : > { %3978 = vadd.xlane.f32.xlu0 %v3945_v3  ;;  %v3953_v25 = vld [vmem:[#allocation2 + $0x80] sm:$0xff]  ;;  %v3952_v34 = vld [vmem:[#allocation2 + $0x48] sm:$0xff]  ;;  %v3951_v59 = vld [vmem:[#allocation2 + $0x30] sm:$0xff] }
 0x356   : > { %v3956_v0 = vld [vmem:[#allocation2 + $0x100] sm:$0xff]  ;;  %v3955_v10 = vld [vmem:[#allocation2 + $0xe8] sm:$0xff]  ;;  %v3959_v31 = vld [vmem:[#allocation2 + $0xf8] sm:$0xff] }
 0x357   : > { %v3954_v61 = vld [vmem:[#allocation2 + $0x88] sm:$0xff]  ;;  %v3957_v8 = vld [vmem:[#allocation2 + $0xc0] sm:$0xff]  ;;  %v3962_v28 = vld [vmem:[#allocation2 + $0x90] sm:$0xff] }
 0x358   : > { %v3958_v41 = vld [vmem:[#allocation2 + $0x28] sm:$0xff]  ;;  %v3961_v46 = vld [vmem:[#allocation2 + $0x40] sm:$0xff]  ;;  %v3960_v18 = vld [vmem:[#allocation2 + $0xb8] sm:$0xff] }
 0x359   : > { %v3965_v58 = vld [vmem:[#allocation2 + $0xd0] sm:$0xff]  ;;  %v3964_v62 = vld [vmem:[#allocation2 + $0x38] sm:$0xff]  ;;  %v3963_v33 = vld [vmem:[#allocation2 + $0x60] sm:$0xff] }
 0x35a   : > { %v3968_v16 = vld [vmem:[#allocation2 + $0x78] sm:$0xff]  ;;  %v3966_v6 = vld [vmem:[#allocation2 + $0x20] sm:$0xff]  ;;  %v3971_v52 = vld [vmem:[#allocation2 + $0x10] sm:$0xff] }
 0x35b   : > { %v3967_v15 = vld [vmem:[#allocation2 + $0x98] sm:$0xff]  ;;  %v3970_v36 = vld [vmem:[#allocation2 + $0x8] sm:$0xff]  ;;  %v3973_v23 = vld [vmem:[#allocation2 + $0x70] sm:$0xff] }
 0x35c   : > { %3988 = vadd.xlane.f32.xlu2 %v3950_v7  ;;  %3984 = vadd.xlane.f32.xlu1 %v3948_v53  ;;  %v3969_v32 = vld [vmem:[#allocation2 + $0xc8] sm:$0xff]  ;;  %v3972_v60 = vld [vmem:[#allocation2 + $0xe0] sm:$0xff]  ;;  %v3976_v17 = vld [vmem:[#allocation2 + $0xf0] sm:$0xff] }
 0x35d   : > { %3980 = vadd.xlane.f32.xlu0 %v3946_v45  ;;  %v3974_v35 = vld [vmem:[#allocation2 + $0xa8] sm:$0xff]  ;;  %v3977_v57 = vld [vmem:[#allocation2 + $0xa0] sm:$0xff]  ;;  %v3975_v1 = vld [vmem:[#allocation2 + $0x58] sm:$0xff] }
 0x364   : > { %3994 = vadd.xlane.f32.xlu2 %v3953_v25  ;;  %3992 = vadd.xlane.f32.xlu1 %v3952_v34 }
 0x365   : > { %3990 = vadd.xlane.f32.xlu0 %v3951_v59 }
 0x36c   : > { %4000 = vadd.xlane.f32.xlu2 %v3956_v0  ;;  %3998 = vadd.xlane.f32.xlu1 %v3955_v10 }
 0x36d   : > { %3996 = vadd.xlane.f32.xlu0 %v3954_v61 }
 0x374   : > { %4006 = vadd.xlane.f32.xlu2 %v3959_v31  ;;  %4004 = vadd.xlane.f32.xlu1 %v3958_v41 }
 0x375   : > { %4002 = vadd.xlane.f32.xlu0 %v3957_v8 }
 0x37c   : > { %4012 = vadd.xlane.f32.xlu2 %v3962_v28  ;;  %4010 = vadd.xlane.f32.xlu1 %v3961_v46 }
 0x37d   : > { %4008 = vadd.xlane.f32.xlu0 %v3960_v18 }
 0x384   : > { %4018 = vadd.xlane.f32.xlu2 %v3965_v58  ;;  %4016 = vadd.xlane.f32.xlu1 %v3964_v62 }
 0x385   : > { %4014 = vadd.xlane.f32.xlu0 %v3963_v33 }
 0x38c   : > { %4024 = vadd.xlane.f32.xlu2 %v3968_v16  ;;  %4022 = vadd.xlane.f32.xlu1 %v3967_v15 }
 0x38d   : > { %4020 = vadd.xlane.f32.xlu0 %v3966_v6 }
 0x394   : > { %4030 = vadd.xlane.f32.xlu2 %v3971_v52  ;;  %4028 = vadd.xlane.f32.xlu1 %v3970_v36 }
 0x395   : > { %4026 = vadd.xlane.f32.xlu0 %v3969_v32 }
 0x39c   : > { %4036 = vadd.xlane.f32.xlu2 %v3974_v35  ;;  %4034 = vadd.xlane.f32.xlu1 %v3973_v23 }
 0x39d   : > { %4032 = vadd.xlane.f32.xlu0 %v3972_v60 }
 0x3a4   : > { %4042 = vadd.xlane.f32.xlu2 %v3977_v57  ;;  %4040 = vadd.xlane.f32.xlu1 %v3976_v17 }
 0x3a5   : > { %4038 = vadd.xlane.f32.xlu0 %v3975_v1 }
 0x3c7   : > { %v3987_v30 = vpop.xlane.xlu2 %3986  ;;  %v3983_v12 = vpop.xlane.xlu1 %3982 }
 0x3c8   : > { %v4048_v2 = vmul.f32 0.00045454546, %v3987_v30  ;;  %v4046_v50 = vmul.f32 0.00045454546, %v3983_v12  ;;  %v3979_v19 = vpop.xlane.xlu0 %3978 }
 0x3c9   : > { %v4044_v11 = vmul.f32 0.00045454546, %v3979_v19 }
 0x3ca   : > { %4082 = vst.msk [vmem:[%s5624_s27 + $0x20] sm:$0xff] %vm4077_vm1, %v4048_v2 }
 0x3cb   : > { %4080 = vst.msk [vmem:[%s5624_s27 + $0x10] sm:$0xff] %vm4077_vm1, %v4046_v50 }
 0x3cc   : > { %4078 = vst.msk [vmem:[%s5624_s27] sm:$0xff] %vm4077_vm1, %v4044_v11 }
 0x3cf   : > { %v3989_v56 = vpop.xlane.xlu2 %3988  ;;  %v3985_v44 = vpop.xlane.xlu1 %3984 }
 0x3d0   : > { %v4049_v27 = vmul.f32 0.00045454546, %v3989_v56  ;;  %v4047_v21 = vmul.f32 0.00045454546, %v3985_v44  ;;  %v3981_v24 = vpop.xlane.xlu0 %3980 }
 0x3d1   : > { %v4045_v29 = vmul.f32 0.00045454546, %v3981_v24 }
 0x3d2   : > { %4083 = vst.msk [vmem:[%s5624_s27 + $0x28] sm:$0xff] %vm4077_vm1, %v4049_v27 }
 0x3d3   : > { %4081 = vst.msk [vmem:[%s5624_s27 + $0x18] sm:$0xff] %vm4077_vm1, %v4047_v21 }
 0x3d4   : > { %4079 = vst.msk [vmem:[%s5624_s27 + $0x8] sm:$0xff] %vm4077_vm1, %v4045_v29 }
 0x3d7   : > { %v3995_v26 = vpop.xlane.xlu2 %3994  ;;  %v3993_v48 = vpop.xlane.xlu1 %3992 }
 0x3d8   : > { %v4052_v20 = vmul.f32 0.00045454546, %v3995_v26  ;;  %v4051_v38 = vmul.f32 0.00045454546, %v3993_v48  ;;  %v3991_v42 = vpop.xlane.xlu0 %3990 }
 0x3d9   : > { %v4050_v39 = vmul.f32 0.00045454546, %v3991_v42 }
 0x3da   : > { %4086 = vst.msk [vmem:[%s5624_s27 + $0x40] sm:$0xff] %vm4077_vm1, %v4052_v20 }
 0x3db   : > { %4085 = vst.msk [vmem:[%s5624_s27 + $0x38] sm:$0xff] %vm4077_vm1, %v4051_v38 }
 0x3dc   : > { %4084 = vst.msk [vmem:[%s5624_s27 + $0x30] sm:$0xff] %vm4077_vm1, %v4050_v39 }
 0x3df   : > { %v4001_v54 = vpop.xlane.xlu2 %4000  ;;  %v3999_v4 = vpop.xlane.xlu1 %3998 }
 0x3e0   : > { %v4055_v51 = vmul.f32 0.00045454546, %v4001_v54  ;;  %v4054_v14 = vmul.f32 0.00045454546, %v3999_v4  ;;  %v3997_v13 = vpop.xlane.xlu0 %3996 }
 0x3e1   : > { %v4053_v37 = vmul.f32 0.00045454546, %v3997_v13 }
 0x3e2   : > { %4089 = vst.msk [vmem:[%s5624_s27 + $0x58] sm:$0xff] %vm4077_vm1, %v4055_v51 }
 0x3e3   : > { %4088 = vst.msk [vmem:[%s5624_s27 + $0x50] sm:$0xff] %vm4077_vm1, %v4054_v14 }
 0x3e4   : > { %4087 = vst.msk [vmem:[%s5624_s27 + $0x48] sm:$0xff] %vm4077_vm1, %v4053_v37 }
 0x3e7   : > { %v4007_v49 = vpop.xlane.xlu2 %4006  ;;  %v4005_v55 = vpop.xlane.xlu1 %4004 }
 0x3e8   : > { %v4058_v9 = vmul.f32 0.00045454546, %v4007_v49  ;;  %v4057_v22 = vmul.f32 0.00045454546, %v4005_v55  ;;  %v4003_v47 = vpop.xlane.xlu0 %4002 }
 0x3e9   : > { %v4056_v5 = vmul.f32 0.00045454546, %v4003_v47 }
 0x3ea   : > { %4092 = vst.msk [vmem:[%s5624_s27 + $0x70] sm:$0xff] %vm4077_vm1, %v4058_v9 }
 0x3eb   : > { %4091 = vst.msk [vmem:[%s5624_s27 + $0x68] sm:$0xff] %vm4077_vm1, %v4057_v22 }
 0x3ec   : > { %4090 = vst.msk [vmem:[%s5624_s27 + $0x60] sm:$0xff] %vm4077_vm1, %v4056_v5 }
 0x3ef   : > { %v4013_v40 = vpop.xlane.xlu2 %4012  ;;  %v4011_v63 = vpop.xlane.xlu1 %4010 }
 0x3f0   : > { %v4061_v43 = vmul.f32 0.00045454546, %v4013_v40  ;;  %v4060_v3 = vmul.f32 0.00045454546, %v4011_v63  ;;  %v4009_v7 = vpop.xlane.xlu0 %4008 }
 0x3f1   : > { %v4059_v53 = vmul.f32 0.00045454546, %v4009_v7 }
 0x3f2   : > { %4095 = vst.msk [vmem:[%s5624_s27 + $0x88] sm:$0xff] %vm4077_vm1, %v4061_v43 }
 0x3f3   : > { %4094 = vst.msk [vmem:[%s5624_s27 + $0x80] sm:$0xff] %vm4077_vm1, %v4060_v3 }
 0x3f4   : > { %4093 = vst.msk [vmem:[%s5624_s27 + $0x78] sm:$0xff] %vm4077_vm1, %v4059_v53 }
 0x3f7   : > { %v4019_v45 = vpop.xlane.xlu2 %4018  ;;  %v4017_v25 = vpop.xlane.xlu1 %4016 }
 0x3f8   : > { %v4064_v34 = vmul.f32 0.00045454546, %v4019_v45  ;;  %v4063_v59 = vmul.f32 0.00045454546, %v4017_v25  ;;  %v4015_v0 = vpop.xlane.xlu0 %4014 }
 0x3f9   : > { %v4062_v10 = vmul.f32 0.00045454546, %v4015_v0 }
 0x3fa   : > { %4098 = vst.msk [vmem:[%s5624_s27 + $0xa0] sm:$0xff] %vm4077_vm1, %v4064_v34 }
 0x3fb   : > { %4097 = vst.msk [vmem:[%s5624_s27 + $0x98] sm:$0xff] %vm4077_vm1, %v4063_v59 }
 0x3fc   : > { %4096 = vst.msk [vmem:[%s5624_s27 + $0x90] sm:$0xff] %vm4077_vm1, %v4062_v10 }
 0x3ff   : > { %v4025_v61 = vpop.xlane.xlu2 %4024  ;;  %v4023_v31 = vpop.xlane.xlu1 %4022 }
 0x400   : > { %v4067_v41 = vmul.f32 0.00045454546, %v4025_v61  ;;  %v4066_v8 = vmul.f32 0.00045454546, %v4023_v31  ;;  %v4021_v28 = vpop.xlane.xlu0 %4020 }
 0x401   : > { %v4065_v46 = vmul.f32 0.00045454546, %v4021_v28 }
 0x402   : > { %4101 = vst.msk [vmem:[%s5624_s27 + $0xb8] sm:$0xff] %vm4077_vm1, %v4067_v41 }
 0x403   : > { %4100 = vst.msk [vmem:[%s5624_s27 + $0xb0] sm:$0xff] %vm4077_vm1, %v4066_v8 }
 0x404   : > { %4099 = vst.msk [vmem:[%s5624_s27 + $0xa8] sm:$0xff] %vm4077_vm1, %v4065_v46 }
 0x407   : > { %v4031_v18 = vpop.xlane.xlu2 %4030  ;;  %v4029_v58 = vpop.xlane.xlu1 %4028 }
 0x408   : > { %v4070_v62 = vmul.f32 0.00045454546, %v4031_v18  ;;  %v4069_v33 = vmul.f32 0.00045454546, %v4029_v58  ;;  %v4027_v16 = vpop.xlane.xlu0 %4026 }
 0x409   : > { %v4068_v15 = vmul.f32 0.00045454546, %v4027_v16 }
 0x40a   : > { %4104 = vst.msk [vmem:[%s5624_s27 + $0xd0] sm:$0xff] %vm4077_vm1, %v4070_v62 }
 0x40b   : > { %4103 = vst.msk [vmem:[%s5624_s27 + $0xc8] sm:$0xff] %vm4077_vm1, %v4069_v33 }
 0x40c   : > { %4102 = vst.msk [vmem:[%s5624_s27 + $0xc0] sm:$0xff] %vm4077_vm1, %v4068_v15 }
 0x40f   : > { %v4037_v6 = vpop.xlane.xlu2 %4036  ;;  %v4035_v52 = vpop.xlane.xlu1 %4034 }
 0x410   : > { %v4073_v36 = vmul.f32 0.00045454546, %v4037_v6  ;;  %v4072_v32 = vmul.f32 0.00045454546, %v4035_v52  ;;  %v4033_v35 = vpop.xlane.xlu0 %4032 }
 0x411   : > { %v4071_v23 = vmul.f32 0.00045454546, %v4033_v35 }
 0x412   : > { %4107 = vst.msk [vmem:[%s5624_s27 + $0xe8] sm:$0xff] %vm4077_vm1, %v4073_v36 }
 0x413   : > { %4106 = vst.msk [vmem:[%s5624_s27 + $0xe0] sm:$0xff] %vm4077_vm1, %v4072_v32 }
 0x414   : > { %4105 = vst.msk [vmem:[%s5624_s27 + $0xd8] sm:$0xff] %vm4077_vm1, %v4071_v23 }
 0x417   : > { %v4043_v60 = vpop.xlane.xlu2 %4042  ;;  %v4041_v57 = vpop.xlane.xlu1 %4040 }
 0x418   : > { %v4076_v17 = vmul.f32 0.00045454546, %v4043_v60  ;;  %v4075_v1 = vmul.f32 0.00045454546, %v4041_v57  ;;  %v4039_v30 = vpop.xlane.xlu0 %4038 }
 0x419   : > { %v4074_v12 = vmul.f32 0.00045454546, %v4039_v30 }
 0x41a   : > { %4110 = vst.msk [vmem:[%s5624_s27 + $0x100] sm:$0xff] %vm4077_vm1, %v4076_v17 }
 0x41b   : > { %4109 = vst.msk [vmem:[%s5624_s27 + $0xf8] sm:$0xff] %vm4077_vm1, %v4075_v1 }
 0x41c   : > { %4108 = vst.msk [vmem:[%s5624_s27 + $0xf0] sm:$0xff] %vm4077_vm1, %v4074_v12 }
 0x41d PF: > { %s19_s22 = sadd.s32 1, %s5440_s22   ;;  %s7425_s18 = sld [smem:[#allocation13_spill]] }
 0x41e   : > { %p16_p9 = scmp.ge.s32.totalorder %s19_s22, 6   ;;  %s7426_s19 = sld [smem:[#allocation9_spill]] }
 0x41f   : > { %s7427_s9 = sld [smem:[#allocation10_spill]]  ;;  %s7430_s12 = smov %s5404_s13 }
 0x420   : > { %s7428_s20 = sld [smem:[#allocation11_spill]]  ;;  %s7431_s13 = smov %s5408_s14 }
 0x421   : > { %s7429_s21 = sld [smem:[#allocation12_spill]]  ;;  %s7432_s14 = smov %s5555_s7 }
 0x422   : > { %s7433_s15 = smov %s5416_s16  ;;  %s7434_s16 = smov %s5420_s17 }
 0x423   : > { %s7435_s17 = smov %s7425_s18  ;;  %18 = sbr.rel (!%p16_p9) target bundleno = 11 (0xb), region = 96 }
 0x424   : > { %s7436_s18 = smov %s7426_s19 }
 0x425   : > { %s7437_s19 = smov %s7427_s9 }
 0x428   :  { %4133 = vsyncpa [#allocation4], 1 }
 0x429   :  { %4135 = vsyncpa [#allocation4 + $0x1], 1 }
 0x42a   :  { %4136 = vsyncpa [#allocation6], 1 }
 0x42b   :  { %4138 = vsyncpa [#allocation6 + $0x1], 1 }

</bundles_post_ra>
